<compile_context>
chip_gen: v5e
topology: v5e:2x2
jax: 0.10.0
libtpu: 0.0.40
codegen_flags: <defaults>
</compile_context>

<pallas_src>
import jax
import jax.numpy as jnp
import numpy as np
from jax.experimental import pallas as pl
from jax.experimental.pallas import tpu as pltpu

# Sequence length pinned by the module: final_conv_size = 10 * 37 => L0 = 160.
L0 = 160
L1, L2, L3 = 79, 76, 37          # lengths after conv1 / conv2 / conv3 (strided)
L3D = 74                         # dense (stride-1) conv3 length; h3[l] == h3d[2l]
C1, C2, C3, C4 = 32, 64, 64, 10  # channels after each conv
FEATURE_SIZE = 32                # args.feature_size (small, synthetic)


def _make_kernel(tb, feat):
    """Fused conv-stack + Linear kernel for a tile of `tb` batch elements."""

    def kernel(xcol_ref, w1_ref, b1_ref, w2_ref, b2_ref, w3_ref, b3_ref,
               w4_ref, b4_ref, wl_ref, bl_ref, o_ref):
        for b in range(tb):                                   # static unroll over tile
            xc = xcol_ref[b]                                  # (4, 79) im2col of conv1
            # conv1: (32,4)@(4,79) -> (32,79)
            h1 = jnp.maximum(
                jnp.dot(w1_ref[...], xc, preferred_element_type=jnp.float32)
                + b1_ref[...], 0.0)
            # conv2 (k=4, s=1): sum of 4 dense lane-offset matmuls -> (64,76)
            acc2 = jnp.dot(w2_ref[0], h1[:, 0:L2],
                           preferred_element_type=jnp.float32)
            for k in range(1, 4):
                acc2 = acc2 + jnp.dot(w2_ref[k], h1[:, k:k + L2],
                                      preferred_element_type=jnp.float32)
            h2 = jnp.maximum(acc2 + b2_ref[...], 0.0)         # (64, 76)
            # conv3 computed DENSE (stride 1, 74 positions); stride-2 subsample
            # is absorbed into the zero-interleaved Linear weight.
            acc3 = jnp.dot(w3_ref[0], h2[:, 0:L3D],
                           preferred_element_type=jnp.float32)
            for k in range(1, 3):
                acc3 = acc3 + jnp.dot(w3_ref[k], h2[:, k:k + L3D],
                                      preferred_element_type=jnp.float32)
            h3d = jnp.maximum(acc3 + b3_ref[...], 0.0)        # (64, 74)
            # conv4 (1x1): (10,64)@(64,74) -> (10,74)
            z = jnp.maximum(
                jnp.dot(w4_ref[...], h3d, preferred_element_type=jnp.float32)
                + b4_ref[...], 0.0)
            # Fused Linear without reshape: Q = z @ Wd, then sum diagonal blocks.
            q = jnp.dot(z, wl_ref[...],
                        preferred_element_type=jnp.float32)   # (10, 10*feat)
            row = q[0:1, 0:feat]
            for c in range(1, C4):
                row = row + q[c:c + 1, c * feat:(c + 1) * feat]
            o_ref[b:b + 1, :] = row + bl_ref[...]             # (1, feat)

    return kernel


def prepare_params(params):
    """Precompute kernel-layout weights ONCE (hoisted out of the jitted forward)."""
    (w1, b1), (w2, b2), (w3, b3), (w4, b4), (wl, bl) = params
    feat = wl.shape[0]
    w1cm = w1[:, 0, :].astype(jnp.float32)                      # (32, 4)
    w2cm = jnp.transpose(w2, (2, 0, 1)).astype(jnp.float32)     # (4, 64, 32) [k,o,i]
    w3cm = jnp.transpose(w3, (2, 0, 1)).astype(jnp.float32)     # (3, 64, 64)
    w4cm = w4[:, :, 0].astype(jnp.float32)                      # (10, 64)
    # Linear weight -> W[l, c, f] = wl[f, c*37 + l], flattened to (37, 10*feat),
    # then zero-interleaved along l to (74, 10*feat) so the dense conv3 output's
    # odd (invalid) positions contribute nothing.
    w_lcf = jnp.transpose(wl.reshape(feat, C4, L3), (2, 1, 0))  # (37, 10, feat)
    wd_even = w_lcf.reshape(L3, C4 * feat).astype(jnp.float32)  # (37, 10*feat)
    wld = jnp.zeros((L3D, C4 * feat), jnp.float32).at[0::2, :].set(wd_even)
    return (w1cm, b1.reshape(C1, 1).astype(jnp.float32),
            w2cm, b2.reshape(C2, 1).astype(jnp.float32),
            w3cm, b3.reshape(C3, 1).astype(jnp.float32),
            w4cm, b4.reshape(C4, 1).astype(jnp.float32),
            wld, bl.reshape(1, feat).astype(jnp.float32))


def nature_one_cnn_forward(x_ncl, prep):
    """x_ncl: (B, 1, 160) float32 (PyTorch NCW).  Returns (B, feature_size)."""
    (w1cm, b1c, w2cm, b2c, w3cm, b3c, w4cm, b4c, wld, blr) = prep
    B = x_ncl.shape[0]
    feat = blr.shape[1]

    x2 = x_ncl[:, 0, :].astype(jnp.float32)                     # (B, 160)
    # im2col for conv1 (k=4, stride=2): xcol[b, k, l] = x2[b, 2*l + k]
    xcol = jnp.stack([x2[:, k:k + 2 * L1:2] for k in range(4)], axis=1)  # (B,4,79)

    tb = B if B <= 8 else 8
    bp = -(-B // tb) * tb
    if bp != B:
        xcol = jnp.pad(xcol, ((0, bp - B), (0, 0), (0, 0)))

    kernel = _make_kernel(tb, feat)
    out = pl.pallas_call(
        kernel,
        out_shape=jax.ShapeDtypeStruct((bp, feat), jnp.float32),
        grid_spec=pltpu.PrefetchScalarGridSpec(
            num_scalar_prefetch=0,
            grid=(bp // tb,),
            in_specs=[
                pl.BlockSpec((tb, 4, L1), lambda i: (i, 0, 0)),      # xcol tile
                pl.BlockSpec((C1, 4), lambda i: (0, 0)),             # w1
                pl.BlockSpec((C1, 1), lambda i: (0, 0)),             # b1
                pl.BlockSpec((4, C2, C1), lambda i: (0, 0, 0)),      # w2
                pl.BlockSpec((C2, 1), lambda i: (0, 0)),             # b2
                pl.BlockSpec((3, C3, C2), lambda i: (0, 0, 0)),      # w3
                pl.BlockSpec((C3, 1), lambda i: (0, 0)),             # b3
                pl.BlockSpec((C4, C3), lambda i: (0, 0)),            # w4 (1x1)
                pl.BlockSpec((C4, 1), lambda i: (0, 0)),             # b4
                pl.BlockSpec((L3D, C4 * feat), lambda i: (0, 0)),    # fused Linear W
                pl.BlockSpec((1, feat), lambda i: (0, 0)),           # Linear bias
            ],
            out_specs=pl.BlockSpec((tb, feat), lambda i: (i, 0)),
        ),
        compiler_params=pltpu.CompilerParams(
            dimension_semantics=("parallel",)),
    )(xcol, w1cm, b1c, w2cm, b2c, w3cm, b3c, w4cm, b4c, wld, blr)
    return out[:B]


def _reference_forward(x_ncl, params):
    """Pure-JAX re-implementation of the PyTorch forward (for verification)."""
    (w1, b1), (w2, b2), (w3, b3), (w4, b4), (wl, bl) = params

    def conv1d(x, w, b, stride):
        y = jax.lax.conv_general_dilated(
            x, w, window_strides=(stride,), padding='VALID',
            dimension_numbers=('NCH', 'OIH', 'NCH'))
        return y + b[None, :, None]

    h = jax.nn.relu(conv1d(x_ncl, w1, b1, 2))
    h = jax.nn.relu(conv1d(h, w2, b2, 1))
    h = jax.nn.relu(conv1d(h, w3, b3, 2))
    h = jax.nn.relu(conv1d(h, w4, b4, 1))
    flat = h.reshape(h.shape[0], -1)            # torch Flatten: channel-major
    return flat @ wl.T + bl


def _init_params(key):
    ks = jax.random.split(key, 10)

    def w(k, shape, scale=0.1):
        return scale * jax.random.normal(k, shape, jnp.float32)

    params = (
        (w(ks[0], (C1, 1, 4)),              w(ks[1], (C1,))),
        (w(ks[2], (C2, C1, 4)),             w(ks[3], (C2,))),
        (w(ks[4], (C3, C2, 3)),             w(ks[5], (C3,))),
        (w(ks[6], (C4, C3, 1)),             w(ks[7], (C4,))),
        (w(ks[8], (FEATURE_SIZE, C4 * L3)), w(ks[9], (FEATURE_SIZE,))),
    )
    return params


if __name__ == "__main__":
    key = jax.random.PRNGKey(0)
    k_params, k_x = jax.random.split(key)
    params = _init_params(k_params)
    prep = prepare_params(params)      # weight permutations hoisted: run once

    B = 4
    x = jax.random.normal(k_x, (B, 1, L0), jnp.float32)   # PyTorch NCW input

    fwd = jax.jit(nature_one_cnn_forward)
    out = jax.block_until_ready(fwd(x, prep))

    ref = _reference_forward(x, params)
    np.testing.assert_allclose(np.asarray(out), np.asarray(ref), rtol=1e-4, atol=1e-4)
    assert out.shape == (B, FEATURE_SIZE)

    print("KERNEL_OK")
</pallas_src>

<mosaic_0001>
module attributes {stable_mosaic.version = 11 : i64} {
  func.func @kernel(%arg0: i32, %arg1: memref<4x4x79xf32, #tpu.memory_space<vmem>>, %arg2: memref<32x4xf32, #tpu.memory_space<vmem>>, %arg3: memref<32x1xf32, #tpu.memory_space<vmem>>, %arg4: memref<4x64x32xf32, #tpu.memory_space<vmem>>, %arg5: memref<64x1xf32, #tpu.memory_space<vmem>>, %arg6: memref<3x64x64xf32, #tpu.memory_space<vmem>>, %arg7: memref<64x1xf32, #tpu.memory_space<vmem>>, %arg8: memref<10x64xf32, #tpu.memory_space<vmem>>, %arg9: memref<10x1xf32, #tpu.memory_space<vmem>>, %arg10: memref<74x320xf32, #tpu.memory_space<vmem>>, %arg11: memref<1x32xf32, #tpu.memory_space<vmem>>, %arg12: memref<4x32xf32, #tpu.memory_space<vmem>>) attributes {dimension_semantics = [#tpu.dimension_semantics<parallel>], iteration_bounds = array<i64: 1>, scalar_prefetch = 0 : i64, scratch_operands = 0 : i64, tpu.core_type = #tpu.core_type<tc>, window_params = [{transform_indices = @transform_0, window_bounds = array<i64: 4, 4, 79>}, {pipeline_mode = #tpu.pipeline_mode<synchronous>, transform_indices = @transform_1, window_bounds = array<i64: 32, 4>}, {pipeline_mode = #tpu.pipeline_mode<synchronous>, transform_indices = @transform_2, window_bounds = array<i64: 32, 1>}, {pipeline_mode = #tpu.pipeline_mode<synchronous>, transform_indices = @transform_3, window_bounds = array<i64: 4, 64, 32>}, {pipeline_mode = #tpu.pipeline_mode<synchronous>, transform_indices = @transform_4, window_bounds = array<i64: 64, 1>}, {pipeline_mode = #tpu.pipeline_mode<synchronous>, transform_indices = @transform_5, window_bounds = array<i64: 3, 64, 64>}, {pipeline_mode = #tpu.pipeline_mode<synchronous>, transform_indices = @transform_6, window_bounds = array<i64: 64, 1>}, {pipeline_mode = #tpu.pipeline_mode<synchronous>, transform_indices = @transform_7, window_bounds = array<i64: 10, 64>}, {pipeline_mode = #tpu.pipeline_mode<synchronous>, transform_indices = @transform_8, window_bounds = array<i64: 10, 1>}, {pipeline_mode = #tpu.pipeline_mode<synchronous>, transform_indices = @transform_9, window_bounds = array<i64: 74, 320>}, {pipeline_mode = #tpu.pipeline_mode<synchronous>, transform_indices = @transform_10, window_bounds = array<i64: 1, 32>}, {transform_indices = @transform_11, window_bounds = array<i64: 4, 32>}]} {
    %c0 = arith.constant 0 : index
    %c0_0 = arith.constant 0 : index
    %c0_1 = arith.constant 0 : index
    %0 = vector.load %arg1[%c0, %c0_0, %c0_1] : memref<4x4x79xf32, #tpu.memory_space<vmem>>, vector<1x4x79xf32>
    %1 = vector.shape_cast %0 : vector<1x4x79xf32> to vector<4x79xf32>
    %c0_2 = arith.constant 0 : index
    %c0_3 = arith.constant 0 : index
    %2 = vector.load %arg2[%c0_2, %c0_3] : memref<32x4xf32, #tpu.memory_space<vmem>>, vector<32x4xf32>
    %cst = arith.constant dense<0.000000e+00> : vector<32x79xf32>
    %3 = tpu.matmul %2, %1, %cst {dimension_numbers = #tpu.dot_dimension_numbers<[1], [0], [0], [1], [0, 0, 1, 1], [], []>} : vector<32x4xf32>, vector<4x79xf32>, vector<32x79xf32> -> vector<32x79xf32>
    %c0_4 = arith.constant 0 : index
    %c0_5 = arith.constant 0 : index
    %4 = vector.load %arg3[%c0_4, %c0_5] : memref<32x1xf32, #tpu.memory_space<vmem>>, vector<32x1xf32>
    %5 = vector.broadcast %4 : vector<32x1xf32> to vector<32x79xf32>
    %6 = arith.addf %3, %5 : vector<32x79xf32>
    %cst_6 = arith.constant 0.000000e+00 : f32
    %7 = vector.broadcast %cst_6 : f32 to vector<32x79xf32>
    %8 = arith.maximumf %6, %7 : vector<32x79xf32>
    %c0_7 = arith.constant 0 : index
    %c0_8 = arith.constant 0 : index
    %c0_9 = arith.constant 0 : index
    %9 = vector.load %arg4[%c0_7, %c0_8, %c0_9] : memref<4x64x32xf32, #tpu.memory_space<vmem>>, vector<1x64x32xf32>
    %10 = vector.shape_cast %9 : vector<1x64x32xf32> to vector<64x32xf32>
    %11 = vector.extract_strided_slice %8 {offsets = [0, 0], sizes = [32, 76], strides = [1, 1]} : vector<32x79xf32> to vector<32x76xf32>
    %cst_10 = arith.constant dense<0.000000e+00> : vector<64x76xf32>
    %12 = tpu.matmul %10, %11, %cst_10 {dimension_numbers = #tpu.dot_dimension_numbers<[1], [0], [0], [1], [0, 0, 1, 1], [], []>} : vector<64x32xf32>, vector<32x76xf32>, vector<64x76xf32> -> vector<64x76xf32>
    %c1 = arith.constant 1 : index
    %c0_11 = arith.constant 0 : index
    %c0_12 = arith.constant 0 : index
    %13 = vector.load %arg4[%c1, %c0_11, %c0_12] : memref<4x64x32xf32, #tpu.memory_space<vmem>>, vector<1x64x32xf32>
    %14 = vector.shape_cast %13 : vector<1x64x32xf32> to vector<64x32xf32>
    %15 = vector.extract_strided_slice %8 {offsets = [0, 1], sizes = [32, 76], strides = [1, 1]} : vector<32x79xf32> to vector<32x76xf32>
    %cst_13 = arith.constant dense<0.000000e+00> : vector<64x76xf32>
    %16 = tpu.matmul %14, %15, %cst_13 {dimension_numbers = #tpu.dot_dimension_numbers<[1], [0], [0], [1], [0, 0, 1, 1], [], []>} : vector<64x32xf32>, vector<32x76xf32>, vector<64x76xf32> -> vector<64x76xf32>
    %17 = arith.addf %12, %16 : vector<64x76xf32>
    %c2 = arith.constant 2 : index
    %c0_14 = arith.constant 0 : index
    %c0_15 = arith.constant 0 : index
    %18 = vector.load %arg4[%c2, %c0_14, %c0_15] : memref<4x64x32xf32, #tpu.memory_space<vmem>>, vector<1x64x32xf32>
    %19 = vector.shape_cast %18 : vector<1x64x32xf32> to vector<64x32xf32>
    %20 = vector.extract_strided_slice %8 {offsets = [0, 2], sizes = [32, 76], strides = [1, 1]} : vector<32x79xf32> to vector<32x76xf32>
    %cst_16 = arith.constant dense<0.000000e+00> : vector<64x76xf32>
    %21 = tpu.matmul %19, %20, %cst_16 {dimension_numbers = #tpu.dot_dimension_numbers<[1], [0], [0], [1], [0, 0, 1, 1], [], []>} : vector<64x32xf32>, vector<32x76xf32>, vector<64x76xf32> -> vector<64x76xf32>
    %22 = arith.addf %17, %21 : vector<64x76xf32>
    %c3 = arith.constant 3 : index
    %c0_17 = arith.constant 0 : index
    %c0_18 = arith.constant 0 : index
    %23 = vector.load %arg4[%c3, %c0_17, %c0_18] : memref<4x64x32xf32, #tpu.memory_space<vmem>>, vector<1x64x32xf32>
    %24 = vector.shape_cast %23 : vector<1x64x32xf32> to vector<64x32xf32>
    %25 = vector.extract_strided_slice %8 {offsets = [0, 3], sizes = [32, 76], strides = [1, 1]} : vector<32x79xf32> to vector<32x76xf32>
    %cst_19 = arith.constant dense<0.000000e+00> : vector<64x76xf32>
    %26 = tpu.matmul %24, %25, %cst_19 {dimension_numbers = #tpu.dot_dimension_numbers<[1], [0], [0], [1], [0, 0, 1, 1], [], []>} : vector<64x32xf32>, vector<32x76xf32>, vector<64x76xf32> -> vector<64x76xf32>
    %27 = arith.addf %22, %26 : vector<64x76xf32>
    %c0_20 = arith.constant 0 : index
    %c0_21 = arith.constant 0 : index
    %28 = vector.load %arg5[%c0_20, %c0_21] : memref<64x1xf32, #tpu.memory_space<vmem>>, vector<64x1xf32>
    %29 = vector.broadcast %28 : vector<64x1xf32> to vector<64x76xf32>
    %30 = arith.addf %27, %29 : vector<64x76xf32>
    %cst_22 = arith.constant 0.000000e+00 : f32
    %31 = vector.broadcast %cst_22 : f32 to vector<64x76xf32>
    %32 = arith.maximumf %30, %31 : vector<64x76xf32>
    %c0_23 = arith.constant 0 : index
    %c0_24 = arith.constant 0 : index
    %c0_25 = arith.constant 0 : index
    %33 = vector.load %arg6[%c0_23, %c0_24, %c0_25] : memref<3x64x64xf32, #tpu.memory_space<vmem>>, vector<1x64x64xf32>
    %34 = vector.shape_cast %33 : vector<1x64x64xf32> to vector<64x64xf32>
    %35 = vector.extract_strided_slice %32 {offsets = [0, 0], sizes = [64, 74], strides = [1, 1]} : vector<64x76xf32> to vector<64x74xf32>
    %cst_26 = arith.constant dense<0.000000e+00> : vector<64x74xf32>
    %36 = tpu.matmul %34, %35, %cst_26 {dimension_numbers = #tpu.dot_dimension_numbers<[1], [0], [0], [1], [0, 0, 1, 1], [], []>} : vector<64x64xf32>, vector<64x74xf32>, vector<64x74xf32> -> vector<64x74xf32>
    %c1_27 = arith.constant 1 : index
    %c0_28 = arith.constant 0 : index
    %c0_29 = arith.constant 0 : index
    %37 = vector.load %arg6[%c1_27, %c0_28, %c0_29] : memref<3x64x64xf32, #tpu.memory_space<vmem>>, vector<1x64x64xf32>
    %38 = vector.shape_cast %37 : vector<1x64x64xf32> to vector<64x64xf32>
    %39 = vector.extract_strided_slice %32 {offsets = [0, 1], sizes = [64, 74], strides = [1, 1]} : vector<64x76xf32> to vector<64x74xf32>
    %cst_30 = arith.constant dense<0.000000e+00> : vector<64x74xf32>
    %40 = tpu.matmul %38, %39, %cst_30 {dimension_numbers = #tpu.dot_dimension_numbers<[1], [0], [0], [1], [0, 0, 1, 1], [], []>} : vector<64x64xf32>, vector<64x74xf32>, vector<64x74xf32> -> vector<64x74xf32>
    %41 = arith.addf %36, %40 : vector<64x74xf32>
    %c2_31 = arith.constant 2 : index
    %c0_32 = arith.constant 0 : index
    %c0_33 = arith.constant 0 : index
    %42 = vector.load %arg6[%c2_31, %c0_32, %c0_33] : memref<3x64x64xf32, #tpu.memory_space<vmem>>, vector<1x64x64xf32>
    %43 = vector.shape_cast %42 : vector<1x64x64xf32> to vector<64x64xf32>
    %44 = vector.extract_strided_slice %32 {offsets = [0, 2], sizes = [64, 74], strides = [1, 1]} : vector<64x76xf32> to vector<64x74xf32>
    %cst_34 = arith.constant dense<0.000000e+00> : vector<64x74xf32>
    %45 = tpu.matmul %43, %44, %cst_34 {dimension_numbers = #tpu.dot_dimension_numbers<[1], [0], [0], [1], [0, 0, 1, 1], [], []>} : vector<64x64xf32>, vector<64x74xf32>, vector<64x74xf32> -> vector<64x74xf32>
    %46 = arith.addf %41, %45 : vector<64x74xf32>
    %c0_35 = arith.constant 0 : index
    %c0_36 = arith.constant 0 : index
    %47 = vector.load %arg7[%c0_35, %c0_36] : memref<64x1xf32, #tpu.memory_space<vmem>>, vector<64x1xf32>
    %48 = vector.broadcast %47 : vector<64x1xf32> to vector<64x74xf32>
    %49 = arith.addf %46, %48 : vector<64x74xf32>
    %cst_37 = arith.constant 0.000000e+00 : f32
    %50 = vector.broadcast %cst_37 : f32 to vector<64x74xf32>
    %51 = arith.maximumf %49, %50 : vector<64x74xf32>
    %c0_38 = arith.constant 0 : index
    %c0_39 = arith.constant 0 : index
    %52 = vector.load %arg8[%c0_38, %c0_39] : memref<10x64xf32, #tpu.memory_space<vmem>>, vector<10x64xf32>
    %cst_40 = arith.constant dense<0.000000e+00> : vector<10x74xf32>
    %53 = tpu.matmul %52, %51, %cst_40 {dimension_numbers = #tpu.dot_dimension_numbers<[1], [0], [0], [1], [0, 0, 1, 1], [], []>} : vector<10x64xf32>, vector<64x74xf32>, vector<10x74xf32> -> vector<10x74xf32>
    %c0_41 = arith.constant 0 : index
    %c0_42 = arith.constant 0 : index
    %54 = vector.load %arg9[%c0_41, %c0_42] : memref<10x1xf32, #tpu.memory_space<vmem>>, vector<10x1xf32>
    %55 = vector.broadcast %54 : vector<10x1xf32> to vector<10x74xf32>
    %56 = arith.addf %53, %55 : vector<10x74xf32>
    %cst_43 = arith.constant 0.000000e+00 : f32
    %57 = vector.broadcast %cst_43 : f32 to vector<10x74xf32>
    %58 = arith.maximumf %56, %57 : vector<10x74xf32>
    %c0_44 = arith.constant 0 : index
    %c0_45 = arith.constant 0 : index
    %59 = vector.load %arg10[%c0_44, %c0_45] : memref<74x320xf32, #tpu.memory_space<vmem>>, vector<74x320xf32>
    %cst_46 = arith.constant dense<0.000000e+00> : vector<10x320xf32>
    %60 = tpu.matmul %58, %59, %cst_46 {dimension_numbers = #tpu.dot_dimension_numbers<[1], [0], [0], [1], [0, 0, 1, 1], [], []>} : vector<10x74xf32>, vector<74x320xf32>, vector<10x320xf32> -> vector<10x320xf32>
    %61 = vector.extract_strided_slice %60 {offsets = [0, 0], sizes = [1, 32], strides = [1, 1]} : vector<10x320xf32> to vector<1x32xf32>
    %62 = vector.extract_strided_slice %60 {offsets = [1, 32], sizes = [1, 32], strides = [1, 1]} : vector<10x320xf32> to vector<1x32xf32>
    %63 = arith.addf %61, %62 : vector<1x32xf32>
    %64 = vector.extract_strided_slice %60 {offsets = [2, 64], sizes = [1, 32], strides = [1, 1]} : vector<10x320xf32> to vector<1x32xf32>
    %65 = arith.addf %63, %64 : vector<1x32xf32>
    %66 = vector.extract_strided_slice %60 {offsets = [3, 96], sizes = [1, 32], strides = [1, 1]} : vector<10x320xf32> to vector<1x32xf32>
    %67 = arith.addf %65, %66 : vector<1x32xf32>
    %68 = vector.extract_strided_slice %60 {offsets = [4, 128], sizes = [1, 32], strides = [1, 1]} : vector<10x320xf32> to vector<1x32xf32>
    %69 = arith.addf %67, %68 : vector<1x32xf32>
    %70 = vector.extract_strided_slice %60 {offsets = [5, 160], sizes = [1, 32], strides = [1, 1]} : vector<10x320xf32> to vector<1x32xf32>
    %71 = arith.addf %69, %70 : vector<1x32xf32>
    %72 = vector.extract_strided_slice %60 {offsets = [6, 192], sizes = [1, 32], strides = [1, 1]} : vector<10x320xf32> to vector<1x32xf32>
    %73 = arith.addf %71, %72 : vector<1x32xf32>
    %74 = vector.extract_strided_slice %60 {offsets = [7, 224], sizes = [1, 32], strides = [1, 1]} : vector<10x320xf32> to vector<1x32xf32>
    %75 = arith.addf %73, %74 : vector<1x32xf32>
    %76 = vector.extract_strided_slice %60 {offsets = [8, 256], sizes = [1, 32], strides = [1, 1]} : vector<10x320xf32> to vector<1x32xf32>
    %77 = arith.addf %75, %76 : vector<1x32xf32>
    %78 = vector.extract_strided_slice %60 {offsets = [9, 288], sizes = [1, 32], strides = [1, 1]} : vector<10x320xf32> to vector<1x32xf32>
    %79 = arith.addf %77, %78 : vector<1x32xf32>
    %c0_47 = arith.constant 0 : index
    %c0_48 = arith.constant 0 : index
    %80 = vector.load %arg11[%c0_47, %c0_48] : memref<1x32xf32, #tpu.memory_space<vmem>>, vector<1x32xf32>
    %81 = arith.addf %79, %80 : vector<1x32xf32>
    %c0_49 = arith.constant 0 : index
    %c0_50 = arith.constant 0 : index
    %82 = vector.load %arg12[%c0_49, %c0_50] : memref<4x32xf32, #tpu.memory_space<vmem>>, vector<1x32xf32>
    tpu.vector_store %arg12[%c0_49, %c0_50], %81 {strides = array<i32>} : memref<4x32xf32, #tpu.memory_space<vmem>>, vector<1x32xf32>,
    %c1_51 = arith.constant 1 : index
    %c0_52 = arith.constant 0 : index
    %c0_53 = arith.constant 0 : index
    %83 = vector.load %arg1[%c1_51, %c0_52, %c0_53] : memref<4x4x79xf32, #tpu.memory_space<vmem>>, vector<1x4x79xf32>
    %84 = vector.shape_cast %83 : vector<1x4x79xf32> to vector<4x79xf32>
    %c0_54 = arith.constant 0 : index
    %c0_55 = arith.constant 0 : index
    %85 = vector.load %arg2[%c0_54, %c0_55] : memref<32x4xf32, #tpu.memory_space<vmem>>, vector<32x4xf32>
    %cst_56 = arith.constant dense<0.000000e+00> : vector<32x79xf32>
    %86 = tpu.matmul %85, %84, %cst_56 {dimension_numbers = #tpu.dot_dimension_numbers<[1], [0], [0], [1], [0, 0, 1, 1], [], []>} : vector<32x4xf32>, vector<4x79xf32>, vector<32x79xf32> -> vector<32x79xf32>
    %c0_57 = arith.constant 0 : index
    %c0_58 = arith.constant 0 : index
    %87 = vector.load %arg3[%c0_57, %c0_58] : memref<32x1xf32, #tpu.memory_space<vmem>>, vector<32x1xf32>
    %88 = vector.broadcast %87 : vector<32x1xf32> to vector<32x79xf32>
    %89 = arith.addf %86, %88 : vector<32x79xf32>
    %cst_59 = arith.constant 0.000000e+00 : f32
    %90 = vector.broadcast %cst_59 : f32 to vector<32x79xf32>
    %91 = arith.maximumf %89, %90 : vector<32x79xf32>
    %c0_60 = arith.constant 0 : index
    %c0_61 = arith.constant 0 : index
    %c0_62 = arith.constant 0 : index
    %92 = vector.load %arg4[%c0_60, %c0_61, %c0_62] : memref<4x64x32xf32, #tpu.memory_space<vmem>>, vector<1x64x32xf32>
    %93 = vector.shape_cast %92 : vector<1x64x32xf32> to vector<64x32xf32>
    %94 = vector.extract_strided_slice %91 {offsets = [0, 0], sizes = [32, 76], strides = [1, 1]} : vector<32x79xf32> to vector<32x76xf32>
    %cst_63 = arith.constant dense<0.000000e+00> : vector<64x76xf32>
    %95 = tpu.matmul %93, %94, %cst_63 {dimension_numbers = #tpu.dot_dimension_numbers<[1], [0], [0], [1], [0, 0, 1, 1], [], []>} : vector<64x32xf32>, vector<32x76xf32>, vector<64x76xf32> -> vector<64x76xf32>
    %c1_64 = arith.constant 1 : index
    %c0_65 = arith.constant 0 : index
    %c0_66 = arith.constant 0 : index
    %96 = vector.load %arg4[%c1_64, %c0_65, %c0_66] : memref<4x64x32xf32, #tpu.memory_space<vmem>>, vector<1x64x32xf32>
    %97 = vector.shape_cast %96 : vector<1x64x32xf32> to vector<64x32xf32>
    %98 = vector.extract_strided_slice %91 {offsets = [0, 1], sizes = [32, 76], strides = [1, 1]} : vector<32x79xf32> to vector<32x76xf32>
    %cst_67 = arith.constant dense<0.000000e+00> : vector<64x76xf32>
    %99 = tpu.matmul %97, %98, %cst_67 {dimension_numbers = #tpu.dot_dimension_numbers<[1], [0], [0], [1], [0, 0, 1, 1], [], []>} : vector<64x32xf32>, vector<32x76xf32>, vector<64x76xf32> -> vector<64x76xf32>
    %100 = arith.addf %95, %99 : vector<64x76xf32>
    %c2_68 = arith.constant 2 : index
    %c0_69 = arith.constant 0 : index
    %c0_70 = arith.constant 0 : index
    %101 = vector.load %arg4[%c2_68, %c0_69, %c0_70] : memref<4x64x32xf32, #tpu.memory_space<vmem>>, vector<1x64x32xf32>
    %102 = vector.shape_cast %101 : vector<1x64x32xf32> to vector<64x32xf32>
    %103 = vector.extract_strided_slice %91 {offsets = [0, 2], sizes = [32, 76], strides = [1, 1]} : vector<32x79xf32> to vector<32x76xf32>
    %cst_71 = arith.constant dense<0.000000e+00> : vector<64x76xf32>
    %104 = tpu.matmul %102, %103, %cst_71 {dimension_numbers = #tpu.dot_dimension_numbers<[1], [0], [0], [1], [0, 0, 1, 1], [], []>} : vector<64x32xf32>, vector<32x76xf32>, vector<64x76xf32> -> vector<64x76xf32>
    %105 = arith.addf %100, %104 : vector<64x76xf32>
    %c3_72 = arith.constant 3 : index
    %c0_73 = arith.constant 0 : index
    %c0_74 = arith.constant 0 : index
    %106 = vector.load %arg4[%c3_72, %c0_73, %c0_74] : memref<4x64x32xf32, #tpu.memory_space<vmem>>, vector<1x64x32xf32>
    %107 = vector.shape_cast %106 : vector<1x64x32xf32> to vector<64x32xf32>
    %108 = vector.extract_strided_slice %91 {offsets = [0, 3], sizes = [32, 76], strides = [1, 1]} : vector<32x79xf32> to vector<32x76xf32>
    %cst_75 = arith.constant dense<0.000000e+00> : vector<64x76xf32>
    %109 = tpu.matmul %107, %108, %cst_75 {dimension_numbers = #tpu.dot_dimension_numbers<[1], [0], [0], [1], [0, 0, 1, 1], [], []>} : vector<64x32xf32>, vector<32x76xf32>, vector<64x76xf32> -> vector<64x76xf32>
    %110 = arith.addf %105, %109 : vector<64x76xf32>
    %c0_76 = arith.constant 0 : index
    %c0_77 = arith.constant 0 : index
    %111 = vector.load %arg5[%c0_76, %c0_77] : memref<64x1xf32, #tpu.memory_space<vmem>>, vector<64x1xf32>
    %112 = vector.broadcast %111 : vector<64x1xf32> to vector<64x76xf32>
    %113 = arith.addf %110, %112 : vector<64x76xf32>
    %cst_78 = arith.constant 0.000000e+00 : f32
    %114 = vector.broadcast %cst_78 : f32 to vector<64x76xf32>
    %115 = arith.maximumf %113, %114 : vector<64x76xf32>
    %c0_79 = arith.constant 0 : index
    %c0_80 = arith.constant 0 : index
    %c0_81 = arith.constant 0 : index
    %116 = vector.load %arg6[%c0_79, %c0_80, %c0_81] : memref<3x64x64xf32, #tpu.memory_space<vmem>>, vector<1x64x64xf32>
    %117 = vector.shape_cast %116 : vector<1x64x64xf32> to vector<64x64xf32>
    %118 = vector.extract_strided_slice %115 {offsets = [0, 0], sizes = [64, 74], strides = [1, 1]} : vector<64x76xf32> to vector<64x74xf32>
    %cst_82 = arith.constant dense<0.000000e+00> : vector<64x74xf32>
    %119 = tpu.matmul %117, %118, %cst_82 {dimension_numbers = #tpu.dot_dimension_numbers<[1], [0], [0], [1], [0, 0, 1, 1], [], []>} : vector<64x64xf32>, vector<64x74xf32>, vector<64x74xf32> -> vector<64x74xf32>
    %c1_83 = arith.constant 1 : index
    %c0_84 = arith.constant 0 : index
    %c0_85 = arith.constant 0 : index
    %120 = vector.load %arg6[%c1_83, %c0_84, %c0_85] : memref<3x64x64xf32, #tpu.memory_space<vmem>>, vector<1x64x64xf32>
    %121 = vector.shape_cast %120 : vector<1x64x64xf32> to vector<64x64xf32>
    %122 = vector.extract_strided_slice %115 {offsets = [0, 1], sizes = [64, 74], strides = [1, 1]} : vector<64x76xf32> to vector<64x74xf32>
    %cst_86 = arith.constant dense<0.000000e+00> : vector<64x74xf32>
    %123 = tpu.matmul %121, %122, %cst_86 {dimension_numbers = #tpu.dot_dimension_numbers<[1], [0], [0], [1], [0, 0, 1, 1], [], []>} : vector<64x64xf32>, vector<64x74xf32>, vector<64x74xf32> -> vector<64x74xf32>
    %124 = arith.addf %119, %123 : vector<64x74xf32>
    %c2_87 = arith.constant 2 : index
    %c0_88 = arith.constant 0 : index
    %c0_89 = arith.constant 0 : index
    %125 = vector.load %arg6[%c2_87, %c0_88, %c0_89] : memref<3x64x64xf32, #tpu.memory_space<vmem>>, vector<1x64x64xf32>
    %126 = vector.shape_cast %125 : vector<1x64x64xf32> to vector<64x64xf32>
    %127 = vector.extract_strided_slice %115 {offsets = [0, 2], sizes = [64, 74], strides = [1, 1]} : vector<64x76xf32> to vector<64x74xf32>
    %cst_90 = arith.constant dense<0.000000e+00> : vector<64x74xf32>
    %128 = tpu.matmul %126, %127, %cst_90 {dimension_numbers = #tpu.dot_dimension_numbers<[1], [0], [0], [1], [0, 0, 1, 1], [], []>} : vector<64x64xf32>, vector<64x74xf32>, vector<64x74xf32> -> vector<64x74xf32>
    %129 = arith.addf %124, %128 : vector<64x74xf32>
    %c0_91 = arith.constant 0 : index
    %c0_92 = arith.constant 0 : index
    %130 = vector.load %arg7[%c0_91, %c0_92] : memref<64x1xf32, #tpu.memory_space<vmem>>, vector<64x1xf32>
    %131 = vector.broadcast %130 : vector<64x1xf32> to vector<64x74xf32>
    %132 = arith.addf %129, %131 : vector<64x74xf32>
    %cst_93 = arith.constant 0.000000e+00 : f32
    %133 = vector.broadcast %cst_93 : f32 to vector<64x74xf32>
    %134 = arith.maximumf %132, %133 : vector<64x74xf32>
    %c0_94 = arith.constant 0 : index
    %c0_95 = arith.constant 0 : index
    %135 = vector.load %arg8[%c0_94, %c0_95] : memref<10x64xf32, #tpu.memory_space<vmem>>, vector<10x64xf32>
    %cst_96 = arith.constant dense<0.000000e+00> : vector<10x74xf32>
    %136 = tpu.matmul %135, %134, %cst_96 {dimension_numbers = #tpu.dot_dimension_numbers<[1], [0], [0], [1], [0, 0, 1, 1], [], []>} : vector<10x64xf32>, vector<64x74xf32>, vector<10x74xf32> -> vector<10x74xf32>
    %c0_97 = arith.constant 0 : index
    %c0_98 = arith.constant 0 : index
    %137 = vector.load %arg9[%c0_97, %c0_98] : memref<10x1xf32, #tpu.memory_space<vmem>>, vector<10x1xf32>
    %138 = vector.broadcast %137 : vector<10x1xf32> to vector<10x74xf32>
    %139 = arith.addf %136, %138 : vector<10x74xf32>
    %cst_99 = arith.constant 0.000000e+00 : f32
    %140 = vector.broadcast %cst_99 : f32 to vector<10x74xf32>
    %141 = arith.maximumf %139, %140 : vector<10x74xf32>
    %c0_100 = arith.constant 0 : index
    %c0_101 = arith.constant 0 : index
    %142 = vector.load %arg10[%c0_100, %c0_101] : memref<74x320xf32, #tpu.memory_space<vmem>>, vector<74x320xf32>
    %cst_102 = arith.constant dense<0.000000e+00> : vector<10x320xf32>
    %143 = tpu.matmul %141, %142, %cst_102 {dimension_numbers = #tpu.dot_dimension_numbers<[1], [0], [0], [1], [0, 0, 1, 1], [], []>} : vector<10x74xf32>, vector<74x320xf32>, vector<10x320xf32> -> vector<10x320xf32>
    %144 = vector.extract_strided_slice %143 {offsets = [0, 0], sizes = [1, 32], strides = [1, 1]} : vector<10x320xf32> to vector<1x32xf32>
    %145 = vector.extract_strided_slice %143 {offsets = [1, 32], sizes = [1, 32], strides = [1, 1]} : vector<10x320xf32> to vector<1x32xf32>
    %146 = arith.addf %144, %145 : vector<1x32xf32>
    %147 = vector.extract_strided_slice %143 {offsets = [2, 64], sizes = [1, 32], strides = [1, 1]} : vector<10x320xf32> to vector<1x32xf32>
    %148 = arith.addf %146, %147 : vector<1x32xf32>
    %149 = vector.extract_strided_slice %143 {offsets = [3, 96], sizes = [1, 32], strides = [1, 1]} : vector<10x320xf32> to vector<1x32xf32>
    %150 = arith.addf %148, %149 : vector<1x32xf32>
    %151 = vector.extract_strided_slice %143 {offsets = [4, 128], sizes = [1, 32], strides = [1, 1]} : vector<10x320xf32> to vector<1x32xf32>
    %152 = arith.addf %150, %151 : vector<1x32xf32>
    %153 = vector.extract_strided_slice %143 {offsets = [5, 160], sizes = [1, 32], strides = [1, 1]} : vector<10x320xf32> to vector<1x32xf32>
    %154 = arith.addf %152, %153 : vector<1x32xf32>
    %155 = vector.extract_strided_slice %143 {offsets = [6, 192], sizes = [1, 32], strides = [1, 1]} : vector<10x320xf32> to vector<1x32xf32>
    %156 = arith.addf %154, %155 : vector<1x32xf32>
    %157 = vector.extract_strided_slice %143 {offsets = [7, 224], sizes = [1, 32], strides = [1, 1]} : vector<10x320xf32> to vector<1x32xf32>
    %158 = arith.addf %156, %157 : vector<1x32xf32>
    %159 = vector.extract_strided_slice %143 {offsets = [8, 256], sizes = [1, 32], strides = [1, 1]} : vector<10x320xf32> to vector<1x32xf32>
    %160 = arith.addf %158, %159 : vector<1x32xf32>
    %161 = vector.extract_strided_slice %143 {offsets = [9, 288], sizes = [1, 32], strides = [1, 1]} : vector<10x320xf32> to vector<1x32xf32>
    %162 = arith.addf %160, %161 : vector<1x32xf32>
    %c0_103 = arith.constant 0 : index
    %c0_104 = arith.constant 0 : index
    %163 = vector.load %arg11[%c0_103, %c0_104] : memref<1x32xf32, #tpu.memory_space<vmem>>, vector<1x32xf32>
    %164 = arith.addf %162, %163 : vector<1x32xf32>
    %c1_105 = arith.constant 1 : index
    %c0_106 = arith.constant 0 : index
    %165 = vector.load %arg12[%c1_105, %c0_106] : memref<4x32xf32, #tpu.memory_space<vmem>>, vector<1x32xf32>
    tpu.vector_store %arg12[%c1_105, %c0_106], %164 {strides = array<i32>} : memref<4x32xf32, #tpu.memory_space<vmem>>, vector<1x32xf32>,
    %c2_107 = arith.constant 2 : index
    %c0_108 = arith.constant 0 : index
    %c0_109 = arith.constant 0 : index
    %166 = vector.load %arg1[%c2_107, %c0_108, %c0_109] : memref<4x4x79xf32, #tpu.memory_space<vmem>>, vector<1x4x79xf32>
    %167 = vector.shape_cast %166 : vector<1x4x79xf32> to vector<4x79xf32>
    %c0_110 = arith.constant 0 : index
    %c0_111 = arith.constant 0 : index
    %168 = vector.load %arg2[%c0_110, %c0_111] : memref<32x4xf32, #tpu.memory_space<vmem>>, vector<32x4xf32>
    %cst_112 = arith.constant dense<0.000000e+00> : vector<32x79xf32>
    %169 = tpu.matmul %168, %167, %cst_112 {dimension_numbers = #tpu.dot_dimension_numbers<[1], [0], [0], [1], [0, 0, 1, 1], [], []>} : vector<32x4xf32>, vector<4x79xf32>, vector<32x79xf32> -> vector<32x79xf32>
    %c0_113 = arith.constant 0 : index
    %c0_114 = arith.constant 0 : index
    %170 = vector.load %arg3[%c0_113, %c0_114] : memref<32x1xf32, #tpu.memory_space<vmem>>, vector<32x1xf32>
    %171 = vector.broadcast %170 : vector<32x1xf32> to vector<32x79xf32>
    %172 = arith.addf %169, %171 : vector<32x79xf32>
    %cst_115 = arith.constant 0.000000e+00 : f32
    %173 = vector.broadcast %cst_115 : f32 to vector<32x79xf32>
    %174 = arith.maximumf %172, %173 : vector<32x79xf32>
    %c0_116 = arith.constant 0 : index
    %c0_117 = arith.constant 0 : index
    %c0_118 = arith.constant 0 : index
    %175 = vector.load %arg4[%c0_116, %c0_117, %c0_118] : memref<4x64x32xf32, #tpu.memory_space<vmem>>, vector<1x64x32xf32>
    %176 = vector.shape_cast %175 : vector<1x64x32xf32> to vector<64x32xf32>
    %177 = vector.extract_strided_slice %174 {offsets = [0, 0], sizes = [32, 76], strides = [1, 1]} : vector<32x79xf32> to vector<32x76xf32>
    %cst_119 = arith.constant dense<0.000000e+00> : vector<64x76xf32>
    %178 = tpu.matmul %176, %177, %cst_119 {dimension_numbers = #tpu.dot_dimension_numbers<[1], [0], [0], [1], [0, 0, 1, 1], [], []>} : vector<64x32xf32>, vector<32x76xf32>, vector<64x76xf32> -> vector<64x76xf32>
    %c1_120 = arith.constant 1 : index
    %c0_121 = arith.constant 0 : index
    %c0_122 = arith.constant 0 : index
    %179 = vector.load %arg4[%c1_120, %c0_121, %c0_122] : memref<4x64x32xf32, #tpu.memory_space<vmem>>, vector<1x64x32xf32>
    %180 = vector.shape_cast %179 : vector<1x64x32xf32> to vector<64x32xf32>
    %181 = vector.extract_strided_slice %174 {offsets = [0, 1], sizes = [32, 76], strides = [1, 1]} : vector<32x79xf32> to vector<32x76xf32>
    %cst_123 = arith.constant dense<0.000000e+00> : vector<64x76xf32>
    %182 = tpu.matmul %180, %181, %cst_123 {dimension_numbers = #tpu.dot_dimension_numbers<[1], [0], [0], [1], [0, 0, 1, 1], [], []>} : vector<64x32xf32>, vector<32x76xf32>, vector<64x76xf32> -> vector<64x76xf32>
    %183 = arith.addf %178, %182 : vector<64x76xf32>
    %c2_124 = arith.constant 2 : index
    %c0_125 = arith.constant 0 : index
    %c0_126 = arith.constant 0 : index
    %184 = vector.load %arg4[%c2_124, %c0_125, %c0_126] : memref<4x64x32xf32, #tpu.memory_space<vmem>>, vector<1x64x32xf32>
    %185 = vector.shape_cast %184 : vector<1x64x32xf32> to vector<64x32xf32>
    %186 = vector.extract_strided_slice %174 {offsets = [0, 2], sizes = [32, 76], strides = [1, 1]} : vector<32x79xf32> to vector<32x76xf32>
    %cst_127 = arith.constant dense<0.000000e+00> : vector<64x76xf32>
    %187 = tpu.matmul %185, %186, %cst_127 {dimension_numbers = #tpu.dot_dimension_numbers<[1], [0], [0], [1], [0, 0, 1, 1], [], []>} : vector<64x32xf32>, vector<32x76xf32>, vector<64x76xf32> -> vector<64x76xf32>
    %188 = arith.addf %183, %187 : vector<64x76xf32>
    %c3_128 = arith.constant 3 : index
    %c0_129 = arith.constant 0 : index
    %c0_130 = arith.constant 0 : index
    %189 = vector.load %arg4[%c3_128, %c0_129, %c0_130] : memref<4x64x32xf32, #tpu.memory_space<vmem>>, vector<1x64x32xf32>
    %190 = vector.shape_cast %189 : vector<1x64x32xf32> to vector<64x32xf32>
    %191 = vector.extract_strided_slice %174 {offsets = [0, 3], sizes = [32, 76], strides = [1, 1]} : vector<32x79xf32> to vector<32x76xf32>
    %cst_131 = arith.constant dense<0.000000e+00> : vector<64x76xf32>
    %192 = tpu.matmul %190, %191, %cst_131 {dimension_numbers = #tpu.dot_dimension_numbers<[1], [0], [0], [1], [0, 0, 1, 1], [], []>} : vector<64x32xf32>, vector<32x76xf32>, vector<64x76xf32> -> vector<64x76xf32>
    %193 = arith.addf %188, %192 : vector<64x76xf32>
    %c0_132 = arith.constant 0 : index
    %c0_133 = arith.constant 0 : index
    %194 = vector.load %arg5[%c0_132, %c0_133] : memref<64x1xf32, #tpu.memory_space<vmem>>, vector<64x1xf32>
    %195 = vector.broadcast %194 : vector<64x1xf32> to vector<64x76xf32>
    %196 = arith.addf %193, %195 : vector<64x76xf32>
    %cst_134 = arith.constant 0.000000e+00 : f32
    %197 = vector.broadcast %cst_134 : f32 to vector<64x76xf32>
    %198 = arith.maximumf %196, %197 : vector<64x76xf32>
    %c0_135 = arith.constant 0 : index
    %c0_136 = arith.constant 0 : index
    %c0_137 = arith.constant 0 : index
    %199 = vector.load %arg6[%c0_135, %c0_136, %c0_137] : memref<3x64x64xf32, #tpu.memory_space<vmem>>, vector<1x64x64xf32>
    %200 = vector.shape_cast %199 : vector<1x64x64xf32> to vector<64x64xf32>
    %201 = vector.extract_strided_slice %198 {offsets = [0, 0], sizes = [64, 74], strides = [1, 1]} : vector<64x76xf32> to vector<64x74xf32>
    %cst_138 = arith.constant dense<0.000000e+00> : vector<64x74xf32>
    %202 = tpu.matmul %200, %201, %cst_138 {dimension_numbers = #tpu.dot_dimension_numbers<[1], [0], [0], [1], [0, 0, 1, 1], [], []>} : vector<64x64xf32>, vector<64x74xf32>, vector<64x74xf32> -> vector<64x74xf32>
    %c1_139 = arith.constant 1 : index
    %c0_140 = arith.constant 0 : index
    %c0_141 = arith.constant 0 : index
    %203 = vector.load %arg6[%c1_139, %c0_140, %c0_141] : memref<3x64x64xf32, #tpu.memory_space<vmem>>, vector<1x64x64xf32>
    %204 = vector.shape_cast %203 : vector<1x64x64xf32> to vector<64x64xf32>
    %205 = vector.extract_strided_slice %198 {offsets = [0, 1], sizes = [64, 74], strides = [1, 1]} : vector<64x76xf32> to vector<64x74xf32>
    %cst_142 = arith.constant dense<0.000000e+00> : vector<64x74xf32>
    %206 = tpu.matmul %204, %205, %cst_142 {dimension_numbers = #tpu.dot_dimension_numbers<[1], [0], [0], [1], [0, 0, 1, 1], [], []>} : vector<64x64xf32>, vector<64x74xf32>, vector<64x74xf32> -> vector<64x74xf32>
    %207 = arith.addf %202, %206 : vector<64x74xf32>
    %c2_143 = arith.constant 2 : index
    %c0_144 = arith.constant 0 : index
    %c0_145 = arith.constant 0 : index
    %208 = vector.load %arg6[%c2_143, %c0_144, %c0_145] : memref<3x64x64xf32, #tpu.memory_space<vmem>>, vector<1x64x64xf32>
    %209 = vector.shape_cast %208 : vector<1x64x64xf32> to vector<64x64xf32>
    %210 = vector.extract_strided_slice %198 {offsets = [0, 2], sizes = [64, 74], strides = [1, 1]} : vector<64x76xf32> to vector<64x74xf32>
    %cst_146 = arith.constant dense<0.000000e+00> : vector<64x74xf32>
    %211 = tpu.matmul %209, %210, %cst_146 {dimension_numbers = #tpu.dot_dimension_numbers<[1], [0], [0], [1], [0, 0, 1, 1], [], []>} : vector<64x64xf32>, vector<64x74xf32>, vector<64x74xf32> -> vector<64x74xf32>
    %212 = arith.addf %207, %211 : vector<64x74xf32>
    %c0_147 = arith.constant 0 : index
    %c0_148 = arith.constant 0 : index
    %213 = vector.load %arg7[%c0_147, %c0_148] : memref<64x1xf32, #tpu.memory_space<vmem>>, vector<64x1xf32>
    %214 = vector.broadcast %213 : vector<64x1xf32> to vector<64x74xf32>
    %215 = arith.addf %212, %214 : vector<64x74xf32>
    %cst_149 = arith.constant 0.000000e+00 : f32
    %216 = vector.broadcast %cst_149 : f32 to vector<64x74xf32>
    %217 = arith.maximumf %215, %216 : vector<64x74xf32>
    %c0_150 = arith.constant 0 : index
    %c0_151 = arith.constant 0 : index
    %218 = vector.load %arg8[%c0_150, %c0_151] : memref<10x64xf32, #tpu.memory_space<vmem>>, vector<10x64xf32>
    %cst_152 = arith.constant dense<0.000000e+00> : vector<10x74xf32>
    %219 = tpu.matmul %218, %217, %cst_152 {dimension_numbers = #tpu.dot_dimension_numbers<[1], [0], [0], [1], [0, 0, 1, 1], [], []>} : vector<10x64xf32>, vector<64x74xf32>, vector<10x74xf32> -> vector<10x74xf32>
    %c0_153 = arith.constant 0 : index
    %c0_154 = arith.constant 0 : index
    %220 = vector.load %arg9[%c0_153, %c0_154] : memref<10x1xf32, #tpu.memory_space<vmem>>, vector<10x1xf32>
    %221 = vector.broadcast %220 : vector<10x1xf32> to vector<10x74xf32>
    %222 = arith.addf %219, %221 : vector<10x74xf32>
    %cst_155 = arith.constant 0.000000e+00 : f32
    %223 = vector.broadcast %cst_155 : f32 to vector<10x74xf32>
    %224 = arith.maximumf %222, %223 : vector<10x74xf32>
    %c0_156 = arith.constant 0 : index
    %c0_157 = arith.constant 0 : index
    %225 = vector.load %arg10[%c0_156, %c0_157] : memref<74x320xf32, #tpu.memory_space<vmem>>, vector<74x320xf32>
    %cst_158 = arith.constant dense<0.000000e+00> : vector<10x320xf32>
    %226 = tpu.matmul %224, %225, %cst_158 {dimension_numbers = #tpu.dot_dimension_numbers<[1], [0], [0], [1], [0, 0, 1, 1], [], []>} : vector<10x74xf32>, vector<74x320xf32>, vector<10x320xf32> -> vector<10x320xf32>
    %227 = vector.extract_strided_slice %226 {offsets = [0, 0], sizes = [1, 32], strides = [1, 1]} : vector<10x320xf32> to vector<1x32xf32>
    %228 = vector.extract_strided_slice %226 {offsets = [1, 32], sizes = [1, 32], strides = [1, 1]} : vector<10x320xf32> to vector<1x32xf32>
    %229 = arith.addf %227, %228 : vector<1x32xf32>
    %230 = vector.extract_strided_slice %226 {offsets = [2, 64], sizes = [1, 32], strides = [1, 1]} : vector<10x320xf32> to vector<1x32xf32>
    %231 = arith.addf %229, %230 : vector<1x32xf32>
    %232 = vector.extract_strided_slice %226 {offsets = [3, 96], sizes = [1, 32], strides = [1, 1]} : vector<10x320xf32> to vector<1x32xf32>
    %233 = arith.addf %231, %232 : vector<1x32xf32>
    %234 = vector.extract_strided_slice %226 {offsets = [4, 128], sizes = [1, 32], strides = [1, 1]} : vector<10x320xf32> to vector<1x32xf32>
    %235 = arith.addf %233, %234 : vector<1x32xf32>
    %236 = vector.extract_strided_slice %226 {offsets = [5, 160], sizes = [1, 32], strides = [1, 1]} : vector<10x320xf32> to vector<1x32xf32>
    %237 = arith.addf %235, %236 : vector<1x32xf32>
    %238 = vector.extract_strided_slice %226 {offsets = [6, 192], sizes = [1, 32], strides = [1, 1]} : vector<10x320xf32> to vector<1x32xf32>
    %239 = arith.addf %237, %238 : vector<1x32xf32>
    %240 = vector.extract_strided_slice %226 {offsets = [7, 224], sizes = [1, 32], strides = [1, 1]} : vector<10x320xf32> to vector<1x32xf32>
    %241 = arith.addf %239, %240 : vector<1x32xf32>
    %242 = vector.extract_strided_slice %226 {offsets = [8, 256], sizes = [1, 32], strides = [1, 1]} : vector<10x320xf32> to vector<1x32xf32>
    %243 = arith.addf %241, %242 : vector<1x32xf32>
    %244 = vector.extract_strided_slice %226 {offsets = [9, 288], sizes = [1, 32], strides = [1, 1]} : vector<10x320xf32> to vector<1x32xf32>
    %245 = arith.addf %243, %244 : vector<1x32xf32>
    %c0_159 = arith.constant 0 : index
    %c0_160 = arith.constant 0 : index
    %246 = vector.load %arg11[%c0_159, %c0_160] : memref<1x32xf32, #tpu.memory_space<vmem>>, vector<1x32xf32>
    %247 = arith.addf %245, %246 : vector<1x32xf32>
    %c2_161 = arith.constant 2 : index
    %c0_162 = arith.constant 0 : index
    %248 = vector.load %arg12[%c2_161, %c0_162] : memref<4x32xf32, #tpu.memory_space<vmem>>, vector<1x32xf32>
    tpu.vector_store %arg12[%c2_161, %c0_162], %247 {strides = array<i32>} : memref<4x32xf32, #tpu.memory_space<vmem>>, vector<1x32xf32>,
    %c3_163 = arith.constant 3 : index
    %c0_164 = arith.constant 0 : index
    %c0_165 = arith.constant 0 : index
    %249 = vector.load %arg1[%c3_163, %c0_164, %c0_165] : memref<4x4x79xf32, #tpu.memory_space<vmem>>, vector<1x4x79xf32>
    %250 = vector.shape_cast %249 : vector<1x4x79xf32> to vector<4x79xf32>
    %c0_166 = arith.constant 0 : index
    %c0_167 = arith.constant 0 : index
    %251 = vector.load %arg2[%c0_166, %c0_167] : memref<32x4xf32, #tpu.memory_space<vmem>>, vector<32x4xf32>
    %cst_168 = arith.constant dense<0.000000e+00> : vector<32x79xf32>
    %252 = tpu.matmul %251, %250, %cst_168 {dimension_numbers = #tpu.dot_dimension_numbers<[1], [0], [0], [1], [0, 0, 1, 1], [], []>} : vector<32x4xf32>, vector<4x79xf32>, vector<32x79xf32> -> vector<32x79xf32>
    %c0_169 = arith.constant 0 : index
    %c0_170 = arith.constant 0 : index
    %253 = vector.load %arg3[%c0_169, %c0_170] : memref<32x1xf32, #tpu.memory_space<vmem>>, vector<32x1xf32>
    %254 = vector.broadcast %253 : vector<32x1xf32> to vector<32x79xf32>
    %255 = arith.addf %252, %254 : vector<32x79xf32>
    %cst_171 = arith.constant 0.000000e+00 : f32
    %256 = vector.broadcast %cst_171 : f32 to vector<32x79xf32>
    %257 = arith.maximumf %255, %256 : vector<32x79xf32>
    %c0_172 = arith.constant 0 : index
    %c0_173 = arith.constant 0 : index
    %c0_174 = arith.constant 0 : index
    %258 = vector.load %arg4[%c0_172, %c0_173, %c0_174] : memref<4x64x32xf32, #tpu.memory_space<vmem>>, vector<1x64x32xf32>
    %259 = vector.shape_cast %258 : vector<1x64x32xf32> to vector<64x32xf32>
    %260 = vector.extract_strided_slice %257 {offsets = [0, 0], sizes = [32, 76], strides = [1, 1]} : vector<32x79xf32> to vector<32x76xf32>
    %cst_175 = arith.constant dense<0.000000e+00> : vector<64x76xf32>
    %261 = tpu.matmul %259, %260, %cst_175 {dimension_numbers = #tpu.dot_dimension_numbers<[1], [0], [0], [1], [0, 0, 1, 1], [], []>} : vector<64x32xf32>, vector<32x76xf32>, vector<64x76xf32> -> vector<64x76xf32>
    %c1_176 = arith.constant 1 : index
    %c0_177 = arith.constant 0 : index
    %c0_178 = arith.constant 0 : index
    %262 = vector.load %arg4[%c1_176, %c0_177, %c0_178] : memref<4x64x32xf32, #tpu.memory_space<vmem>>, vector<1x64x32xf32>
    %263 = vector.shape_cast %262 : vector<1x64x32xf32> to vector<64x32xf32>
    %264 = vector.extract_strided_slice %257 {offsets = [0, 1], sizes = [32, 76], strides = [1, 1]} : vector<32x79xf32> to vector<32x76xf32>
    %cst_179 = arith.constant dense<0.000000e+00> : vector<64x76xf32>
    %265 = tpu.matmul %263, %264, %cst_179 {dimension_numbers = #tpu.dot_dimension_numbers<[1], [0], [0], [1], [0, 0, 1, 1], [], []>} : vector<64x32xf32>, vector<32x76xf32>, vector<64x76xf32> -> vector<64x76xf32>
    %266 = arith.addf %261, %265 : vector<64x76xf32>
    %c2_180 = arith.constant 2 : index
    %c0_181 = arith.constant 0 : index
    %c0_182 = arith.constant 0 : index
    %267 = vector.load %arg4[%c2_180, %c0_181, %c0_182] : memref<4x64x32xf32, #tpu.memory_space<vmem>>, vector<1x64x32xf32>
    %268 = vector.shape_cast %267 : vector<1x64x32xf32> to vector<64x32xf32>
    %269 = vector.extract_strided_slice %257 {offsets = [0, 2], sizes = [32, 76], strides = [1, 1]} : vector<32x79xf32> to vector<32x76xf32>
    %cst_183 = arith.constant dense<0.000000e+00> : vector<64x76xf32>
    %270 = tpu.matmul %268, %269, %cst_183 {dimension_numbers = #tpu.dot_dimension_numbers<[1], [0], [0], [1], [0, 0, 1, 1], [], []>} : vector<64x32xf32>, vector<32x76xf32>, vector<64x76xf32> -> vector<64x76xf32>
    %271 = arith.addf %266, %270 : vector<64x76xf32>
    %c3_184 = arith.constant 3 : index
    %c0_185 = arith.constant 0 : index
    %c0_186 = arith.constant 0 : index
    %272 = vector.load %arg4[%c3_184, %c0_185, %c0_186] : memref<4x64x32xf32, #tpu.memory_space<vmem>>, vector<1x64x32xf32>
    %273 = vector.shape_cast %272 : vector<1x64x32xf32> to vector<64x32xf32>
    %274 = vector.extract_strided_slice %257 {offsets = [0, 3], sizes = [32, 76], strides = [1, 1]} : vector<32x79xf32> to vector<32x76xf32>
    %cst_187 = arith.constant dense<0.000000e+00> : vector<64x76xf32>
    %275 = tpu.matmul %273, %274, %cst_187 {dimension_numbers = #tpu.dot_dimension_numbers<[1], [0], [0], [1], [0, 0, 1, 1], [], []>} : vector<64x32xf32>, vector<32x76xf32>, vector<64x76xf32> -> vector<64x76xf32>
    %276 = arith.addf %271, %275 : vector<64x76xf32>
    %c0_188 = arith.constant 0 : index
    %c0_189 = arith.constant 0 : index
    %277 = vector.load %arg5[%c0_188, %c0_189] : memref<64x1xf32, #tpu.memory_space<vmem>>, vector<64x1xf32>
    %278 = vector.broadcast %277 : vector<64x1xf32> to vector<64x76xf32>
    %279 = arith.addf %276, %278 : vector<64x76xf32>
    %cst_190 = arith.constant 0.000000e+00 : f32
    %280 = vector.broadcast %cst_190 : f32 to vector<64x76xf32>
    %281 = arith.maximumf %279, %280 : vector<64x76xf32>
    %c0_191 = arith.constant 0 : index
    %c0_192 = arith.constant 0 : index
    %c0_193 = arith.constant 0 : index
    %282 = vector.load %arg6[%c0_191, %c0_192, %c0_193] : memref<3x64x64xf32, #tpu.memory_space<vmem>>, vector<1x64x64xf32>
    %283 = vector.shape_cast %282 : vector<1x64x64xf32> to vector<64x64xf32>
    %284 = vector.extract_strided_slice %281 {offsets = [0, 0], sizes = [64, 74], strides = [1, 1]} : vector<64x76xf32> to vector<64x74xf32>
    %cst_194 = arith.constant dense<0.000000e+00> : vector<64x74xf32>
    %285 = tpu.matmul %283, %284, %cst_194 {dimension_numbers = #tpu.dot_dimension_numbers<[1], [0], [0], [1], [0, 0, 1, 1], [], []>} : vector<64x64xf32>, vector<64x74xf32>, vector<64x74xf32> -> vector<64x74xf32>
    %c1_195 = arith.constant 1 : index
    %c0_196 = arith.constant 0 : index
    %c0_197 = arith.constant 0 : index
    %286 = vector.load %arg6[%c1_195, %c0_196, %c0_197] : memref<3x64x64xf32, #tpu.memory_space<vmem>>, vector<1x64x64xf32>
    %287 = vector.shape_cast %286 : vector<1x64x64xf32> to vector<64x64xf32>
    %288 = vector.extract_strided_slice %281 {offsets = [0, 1], sizes = [64, 74], strides = [1, 1]} : vector<64x76xf32> to vector<64x74xf32>
    %cst_198 = arith.constant dense<0.000000e+00> : vector<64x74xf32>
    %289 = tpu.matmul %287, %288, %cst_198 {dimension_numbers = #tpu.dot_dimension_numbers<[1], [0], [0], [1], [0, 0, 1, 1], [], []>} : vector<64x64xf32>, vector<64x74xf32>, vector<64x74xf32> -> vector<64x74xf32>
    %290 = arith.addf %285, %289 : vector<64x74xf32>
    %c2_199 = arith.constant 2 : index
    %c0_200 = arith.constant 0 : index
    %c0_201 = arith.constant 0 : index
    %291 = vector.load %arg6[%c2_199, %c0_200, %c0_201] : memref<3x64x64xf32, #tpu.memory_space<vmem>>, vector<1x64x64xf32>
    %292 = vector.shape_cast %291 : vector<1x64x64xf32> to vector<64x64xf32>
    %293 = vector.extract_strided_slice %281 {offsets = [0, 2], sizes = [64, 74], strides = [1, 1]} : vector<64x76xf32> to vector<64x74xf32>
    %cst_202 = arith.constant dense<0.000000e+00> : vector<64x74xf32>
    %294 = tpu.matmul %292, %293, %cst_202 {dimension_numbers = #tpu.dot_dimension_numbers<[1], [0], [0], [1], [0, 0, 1, 1], [], []>} : vector<64x64xf32>, vector<64x74xf32>, vector<64x74xf32> -> vector<64x74xf32>
    %295 = arith.addf %290, %294 : vector<64x74xf32>
    %c0_203 = arith.constant 0 : index
    %c0_204 = arith.constant 0 : index
    %296 = vector.load %arg7[%c0_203, %c0_204] : memref<64x1xf32, #tpu.memory_space<vmem>>, vector<64x1xf32>
    %297 = vector.broadcast %296 : vector<64x1xf32> to vector<64x74xf32>
    %298 = arith.addf %295, %297 : vector<64x74xf32>
    %cst_205 = arith.constant 0.000000e+00 : f32
    %299 = vector.broadcast %cst_205 : f32 to vector<64x74xf32>
    %300 = arith.maximumf %298, %299 : vector<64x74xf32>
    %c0_206 = arith.constant 0 : index
    %c0_207 = arith.constant 0 : index
    %301 = vector.load %arg8[%c0_206, %c0_207] : memref<10x64xf32, #tpu.memory_space<vmem>>, vector<10x64xf32>
    %cst_208 = arith.constant dense<0.000000e+00> : vector<10x74xf32>
    %302 = tpu.matmul %301, %300, %cst_208 {dimension_numbers = #tpu.dot_dimension_numbers<[1], [0], [0], [1], [0, 0, 1, 1], [], []>} : vector<10x64xf32>, vector<64x74xf32>, vector<10x74xf32> -> vector<10x74xf32>
    %c0_209 = arith.constant 0 : index
    %c0_210 = arith.constant 0 : index
    %303 = vector.load %arg9[%c0_209, %c0_210] : memref<10x1xf32, #tpu.memory_space<vmem>>, vector<10x1xf32>
    %304 = vector.broadcast %303 : vector<10x1xf32> to vector<10x74xf32>
    %305 = arith.addf %302, %304 : vector<10x74xf32>
    %cst_211 = arith.constant 0.000000e+00 : f32
    %306 = vector.broadcast %cst_211 : f32 to vector<10x74xf32>
    %307 = arith.maximumf %305, %306 : vector<10x74xf32>
    %c0_212 = arith.constant 0 : index
    %c0_213 = arith.constant 0 : index
    %308 = vector.load %arg10[%c0_212, %c0_213] : memref<74x320xf32, #tpu.memory_space<vmem>>, vector<74x320xf32>
    %cst_214 = arith.constant dense<0.000000e+00> : vector<10x320xf32>
    %309 = tpu.matmul %307, %308, %cst_214 {dimension_numbers = #tpu.dot_dimension_numbers<[1], [0], [0], [1], [0, 0, 1, 1], [], []>} : vector<10x74xf32>, vector<74x320xf32>, vector<10x320xf32> -> vector<10x320xf32>
    %310 = vector.extract_strided_slice %309 {offsets = [0, 0], sizes = [1, 32], strides = [1, 1]} : vector<10x320xf32> to vector<1x32xf32>
    %311 = vector.extract_strided_slice %309 {offsets = [1, 32], sizes = [1, 32], strides = [1, 1]} : vector<10x320xf32> to vector<1x32xf32>
    %312 = arith.addf %310, %311 : vector<1x32xf32>
    %313 = vector.extract_strided_slice %309 {offsets = [2, 64], sizes = [1, 32], strides = [1, 1]} : vector<10x320xf32> to vector<1x32xf32>
    %314 = arith.addf %312, %313 : vector<1x32xf32>
    %315 = vector.extract_strided_slice %309 {offsets = [3, 96], sizes = [1, 32], strides = [1, 1]} : vector<10x320xf32> to vector<1x32xf32>
    %316 = arith.addf %314, %315 : vector<1x32xf32>
    %317 = vector.extract_strided_slice %309 {offsets = [4, 128], sizes = [1, 32], strides = [1, 1]} : vector<10x320xf32> to vector<1x32xf32>
    %318 = arith.addf %316, %317 : vector<1x32xf32>
    %319 = vector.extract_strided_slice %309 {offsets = [5, 160], sizes = [1, 32], strides = [1, 1]} : vector<10x320xf32> to vector<1x32xf32>
    %320 = arith.addf %318, %319 : vector<1x32xf32>
    %321 = vector.extract_strided_slice %309 {offsets = [6, 192], sizes = [1, 32], strides = [1, 1]} : vector<10x320xf32> to vector<1x32xf32>
    %322 = arith.addf %320, %321 : vector<1x32xf32>
    %323 = vector.extract_strided_slice %309 {offsets = [7, 224], sizes = [1, 32], strides = [1, 1]} : vector<10x320xf32> to vector<1x32xf32>
    %324 = arith.addf %322, %323 : vector<1x32xf32>
    %325 = vector.extract_strided_slice %309 {offsets = [8, 256], sizes = [1, 32], strides = [1, 1]} : vector<10x320xf32> to vector<1x32xf32>
    %326 = arith.addf %324, %325 : vector<1x32xf32>
    %327 = vector.extract_strided_slice %309 {offsets = [9, 288], sizes = [1, 32], strides = [1, 1]} : vector<10x320xf32> to vector<1x32xf32>
    %328 = arith.addf %326, %327 : vector<1x32xf32>
    %c0_215 = arith.constant 0 : index
    %c0_216 = arith.constant 0 : index
    %329 = vector.load %arg11[%c0_215, %c0_216] : memref<1x32xf32, #tpu.memory_space<vmem>>, vector<1x32xf32>
    %330 = arith.addf %328, %329 : vector<1x32xf32>
    %c3_217 = arith.constant 3 : index
    %c0_218 = arith.constant 0 : index
    %331 = vector.load %arg12[%c3_217, %c0_218] : memref<4x32xf32, #tpu.memory_space<vmem>>, vector<1x32xf32>
    tpu.vector_store %arg12[%c3_217, %c0_218], %330 {strides = array<i32>} : memref<4x32xf32, #tpu.memory_space<vmem>>, vector<1x32xf32>,
    return
  }
  func.func @transform_0(%arg0: i32) -> (i32, i32, i32) {
    %c0_i32 = arith.constant 0 : i32
    %c0_i32_0 = arith.constant 0 : i32
    %c0_i32_1 = arith.constant 0 : i32
    return %arg0, %c0_i32, %c0_i32_0 : i32, i32, i32
  }
  func.func @transform_1(%arg0: i32) -> (i32, i32) {
    %c0_i32 = arith.constant 0 : i32
    %c0_i32_0 = arith.constant 0 : i32
    %c0_i32_1 = arith.constant 0 : i32
    return %c0_i32, %c0_i32_0 : i32, i32
  }
  func.func @transform_2(%arg0: i32) -> (i32, i32) {
    %c0_i32 = arith.constant 0 : i32
    %c0_i32_0 = arith.constant 0 : i32
    %c0_i32_1 = arith.constant 0 : i32
    return %c0_i32, %c0_i32_0 : i32, i32
  }
  func.func @transform_3(%arg0: i32) -> (i32, i32, i32) {
    %c0_i32 = arith.constant 0 : i32
    %c0_i32_0 = arith.constant 0 : i32
    %c0_i32_1 = arith.constant 0 : i32
    %c0_i32_2 = arith.constant 0 : i32
    return %c0_i32, %c0_i32_0, %c0_i32_1 : i32, i32, i32
  }
  func.func @transform_4(%arg0: i32) -> (i32, i32) {
    %c0_i32 = arith.constant 0 : i32
    %c0_i32_0 = arith.constant 0 : i32
    %c0_i32_1 = arith.constant 0 : i32
    return %c0_i32, %c0_i32_0 : i32, i32
  }
  func.func @transform_5(%arg0: i32) -> (i32, i32, i32) {
    %c0_i32 = arith.constant 0 : i32
    %c0_i32_0 = arith.constant 0 : i32
    %c0_i32_1 = arith.constant 0 : i32
    %c0_i32_2 = arith.constant 0 : i32
    return %c0_i32, %c0_i32_0, %c0_i32_1 : i32, i32, i32
  }
  func.func @transform_6(%arg0: i32) -> (i32, i32) {
    %c0_i32 = arith.constant 0 : i32
    %c0_i32_0 = arith.constant 0 : i32
    %c0_i32_1 = arith.constant 0 : i32
    return %c0_i32, %c0_i32_0 : i32, i32
  }
  func.func @transform_7(%arg0: i32) -> (i32, i32) {
    %c0_i32 = arith.constant 0 : i32
    %c0_i32_0 = arith.constant 0 : i32
    %c0_i32_1 = arith.constant 0 : i32
    return %c0_i32, %c0_i32_0 : i32, i32
  }
  func.func @transform_8(%arg0: i32) -> (i32, i32) {
    %c0_i32 = arith.constant 0 : i32
    %c0_i32_0 = arith.constant 0 : i32
    %c0_i32_1 = arith.constant 0 : i32
    return %c0_i32, %c0_i32_0 : i32, i32
  }
  func.func @transform_9(%arg0: i32) -> (i32, i32) {
    %c0_i32 = arith.constant 0 : i32
    %c0_i32_0 = arith.constant 0 : i32
    %c0_i32_1 = arith.constant 0 : i32
    return %c0_i32, %c0_i32_0 : i32, i32
  }
  func.func @transform_10(%arg0: i32) -> (i32, i32) {
    %c0_i32 = arith.constant 0 : i32
    %c0_i32_0 = arith.constant 0 : i32
    %c0_i32_1 = arith.constant 0 : i32
    return %c0_i32, %c0_i32_0 : i32, i32
  }
  func.func @transform_11(%arg0: i32) -> (i32, i32) {
    %c0_i32 = arith.constant 0 : i32
    %c0_i32_0 = arith.constant 0 : i32
    return %arg0, %c0_i32 : i32, i32
  }
}

</mosaic_0001>

<bundles_post_ra>
// kernel: nature_one_cnn_forward.1
= control target key start
LH: loop header
LB: loop body
LE: loop exit
PB: predicated region body
PF: predicated region fallthrough
CT: control target
= control target key end

     0   :  { %vm81_vm0 = vcmask 1043456   ;;  %vm68_vm1 = vcmask 31744   ;;  %v4990_v2 = vmov 0   ;;  %s7130_s0 = inlined_call_operand.vmem [shape: f32[4,4,79], index: 0, kind: input, shape index: {}]   ;;  %s7131_s1 = inlined_call_operand.vmem [shape: f32[32,4], index: 1, kind: input, shape index: {}]   ;;  %s7132_s2 = inlined_call_operand.vmem [shape: f32[32,1], index: 2, kind: input, shape index: {}]   ;;  %s7133_s3 = inlined_call_operand.vmem [shape: f32[4,64,32], index: 3, kind: input, shape index: {}]   ;;  %s7134_s4 = inlined_call_operand.vmem [shape: f32[64,1], index: 4, kind: input, shape index: {}]   ;;  %s7135_s5 = inlined_call_operand.vmem [shape: f32[3,64,64], index: 5, kind: input, shape index: {}]   ;;  %s7136_s6 = inlined_call_operand.vmem [shape: f32[64,1], index: 6, kind: input, shape index: {}]   ;;  %s7137_s7 = inlined_call_operand.vmem [shape: f32[10,64], index: 7, kind: input, shape index: {}]   ;;  %s7138_s8 = inlined_call_operand.vmem [shape: f32[10,1], index: 8, kind: input, shape index: {}]   ;;  %s7139_s9 = inlined_call_operand.vmem [shape: f32[74,320], index: 9, kind: input, shape index: {}]   ;;  %s7140_s10 = inlined_call_operand.vmem [shape: f32[1,32], index: 10, kind: input, shape index: {}]   ;;  %s7141_s11 = inlined_call_operand.hbm [shape: f32[4,32], index: 11, kind: output, shape index: {}]  }
   0x1   :  { %v39_v0 = vld [vmem:[%s7130_s0] sm:$0xf]  ;;  %4682 = vset.pattern.permute.xlu1 %v4990_v2  ;;  %v5068_v3 = vld [vmem:[%s7132_s2 + $0x8] sm:$0xff]  ;;  %v5075_v4 = vld [vmem:[%s7132_s2 + $0x18] sm:$0xff]  ;;  %4681 = vset.pattern.permute.xlu0 %v4990_v2 }
   0x2   :  { %v40_v1 = vld [vmem:[%s7131_s1] sm:$0xff]  ;;  %4218 = vmatpush.msk.msra.mxu0 %vm81_vm0, %v39_v0  ;;  %55 = vperm.xlu1 %4682, %v5068_v3  }
   0x3   :  { %4219 = vmatmul.msk.f32.vlgmr.msra.gmra.mxu0 %vm68_vm1, %v40_v1  ;;  %4713 = vset.pattern.permute.xlu2 %v4990_v2 }
   0x4   :  { %16 = vsyncpa [#allocation3], 0  ;;  %65 = vperm.xlu0 %4681, %v5075_v4   ;;  %v41_v5 = vld [vmem:[%s7131_s1 + $0x8] sm:$0xff]  ;;  %v5084_v6 = vld [vmem:[%s7132_s2] sm:$0xff]  ;;  %s4991_s16 = smov 126   ;;  %s4992_s21 = smov 127  }
   0x5   :  { %v5089_v7 = vld [vmem:[%s7132_s2 + $0x10] sm:$0xff]  ;;  %v43_v9 = vld [vmem:[%s7131_s1 + $0x18] sm:$0xff]  ;;  %v474_v29 = vld [vmem:[%s7134_s4 + $0x20] sm:$0xff]  ;;  %s4993_s24 = smov 125   ;;  %vm151_vm2 = vcmask 261120   ;;  %vm583_vm3 = vcmask 523264  }
   0x6   :  { %v42_v8 = vld [vmem:[%s7131_s1 + $0x10] sm:$0xff]  ;;  %v477_v22 = vld [vmem:[%s7134_s4 + $0x38] sm:$0xff]  ;;  %v471_v30 = vld [vmem:[%s7134_s4 + $0x8] sm:$0xff]  ;;  %vm966_vm4 = vcmask 1041408   ;;  %vm959_vm5 = vcmask 605184   ;;  %s4994_s26 = smov 32  }
   0x7   :  { %v475_v31 = vld [vmem:[%s7134_s4 + $0x28] sm:$0xff]  ;;  %v472_v32 = vld [vmem:[%s7134_s4 + $0x10] sm:$0xff]  ;;  %v4230_v39 = vld [vmem:[%s7133_s3 + $0x78] sm:$0xff]  ;;  %vm1086_vm6 = vcmask 253952  }
   0x8   :  { %v4223_v40 = vld [vmem:[%s7133_s3 + $0x40] sm:$0xff]  ;;  %v4224_v45 = vld [vmem:[%s7133_s3 + $0x48] sm:$0xff]  ;;  %v4225_v51 = vld [vmem:[%s7133_s3 + $0x50] sm:$0xff] }
   0x9   :  { %v118_v44 = vld [vmem:[%s7133_s3] sm:$0xff]  ;;  %v119_v50 = vld [vmem:[%s7133_s3 + $0x8] sm:$0xff]  ;;  %v5150_v53 = vld [vmem:[%s7134_s4 + $0x30] sm:$0xff] }
   0xa   :  { %50 = vperm.xlu1 %4682, %v5084_v6   ;;  %v4247_v55 = vld [vmem:[%s7133_s3 + $0x80] sm:$0xff]  ;;  %v120_v59 = vld [vmem:[%s7133_s3 + $0x10] sm:$0xff]  ;;  %v4226_v61 = vld [vmem:[%s7133_s3 + $0x58] sm:$0xff] }
   0xb   :  { %4220 = vmatmul.msk.f32.gmra.mxu0 %vm68_vm1, %v41_v5  ;;  %v4263_v60 = vld [vmem:[%s7133_s3 + $0xc0] sm:$0xff]  ;;  %v5171_v62 = vld [vmem:[%s7134_s4 + $0x18] sm:$0xff]  ;;  %v4248_v63 = vld [vmem:[%s7133_s3 + $0x88] sm:$0xff] }
   0xc   :  { %60 = vperm.xlu0 %4681, %v5089_v7   ;;  %v121_v0 = vld [vmem:[%s7133_s3 + $0x18] sm:$0xff]  ;;  %v4264_v1 = vld [vmem:[%s7133_s3 + $0xc8] sm:$0xff]  ;;  %v4227_v2 = vld [vmem:[%s7133_s3 + $0x60] sm:$0xff] }
   0xd   :  { %v5193_v5 = vld [vmem:[%s7134_s4] sm:$0xff] }
  0x13   :  { %4221 = vmatmul.msk.f32.gmra.mxu0 %vm68_vm1, %v42_v8  ;;  %v4249_v8 = vld [vmem:[%s7133_s3 + $0x90] sm:$0xff] }
  0x1b   :  { %4222 = vmatmul.msk.f32.gmra.mxu0 %vm68_vm1, %v43_v9  ;;  %v122_v9 = vld [vmem:[%s7133_s3 + $0x20] sm:$0xff] }
  0x74   :  { %v56_v10 = vpop.permute.xlu1 %55 }
  0x76   :  { %v66_v16 = vpop.permute.xlu0 %65 }
  0x7c   :  { %v51_v12 = vpop.permute.xlu1 %50 }
  0x7e   :  { %v61_v21 = vpop.permute.xlu0 %60 }
  0x80   :  { %v102_v11 = vpop.f32.mrf.mxu0 }
  0x81   :  { %v103_v13 = vadd.f32 %v102_v11, %v51_v12  ;;  %v4228_v11 = vld [vmem:[%s7133_s3 + $0x68] sm:$0xff]  ;;  %v4250_v12 = vld [vmem:[%s7133_s3 + $0x98] sm:$0xff] }
  0x83   :  { %v114_v17 = vmax.f32 %v103_v13, 0.0  ;;  %v123_v13 = vld [vmem:[%s7133_s3 + $0x28] sm:$0xff] }
  0x88   :  { %v105_v14 = vpop.f32.mrf.mxu0 }
  0x89   :  { %v106_v15 = vadd.f32 %v105_v14, %v56_v10  ;;  %v4265_v10 = vld [vmem:[%s7133_s3 + $0xd0] sm:$0xff]  ;;  %v4266_v14 = vld [vmem:[%s7133_s3 + $0xd8] sm:$0xff] }
  0x8b   :  { %v115_v18 = vmax.f32 %v106_v15, 0.0  ;;  %v4229_v15 = vld [vmem:[%s7133_s3 + $0x70] sm:$0xff] }
  0x8d   :  { %v4698_v19 = vpack.i.bf16 %v114_v17, %v115_v18 }
  0x8f   :  { %4699 = vrot.lane.b32.xlu1 %v4698_v19, %s4991_s16 }
  0x90   :  { %v108_v20 = vpop.f32.mrf.mxu0 }
  0x91   :  { %v109_v23 = vadd.f32 %v108_v20, %v61_v21  ;;  %v125_v20 = vld [vmem:[%s7133_s3 + $0x38] sm:$0xff]  ;;  %v4268_v21 = vld [vmem:[%s7133_s3 + $0xe8] sm:$0xff] }
  0x93   :  { %v116_v26 = vmax.f32 %v109_v23, 0.0  ;;  %v4269_v23 = vld [vmem:[%s7133_s3 + $0xf0] sm:$0xff] }
  0x97   :  { %515 = vperm.xlu1 %4682, %v477_v22   ;;  %v4253_v22 = vld [vmem:[%s7133_s3 + $0xb0] sm:$0xff] }
  0x98   :  { %v111_v24 = vpop.f32.mrf.mxu0 }
  0x99   :  { %v112_v25 = vadd.f32 %v111_v24, %v66_v16  ;;  %v4251_v16 = vld [vmem:[%s7133_s3 + $0xa0] sm:$0xff]  ;;  %v4254_v24 = vld [vmem:[%s7133_s3 + $0xb8] sm:$0xff] }
  0x9b   :  { %v117_v27 = vmax.f32 %v112_v25, 0.0  ;;  %v4270_v25 = vld [vmem:[%s7133_s3 + $0xf8] sm:$0xff] }
  0x9d   :  { %v4693_v28 = vpack.i.bf16 %v116_v26, %v117_v27 }
  0x9f   :  { %4694 = vrot.lane.b32.xlu0 %v4693_v28, %s4991_s16  ;;  %4684 = vrot.lane.b32.xlu2 %v4693_v28, %s4992_s21 }
  0xa0   :  { %500 = vperm.xlu1 %4682, %v474_v29  }
  0xa7   :  { %4709 = vrot.lane.b32.xlu0 %v4698_v19, %s4993_s24  ;;  %4689 = vrot.lane.b32.xlu2 %v4698_v19, %s4992_s21  ;;  %v4252_v19 = vld [vmem:[%s7133_s3 + $0xa8] sm:$0xff] }
  0xa8   :  { %485 = vperm.xlu1 %4682, %v471_v30  }
  0xaf   :  { %505 = vperm.xlu0 %4681, %v475_v31   ;;  %4704 = vrot.lane.b32.xlu2 %v4693_v28, %s4993_s24 }
  0xb7   :  { %490 = vperm.xlu0 %4681, %v472_v32   ;;  %510 = vperm.xlu2 %4713, %v5150_v53  }
  0xbf   :  { %495 = vperm.xlu2 %4713, %v5171_v62  }
  0xc7   :  { %480 = vperm.xlu2 %4713, %v5193_v5  }
  0xf9   :  { %v4685_v33 = vpop.permute.xlu2 %4684 }
  0xfa   :  { %v4686_v34 = vunpack.i.l.bf16 %v4685_v33  ;;  %v4687_v35 = vunpack.i.h.bf16 %v4685_v33 }
  0xfc   :  { %188 = vmatpush.msra.mxu1 %v4686_v34  ;;  %4669 = vmatpush.msra.mxu2 %v4686_v34 }
  0xfe   :  { %189 = vmatpush.msra.mxu1 %v4687_v35  ;;  %4670 = vmatpush.msra.mxu2 %v4687_v35 }
 0x101   :  { %v4690_v36 = vpop.permute.xlu2 %4689  ;;  %v4700_v48 = vpop.permute.xlu1 %4699 }
 0x102   :  { %v4691_v37 = vunpack.i.l.bf16 %v4690_v36  ;;  %v4692_v38 = vunpack.i.h.bf16 %v4690_v36  ;;  %v4701_v52 = vunpack.i.l.bf16 %v4700_v48  ;;  %v4702_v54 = vunpack.i.h.bf16 %v4700_v48 }
 0x104   :  { %190 = vmatpush.msra.mxu1 %v4691_v37  ;;  %4671 = vmatpush.msra.mxu2 %v4691_v37 }
 0x106   :  { %191 = vmatpush.msra.mxu1 %v4692_v38  ;;  %4672 = vmatpush.msra.mxu2 %v4692_v38 }
 0x107   :  { %4238 = vmatmul.msk.f32.vlgmr.msra.gmra.mxu2 %vm151_vm2, %v4230_v39  ;;  %4231 = vmatmul.msk.f32.vlgmr.msra.gmra.mxu1 %vm151_vm2, %v4223_v40 }
 0x108   :  { %253 = vmatpush.msrb.mxu2 %v117_v27 }
 0x109   :  { %v4705_v41 = vpop.permute.xlu2 %4704 }
 0x10a   :  { %254 = vmatpush.msrb.mxu2 %v116_v26  ;;  %v4706_v42 = vunpack.i.l.bf16 %v4705_v41  ;;  %v4707_v43 = vunpack.i.h.bf16 %v4705_v41 }
 0x10c   :  { %255 = vmatpush.msrb.mxu2 %v115_v18  ;;  %433 = vmatpush.msrb.mxu0 %v4706_v42  ;;  %v4267_v18 = vld [vmem:[%s7133_s3 + $0xe0] sm:$0xff] }
 0x10e   :  { %256 = vmatpush.msrb.mxu2 %v114_v17  ;;  %434 = vmatpush.msrb.mxu0 %v4707_v43  ;;  %v124_v17 = vld [vmem:[%s7133_s3 + $0x30] sm:$0xff] }
 0x10f   :  { %4239 = vmatmul.msk.f32.vlgmr.msrb.gmra.mxu2 %vm151_vm2, %v118_v44  ;;  %4232 = vmatmul.msk.f32.gmra.mxu1 %vm151_vm2, %v4224_v45 }
 0x111   :  { %v4695_v46 = vpop.permute.xlu0 %4694 }
 0x112   :  { %v4696_v47 = vunpack.i.l.bf16 %v4695_v46  ;;  %v4697_v49 = vunpack.i.h.bf16 %v4695_v46  ;;  %v516_v46 = vpop.permute.xlu1 %515 }
 0x114   :  { %339 = vmatpush.msra.mxu3 %v4696_v47 }
 0x116   :  { %340 = vmatpush.msra.mxu3 %v4697_v49 }
 0x117   :  { %4240 = vmatmul.msk.f32.gmra.mxu2 %vm151_vm2, %v119_v50  ;;  %4233 = vmatmul.msk.f32.gmra.mxu1 %vm151_vm2, %v4225_v51 }
 0x118   :  { %341 = vmatpush.msra.mxu3 %v4701_v52 }
 0x119   :  { %v4710_v56 = vpop.permute.xlu0 %4709 }
 0x11a   :  { %342 = vmatpush.msra.mxu3 %v4702_v54  ;;  %v4711_v57 = vunpack.i.l.bf16 %v4710_v56  ;;  %v4712_v58 = vunpack.i.h.bf16 %v4710_v56 }
 0x11b   :  { %4255 = vmatmul.msk.f32.vlgmr.msra.gmra.mxu3 %vm151_vm2, %v4247_v55  ;;  %v511_v55 = vpop.permute.xlu2 %510 }
 0x11c   :  { %435 = vmatpush.msrb.mxu0 %v4711_v57 }
 0x11e   :  { %436 = vmatpush.msrb.mxu0 %v4712_v58 }
 0x11f   :  { %4241 = vmatmul.msk.f32.gmra.mxu2 %vm151_vm2, %v120_v59  ;;  %4271 = vmatmul.msk.f32.vlgmr.msrb.gmra.mxu0 %vm151_vm2, %v4263_v60 }
 0x120   :  { %4234 = vmatmul.msk.f32.gmra.mxu1 %vm151_vm2, %v4226_v61 }
 0x121   :  { %v506_v59 = vpop.permute.xlu0 %505 }
 0x123   :  { %4256 = vmatmul.msk.f32.gmra.mxu3 %vm151_vm2, %v4248_v63 }
 0x127   :  { %4242 = vmatmul.msk.f32.gmra.mxu2 %vm151_vm2, %v121_v0  ;;  %4272 = vmatmul.msk.f32.gmra.mxu0 %vm151_vm2, %v4264_v1  ;;  %v501_v0 = vpop.permute.xlu1 %500 }
 0x128   :  { %4235 = vmatmul.msk.f32.gmra.mxu1 %vm151_vm2, %v4227_v2 }
 0x12b   :  { %4257 = vmatmul.msk.f32.gmra.mxu3 %vm151_vm2, %v4249_v8 }
 0x12f   :  { %4243 = vmatmul.msk.f32.gmra.mxu2 %vm151_vm2, %v122_v9  ;;  %4273 = vmatmul.msk.f32.gmra.mxu0 %vm151_vm2, %v4265_v10 }
 0x130   :  { %4236 = vmatmul.msk.f32.gmra.mxu1 %vm151_vm2, %v4228_v11 }
 0x133   :  { %4258 = vmatmul.msk.f32.gmra.mxu3 %vm151_vm2, %v4250_v12 }
 0x137   :  { %4244 = vmatmul.msk.f32.gmra.mxu2 %vm151_vm2, %v123_v13  ;;  %4274 = vmatmul.msk.f32.gmra.mxu0 %vm151_vm2, %v4266_v14 }
 0x138   :  { %4237 = vmatmul.msk.f32.gmra.mxu1 %vm151_vm2, %v4229_v15 }
 0x13b   :  { %4259 = vmatmul.msk.f32.gmra.mxu3 %vm151_vm2, %v4251_v16 }
 0x13f   :  { %4245 = vmatmul.msk.f32.gmra.mxu2 %vm151_vm2, %v124_v17  ;;  %4275 = vmatmul.msk.f32.gmra.mxu0 %vm151_vm2, %v4267_v18  ;;  %v496_v18 = vpop.permute.xlu2 %495 }
 0x143   :  { %4260 = vmatmul.msk.f32.gmra.mxu3 %vm151_vm2, %v4252_v19 }
 0x147   :  { %4246 = vmatmul.msk.f32.gmra.mxu2 %vm151_vm2, %v125_v20  ;;  %4276 = vmatmul.msk.f32.gmra.mxu0 %vm151_vm2, %v4268_v21 }
 0x14b   :  { %4261 = vmatmul.msk.f32.gmra.mxu3 %vm151_vm2, %v4253_v22  ;;  %v491_v22 = vpop.permute.xlu0 %490 }
 0x14f   :  { %4277 = vmatmul.msk.f32.gmra.mxu0 %vm151_vm2, %v4269_v23 }
 0x153   :  { %4262 = vmatmul.msk.f32.gmra.mxu3 %vm151_vm2, %v4254_v24 }
 0x157   :  { %4278 = vmatmul.msk.f32.gmra.mxu0 %vm151_vm2, %v4270_v25 }
 0x184   :  { %v5269_v27 = vpop.f32.mrf.mxu1 }
 0x18a   :  { %v214_v26 = vpop.f32.mrf.mxu2 }
 0x18c   :  { %v5273_v29 = vpop.f32.mrf.mxu1 }
 0x192   :  { %v5271_v28 = vpop.f32.mrf.mxu2 }
 0x194   :  { %v199_v34 = vpop.f32.mrf.mxu1 }
 0x19a   :  { %v5275_v30 = vpop.f32.mrf.mxu2 }
 0x19c   :  { %v5277_v31 = vpop.f32.mrf.mxu0 }
 0x19d   :  { %v202_v39 = vpop.f32.mrf.mxu1 }
 0x19e   :  { %v5279_v32 = vpop.f32.mrf.mxu3 }
 0x1a2   :  { %v264_v33 = vpop.f32.mrf.mxu2 }
 0x1a3   :  { %v265_v57 = vadd.f32 %v264_v33, %v199_v34 }
 0x1a4   :  { %v5281_v35 = vpop.f32.mrf.mxu0 }
 0x1a5   :  { %v205_v44 = vpop.f32.mrf.mxu1 }
 0x1a6   :  { %v5283_v36 = vpop.f32.mrf.mxu3 }
 0x1aa   :  { %v267_v37 = vpop.f32.mrf.mxu2 }
 0x1ab   :  { %v268_v52 = vadd.f32 %v267_v37, %v202_v39 }
 0x1ac   :  { %v444_v38 = vpop.f32.mrf.mxu0 }
 0x1ad   :  { %v208_v50 = vpop.f32.mrf.mxu1 }
 0x1ae   :  { %v350_v40 = vpop.f32.mrf.mxu3 }
 0x1af   :  { %v370_v2 = vadd.f32 %v350_v40, %v265_v57  ;;  %v887_v57 = vld [vmem:[%s7138_s8 + $0x8] sm:$0x3] }
 0x1b1   :  { %v464_v14 = vadd.f32 %v444_v38, %v370_v2 }
 0x1b2   :  { %v270_v41 = vpop.f32.mrf.mxu2 }
 0x1b3   :  { %v271_v47 = vadd.f32 %v270_v41, %v205_v44  ;;  %v520_v23 = vadd.f32 %v491_v22, %v464_v14 }
 0x1b4   :  { %v447_v42 = vpop.f32.mrf.mxu0 }
 0x1b5   :  { %v211_v10 = vpop.f32.mrf.mxu1  ;;  %v528_v34 = vmax.f32 %v520_v23, 0.0 }
 0x1b6   :  { %v353_v43 = vpop.f32.mrf.mxu3 }
 0x1b7   :  { %v371_v61 = vadd.f32 %v353_v43, %v268_v52 }
 0x1b9   :  { %v465_v11 = vadd.f32 %v447_v42, %v371_v61  ;;  %v823_v61 = vld [vmem:[%s7136_s6 + $0x18] sm:$0xff] }
 0x1ba   :  { %v273_v48 = vpop.f32.mrf.mxu2 }
 0x1bb   :  { %v274_v54 = vadd.f32 %v273_v48, %v208_v50  ;;  %v521_v20 = vadd.f32 %v496_v18, %v465_v11  ;;  %v259_v48 = vadd.f32 %v5271_v28, %v5269_v27  ;;  %v486_v28 = vpop.permute.xlu1 %485  ;;  %v5359_v18 = vld [vmem:[%s7135_s5 + $0x18] sm:$0xff] }
 0x1bc   :  { %v450_v45 = vpop.f32.mrf.mxu0 }
 0x1bd   :  { %v529_v33 = vmax.f32 %v521_v20, 0.0 }
 0x1be   :  { %v356_v49 = vpop.f32.mrf.mxu3 }
 0x1bf   :  { %v372_v51 = vadd.f32 %v356_v49, %v271_v47  ;;  %v4739_v42 = vpack.i.bf16 %v528_v34, %v529_v33 }
 0x1c1   :  { %v466_v58 = vadd.f32 %v450_v45, %v372_v51  ;;  %v262_v45 = vadd.f32 %v5275_v30, %v5273_v29  ;;  %v827_v51 = vld [vmem:[%s7136_s6 + $0x38] sm:$0xff]  ;;  %v481_v30 = vpop.permute.xlu2 %480 }
 0x1c2   :  { %v276_v1 = vpop.f32.mrf.mxu2 }
 0x1c3   :  { %v522_v8 = vadd.f32 %v501_v0, %v466_v58  ;;  %v277_v17 = vadd.f32 %v276_v1, %v211_v10  ;;  %v825_v58 = vld [vmem:[%s7136_s6 + $0x28] sm:$0xff]  ;;  %v820_v0 = vld [vmem:[%s7136_s6] sm:$0xff] }
 0x1c4   :  { %v453_v56 = vpop.f32.mrf.mxu0  ;;  %v5345_v1 = vld [vmem:[%s7135_s5 + $0x8] sm:$0xff] }
 0x1c5   :  { %v530_v15 = vmax.f32 %v522_v8, 0.0 }
 0x1c6   :  { %v359_v60 = vpop.f32.mrf.mxu3 }
 0x1c7   :  { %v373_v63 = vadd.f32 %v359_v60, %v274_v54  ;;  %v368_v54 = vadd.f32 %v5279_v32, %v259_v48  ;;  %v822_v60 = vld [vmem:[%s7136_s6 + $0x10] sm:$0xff] }
 0x1c8   :  { %v4281_v48 = vld [vmem:[%s7135_s5 + $0x50] sm:$0xff] }
 0x1c9   :  { %v467_v9 = vadd.f32 %v453_v56, %v373_v63  ;;  %v462_v27 = vadd.f32 %v5277_v31, %v368_v54  ;;  %v821_v31 = vld [vmem:[%s7136_s6 + $0x8] sm:$0xff]  ;;  %v886_v63 = vld [vmem:[%s7138_s8] sm:$0xff] }
 0x1ca   :  { %v279_v25 = vpop.f32.mrf.mxu2  ;;  %v4308_v54 = vld [vmem:[%s7135_s5 + $0xa8] sm:$0xff] }
 0x1cb   :  { %v523_v12 = vadd.f32 %v506_v59, %v467_v9  ;;  %v280_v37 = vadd.f32 %v279_v25, %v214_v26  ;;  %v369_v26 = vadd.f32 %v5283_v36, %v262_v45  ;;  %v518_v32 = vadd.f32 %v481_v30, %v462_v27  ;;  %v826_v59 = vld [vmem:[%s7136_s6 + $0x30] sm:$0xff]  ;;  %v4310_v30 = vld [vmem:[%s7135_s5 + $0xb8] sm:$0xff] }
 0x1cc   :  { %v456_v13 = vpop.f32.mrf.mxu0  ;;  %v5352_v9 = vld [vmem:[%s7135_s5 + $0x10] sm:$0xff] }
 0x1cd   :  { %v531_v16 = vmax.f32 %v523_v12, 0.0  ;;  %v463_v29 = vadd.f32 %v5281_v35, %v369_v26  ;;  %v5396_v45 = vld [vmem:[%s7135_s5 + $0x30] sm:$0xff]  ;;  %v4282_v26 = vld [vmem:[%s7135_s5 + $0x58] sm:$0xff] }
 0x1ce   :  { %v362_v19 = vpop.f32.mrf.mxu3  ;;  %v4309_v27 = vld [vmem:[%s7135_s5 + $0xb0] sm:$0xff] }
 0x1cf   :  { %v4714_v21 = vpack.i.bf16 %v530_v15, %v531_v16  ;;  %v374_v24 = vadd.f32 %v362_v19, %v277_v17  ;;  %v519_v36 = vadd.f32 %v486_v28, %v463_v29  ;;  %v4284_v29 = vld [vmem:[%s7135_s5 + $0x68] sm:$0xff]  ;;  %v4285_v28 = vld [vmem:[%s7135_s5 + $0x70] sm:$0xff] }
 0x1d1   :  { %4715 = vrot.lane.b32.xlu2 %v4714_v21, %s4991_s16  ;;  %v468_v39 = vadd.f32 %v456_v13, %v374_v24  ;;  %v527_v35 = vmax.f32 %v519_v36, 0.0  ;;  %v4286_v36 = vld [vmem:[%s7135_s5 + $0x78] sm:$0xff] }
 0x1d3   :  { %v524_v43 = vadd.f32 %v511_v55, %v468_v39  ;;  %v526_v55 = vmax.f32 %v518_v32, 0.0 }
 0x1d4   :  { %v459_v41 = vpop.f32.mrf.mxu0 }
 0x1d5   :  { %v532_v49 = vmax.f32 %v524_v43, 0.0  ;;  %v4749_v56 = vpack.i.bf16 %v526_v55, %v527_v35  ;;  %v4304_v43 = vld [vmem:[%s7135_s5 + $0x88] sm:$0xff] }
 0x1d6   :  { %v365_v40 = vpop.f32.mrf.mxu3 }
 0x1d7   :  { %v375_v38 = vadd.f32 %v365_v40, %v280_v37  ;;  %v5366_v37 = vld [vmem:[%s7135_s5 + $0x20] sm:$0xff] }
 0x1d9   :  { %v469_v44 = vadd.f32 %v459_v41, %v375_v38  ;;  %4740 = vrot.lane.b32.xlu2 %v4739_v42, %s4992_s21  ;;  %v4303_v41 = vld [vmem:[%s7135_s5 + $0x80] sm:$0xff] }
 0x1da   :  { %v4279_v38 = vld [vmem:[%s7135_s5 + $0x40] sm:$0xff] }
 0x1db   :  { %v525_v47 = vadd.f32 %v516_v46, %v469_v44  ;;  %v824_v46 = vld [vmem:[%s7136_s6 + $0x20] sm:$0xff]  ;;  %v4280_v44 = vld [vmem:[%s7135_s5 + $0x48] sm:$0xff] }
 0x1dd   :  { %v533_v50 = vmax.f32 %v525_v47, 0.0  ;;  %v4305_v47 = vld [vmem:[%s7135_s5 + $0x90] sm:$0xff] }
 0x1df   :  { %681 = vmatpush.msra.mxu2 %v533_v50  ;;  %v4729_v52 = vpack.i.bf16 %v532_v49, %v533_v50  ;;  %v4306_v50 = vld [vmem:[%s7135_s5 + $0x98] sm:$0xff] }
 0x1e1   :  { %865 = vperm.xlu2 %4713, %v827_v51   ;;  %4730 = vrot.lane.b32.xlu1 %v4729_v52, %s4992_s21  ;;  %v4307_v51 = vld [vmem:[%s7135_s5 + $0xa0] sm:$0xff] }
 0x1e2   :  { %4720 = vrot.lane.b32.xlu0 %v4729_v52, %s4991_s16  ;;  %682 = vmatpush.msra.mxu2 %v532_v49  ;;  %v5411_v49 = vld [vmem:[%s7135_s5 + $0x38] sm:$0xff]  ;;  %v4283_v52 = vld [vmem:[%s7135_s5 + $0x60] sm:$0xff] }
 0x1e4   :  { %683 = vmatpush.msra.mxu2 %v531_v16 }
 0x1e6   :  { %684 = vmatpush.msra.mxu2 %v530_v15 }
 0x1e8   :  { %685 = vmatpush.msra.mxu2 %v529_v33 }
 0x1e9   :  { %850 = vperm.xlu2 %4713, %v824_v46   ;;  %4735 = vrot.lane.b32.xlu1 %v4739_v42, %s4991_s16  ;;  %v5381_v42 = vld [vmem:[%s7135_s5 + $0x28] sm:$0xff] }
 0x1ea   :  { %4725 = vrot.lane.b32.xlu0 %v4714_v21, %s4992_s21  ;;  %686 = vmatpush.msra.mxu2 %v528_v34 }
 0x1ec   :  { %687 = vmatpush.msra.mxu2 %v527_v35 }
 0x1ee   :  { %688 = vmatpush.msra.mxu2 %v526_v55 }
 0x1f1   :  { %835 = vperm.xlu2 %4713, %v821_v31   ;;  %4750 = vrot.lane.b32.xlu1 %v4749_v56, %s4992_s21 }
 0x1f2   :  { %4745 = vrot.lane.b32.xlu0 %v4749_v56, %s4991_s16 }
 0x1f9   :  { %895 = vperm.xlu2 %4713, %v887_v57   ;;  %855 = vperm.xlu1 %4682, %v825_v58  }
 0x1fa   :  { %860 = vperm.xlu0 %4681, %v826_v59  }
 0x201   :  { %1105 = vperm.xlu2 %4713, %v5068_v3   ;;  %840 = vperm.xlu1 %4682, %v822_v60   ;;  %v5338_v3 = vld [vmem:[%s7135_s5] sm:$0xff] }
 0x202   :  { %845 = vperm.xlu0 %4681, %v823_v61   ;;  %4295 = vmatmul.msk.f32.vlgmr.msra.gmra.mxu2 %vm583_vm3, %v5338_v3 }
 0x209   :  { %890 = vperm.xlu1 %4682, %v886_v63  }
 0x20a   :  { %830 = vperm.xlu0 %4681, %v820_v0   ;;  %4296 = vmatmul.msk.f32.gmra.mxu2 %vm583_vm3, %v5345_v1 }
 0x211   :  { %1110 = vperm.xlu1 %4682, %v5089_v7  }
 0x212   :  { %1115 = vperm.xlu0 %4681, %v5075_v4   ;;  %4297 = vmatmul.msk.f32.gmra.mxu2 %vm583_vm3, %v5352_v9 }
 0x21a   :  { %1100 = vperm.xlu0 %4681, %v5084_v6   ;;  %4298 = vmatmul.msk.f32.gmra.mxu2 %vm583_vm3, %v5359_v18 }
 0x222   :  { %4299 = vmatmul.msk.f32.gmra.mxu2 %vm583_vm3, %v5366_v37 }
 0x22a   :  { %4300 = vmatmul.msk.f32.gmra.mxu2 %vm583_vm3, %v5381_v42 }
 0x22b   :  { %v4716_v7 = vpop.permute.xlu2 %4715 }
 0x22c   :  { %v4717_v12 = vunpack.i.l.bf16 %v4716_v7  ;;  %v4718_v14 = vunpack.i.h.bf16 %v4716_v7 }
 0x232   :  { %4301 = vmatmul.msk.f32.gmra.mxu2 %vm583_vm3, %v5396_v45 }
 0x233   :  { %v4741_v19 = vpop.permute.xlu2 %4740 }
 0x234   :  { %v4742_v22 = vunpack.i.l.bf16 %v4741_v19  ;;  %v4743_v24 = vunpack.i.h.bf16 %v4741_v19 }
 0x23a   :  { %4302 = vmatmul.msk.f32.gmra.mxu2 %vm583_vm3, %v5411_v49 }
 0x253   :  { %v4731_v4 = vpop.permute.xlu1 %4730 }
 0x254   :  { %v4721_v6 = vpop.permute.xlu0 %4720  ;;  %v4732_v2 = vunpack.i.l.bf16 %v4731_v4  ;;  %v4733_v10 = vunpack.i.h.bf16 %v4731_v4 }
 0x255   :  { %v4722_v8 = vunpack.i.l.bf16 %v4721_v6  ;;  %v4723_v11 = vunpack.i.h.bf16 %v4721_v6 }
 0x256   :  { %616 = vmatpush.msrb.mxu1 %v4732_v2 }
 0x257   :  { %779 = vmatpush.msrb.mxu3 %v4722_v8 }
 0x258   :  { %617 = vmatpush.msrb.mxu1 %v4733_v10 }
 0x259   :  { %780 = vmatpush.msrb.mxu3 %v4723_v11 }
 0x25b   :  { %781 = vmatpush.msrb.mxu3 %v4717_v12  ;;  %v4736_v13 = vpop.permute.xlu1 %4735  ;;  %v866_v12 = vpop.permute.xlu2 %865 }
 0x25c   :  { %v4726_v15 = vpop.permute.xlu0 %4725  ;;  %v4737_v16 = vunpack.i.l.bf16 %v4736_v13  ;;  %v4738_v21 = vunpack.i.h.bf16 %v4736_v13 }
 0x25d   :  { %782 = vmatpush.msrb.mxu3 %v4718_v14  ;;  %v4727_v17 = vunpack.i.l.bf16 %v4726_v15  ;;  %v4728_v20 = vunpack.i.h.bf16 %v4726_v15 }
 0x25f   :  { %618 = vmatpush.msrb.mxu1 %v4727_v17  ;;  %783 = vmatpush.msrb.mxu3 %v4737_v16 }
 0x261   :  { %619 = vmatpush.msrb.mxu1 %v4728_v20  ;;  %784 = vmatpush.msrb.mxu3 %v4738_v21  ;;  %v957_v21 = vld [vmem:[%s7139_s9 + $0xe0] sm:$0x3] }
 0x263   :  { %620 = vmatpush.msrb.mxu1 %v4742_v22  ;;  %v4751_v23 = vpop.permute.xlu1 %4750 }
 0x264   :  { %v4746_v25 = vpop.permute.xlu0 %4745  ;;  %v4752_v33 = vunpack.i.l.bf16 %v4751_v23  ;;  %v4753_v39 = vunpack.i.h.bf16 %v4751_v23 }
 0x265   :  { %621 = vmatpush.msrb.mxu1 %v4743_v24  ;;  %v4747_v34 = vunpack.i.l.bf16 %v4746_v25  ;;  %v4748_v40 = vunpack.i.h.bf16 %v4746_v25  ;;  %v958_v24 = vld [vmem:[%s7139_s9 + $0xe8] sm:$0x3] }
 0x266   :  { %v5473_v25 = vld [vmem:[%s7139_s9 + $0xc8] sm:$0xff]  ;;  %4327 = vmatpush.msk.msrb.mxu2 %vm966_vm4, %v958_v24  ;;  %v944_v24 = vld [vmem:[%s7139_s9 + $0x78] sm:$0xff] }
 0x267   :  { %622 = vmatpush.msrb.mxu1 %v4752_v33  ;;  %785 = vmatpush.msrb.mxu3 %v4747_v34  ;;  %v955_v33 = vld [vmem:[%s7139_s9 + $0xd0] sm:$0xff] }
 0x268   :  { %1027 = vmatpush.msrb.mxu2 %v955_v33  ;;  %v941_v33 = vld [vmem:[%s7139_s9 + $0x60] sm:$0xff] }
 0x269   :  { %623 = vmatpush.msrb.mxu1 %v4753_v39  ;;  %786 = vmatpush.msrb.mxu3 %v4748_v40  ;;  %v5482_v40 = vld [vmem:[%s7139_s9 + $0xb0] sm:$0xff] }
 0x26a   :  { %4311 = vmatmul.msk.f32.vlgmr.msrb.gmra.mxu3 %vm583_vm3, %v4303_v41  ;;  %4287 = vmatmul.msk.f32.vlgmr.msrb.gmra.mxu1 %vm583_vm3, %v4279_v38 }
 0x26b   :  { %4324 = vmatpush.msk.msra.mxu1 %vm966_vm4, %v957_v21  ;;  %v856_v34 = vpop.permute.xlu1 %855  ;;  %v950_v21 = vld [vmem:[%s7139_s9 + $0xa8] sm:$0xff] }
 0x26c   :  { %v861_v14 = vpop.permute.xlu0 %860 }
 0x26d   :  { %1005 = vmatpush.msra.mxu1 %v5473_v25 }
 0x26f   :  { %1006 = vmatpush.msra.mxu1 %v5482_v40 }
 0x272   :  { %4312 = vmatmul.msk.f32.gmra.mxu3 %vm583_vm3, %v4304_v43  ;;  %4288 = vmatmul.msk.f32.gmra.mxu1 %vm583_vm3, %v4280_v44  ;;  %v952_v44 = vld [vmem:[%s7139_s9 + $0xb8] sm:$0xff] }
 0x273   :  { %1028 = vmatpush.msrb.mxu2 %v952_v44  ;;  %v5577_v44 = vld [vmem:[%s7139_s9 + $0x20] sm:$0xff] }
 0x27a   :  { %4313 = vmatmul.msk.f32.gmra.mxu3 %vm583_vm3, %v4305_v47  ;;  %4289 = vmatmul.msk.f32.gmra.mxu1 %vm583_vm3, %v4281_v48  ;;  %v851_v47 = vpop.permute.xlu2 %850  ;;  %v5491_v48 = vld [vmem:[%s7139_s9 + $0x98] sm:$0xff] }
 0x27b   :  { %1007 = vmatpush.msra.mxu1 %v5491_v48 }
 0x282   :  { %4314 = vmatmul.msk.f32.gmra.mxu3 %vm583_vm3, %v4306_v50  ;;  %4290 = vmatmul.msk.f32.gmra.mxu1 %vm583_vm3, %v4282_v26 }
 0x285   :  { %v5455_v46 = vpop.f32.mrf.mxu2 }
 0x28a   :  { %4315 = vmatmul.msk.f32.gmra.mxu3 %vm583_vm3, %v4307_v51  ;;  %4291 = vmatmul.msk.f32.gmra.mxu1 %vm583_vm3, %v4283_v52 }
 0x28d   :  { %v693_v32 = vpop.f32.mrf.mxu2 }
 0x292   :  { %4316 = vmatmul.msk.f32.gmra.mxu3 %vm583_vm3, %v4308_v54  ;;  %4292 = vmatmul.msk.f32.gmra.mxu1 %vm583_vm3, %v4284_v29  ;;  %v949_v54 = vld [vmem:[%s7139_s9 + $0xa0] sm:$0xff]  ;;  %v846_v29 = vpop.permute.xlu0 %845 }
 0x293   :  { %1029 = vmatpush.msrb.mxu2 %v949_v54 }
 0x295   :  { %v696_v31 = vpop.f32.mrf.mxu2 }
 0x29a   :  { %4317 = vmatmul.msk.f32.gmra.mxu3 %vm583_vm3, %v4309_v27  ;;  %4293 = vmatmul.msk.f32.gmra.mxu1 %vm583_vm3, %v4285_v28  ;;  %v5500_v27 = vld [vmem:[%s7139_s9 + $0x80] sm:$0xff] }
 0x29b   :  { %1008 = vmatpush.msra.mxu1 %v5500_v27 }
 0x29d   :  { %v699_v59 = vpop.f32.mrf.mxu2 }
 0x2a2   :  { %4318 = vmatmul.msk.f32.gmra.mxu3 %vm583_vm3, %v4310_v30  ;;  %4294 = vmatmul.msk.f32.gmra.mxu1 %vm583_vm3, %v4286_v36 }
 0x2a5   :  { %v702_v63 = vpop.f32.mrf.mxu2 }
 0x2ad   :  { %v705_v7 = vpop.f32.mrf.mxu2 }
 0x2b5   :  { %v708_v10 = vpop.f32.mrf.mxu2 }
 0x2bd   :  { %v711_v16 = vpop.f32.mrf.mxu2 }
 0x2e7   :  { %v5457_v35 = vpop.f32.mrf.mxu1 }
 0x2ed   :  { %v5459_v55 = vpop.f32.mrf.mxu3 }
 0x2ef   :  { %v628_v56 = vpop.f32.mrf.mxu1 }
 0x2f0   :  { %v694_v28 = vadd.f32 %v693_v32, %v628_v56 }
 0x2f5   :  { %v5461_v57 = vpop.f32.mrf.mxu3 }
 0x2f7   :  { %v631_v58 = vpop.f32.mrf.mxu1 }
 0x2f8   :  { %v697_v50 = vadd.f32 %v696_v31, %v631_v58  ;;  %v946_v58 = vld [vmem:[%s7139_s9 + $0x88] sm:$0xff] }
 0x2f9   :  { %1030 = vmatpush.msrb.mxu2 %v946_v58 }
 0x2fd   :  { %v794_v60 = vpop.f32.mrf.mxu3 }
 0x2ff   :  { %v634_v61 = vpop.f32.mrf.mxu1 }
 0x300   :  { %v700_v41 = vadd.f32 %v699_v59, %v634_v61  ;;  %v5509_v59 = vld [vmem:[%s7139_s9 + $0x68] sm:$0xff]  ;;  %v691_v61 = vadd.f32 %v5455_v46, %v5457_v35  ;;  %v940_v35 = vld [vmem:[%s7139_s9 + $0x58] sm:$0xff] }
 0x301   :  { %1009 = vmatpush.msra.mxu1 %v5509_v59 }
 0x305   :  { %v797_v0 = vpop.f32.mrf.mxu3 }
 0x306   :  { %v815_v30 = vadd.f32 %v797_v0, %v700_v41  ;;  %v943_v0 = vld [vmem:[%s7139_s9 + $0x70] sm:$0xff]  ;;  %v5565_v41 = vld [vmem:[%s7139_s9 + $0x38] sm:$0xff] }
 0x307   :  { %v637_v4 = vpop.f32.mrf.mxu1  ;;  %1031 = vmatpush.msrb.mxu2 %v943_v0  ;;  %v5629_v0 = vld [vmem:[%s7131_s1 + $0x18] sm:$0xff] }
 0x308   :  { %v703_v22 = vadd.f32 %v702_v63, %v637_v4  ;;  %v814_v63 = vadd.f32 %v794_v60, %v697_v50  ;;  %v5520_v4 = vld [vmem:[%s7139_s9 + $0x50] sm:$0xff]  ;;  %v841_v60 = vpop.permute.xlu1 %840  ;;  %v929_v50 = vld [vmem:[%s7139_s9] sm:$0xff] }
 0x309   :  { %1010 = vmatpush.msra.mxu1 %v5520_v4  ;;  %1032 = vmatpush.msrb.mxu2 %v940_v35 }
 0x30b   :  { %1011 = vmatpush.msra.mxu1 %v5565_v41 }
 0x30d   :  { %v800_v6 = vpop.f32.mrf.mxu3  ;;  %1012 = vmatpush.msra.mxu1 %v5577_v44 }
 0x30e   :  { %v816_v26 = vadd.f32 %v800_v6, %v703_v22  ;;  %v871_v6 = vadd.f32 %v846_v29, %v815_v30  ;;  %v947_v22 = vld [vmem:[%s7139_s9 + $0x90] sm:$0xff] }
 0x30f   :  { %v640_v2 = vpop.f32.mrf.mxu1 }
 0x310   :  { %v706_v19 = vadd.f32 %v705_v7, %v640_v2  ;;  %v872_v32 = vadd.f32 %v851_v47, %v816_v26  ;;  %v813_v7 = vadd.f32 %v5461_v57, %v694_v28  ;;  %v812_v2 = vadd.f32 %v5459_v55, %v691_v61  ;;  %v884_v55 = vld [vmem:[%s7137_s7] sm:$0xff]  ;;  %v934_v47 = vld [vmem:[%s7139_s9 + $0x28] sm:$0xff]  ;;  %v891_v54 = vpop.permute.xlu1 %890 }
 0x311   :  { %v5589_v26 = vld [vmem:[%s7139_s9 + $0x8] sm:$0xff] }
 0x312   :  { %1013 = vmatpush.msra.mxu1 %v5589_v26 }
 0x315   :  { %v803_v8 = vpop.f32.mrf.mxu3 }
 0x316   :  { %v817_v38 = vadd.f32 %v803_v8, %v706_v19  ;;  %v870_v8 = vadd.f32 %v841_v60, %v814_v63  ;;  %v956_v19 = vld [vmem:[%s7139_s9 + $0xd8] sm:$0x3]  ;;  %v5608_v63 = vld [vmem:[%s7131_s1] sm:$0xff] }
 0x317   :  { %v643_v11 = vpop.f32.mrf.mxu1 }
 0x318   :  { %v709_v17 = vadd.f32 %v708_v10, %v643_v11  ;;  %v873_v36 = vadd.f32 %v856_v34, %v817_v38  ;;  %v880_v10 = vmax.f32 %v872_v32, 0.0  ;;  %v836_v11 = vpop.permute.xlu2 %835  ;;  %v938_v34 = vld [vmem:[%s7139_s9 + $0x48] sm:$0xff]  ;;  %v937_v38 = vld [vmem:[%s7139_s9 + $0x40] sm:$0xff] }
 0x319   :  { %v869_v57 = vadd.f32 %v836_v11, %v813_v7  ;;  %1033 = vmatpush.msrb.mxu2 %v937_v38  ;;  %v5615_v32 = vld [vmem:[%s7131_s1 + $0x8] sm:$0xff]  ;;  %v5665_v38 = vld [vmem:[%s7134_s4 + $0x20] sm:$0xff] }
 0x31a   :  { %v881_v46 = vmax.f32 %v873_v36, 0.0  ;;  %7163 = vst [vmem:[#allocation9_spill] sm:$0xff] %v5665_v38 }
 0x31b   :  { %1034 = vmatpush.msrb.mxu2 %v934_v47 }
 0x31d   :  { %v806_v13 = vpop.f32.mrf.mxu3 }
 0x31e   :  { %v818_v23 = vadd.f32 %v806_v13, %v709_v17  ;;  %v831_v13 = vpop.permute.xlu0 %830 }
 0x31f   :  { %v646_v15 = vpop.f32.mrf.mxu1 }
 0x320   :  { %v712_v20 = vadd.f32 %v711_v16, %v646_v15  ;;  %v874_v51 = vadd.f32 %v861_v14, %v818_v23  ;;  %v868_v14 = vadd.f32 %v831_v13, %v812_v2  ;;  %v878_v15 = vmax.f32 %v870_v8, 0.0  ;;  %v885_v23 = vld [vmem:[%s7137_s7 + $0x8] sm:$0x3]  ;;  %v896_v36 = vpop.permute.xlu2 %895 }
 0x321   :  { %v877_v16 = vmax.f32 %v869_v57, 0.0 }
 0x322   :  { %v882_v56 = vmax.f32 %v874_v51, 0.0  ;;  %v876_v17 = vmax.f32 %v868_v14, 0.0  ;;  %v931_v51 = vld [vmem:[%s7139_s9 + $0x10] sm:$0xff] }
 0x323   :  { %1035 = vmatpush.msrb.mxu2 %v931_v51 }
 0x325   :  { %v809_v39 = vpop.f32.mrf.mxu3 }
 0x326   :  { %v819_v43 = vadd.f32 %v809_v39, %v712_v20  ;;  %v953_v20 = vld [vmem:[%s7139_s9 + $0xc0] sm:$0xff]  ;;  %v935_v39 = vld [vmem:[%s7139_s9 + $0x30] sm:$0xff]  ;;  %v1116_v2 = vpop.permute.xlu0 %1115 }
 0x328   :  { %v875_v52 = vadd.f32 %v866_v12, %v819_v43  ;;  %v879_v12 = vmax.f32 %v871_v6, 0.0  ;;  %v932_v43 = vld [vmem:[%s7139_s9 + $0x18] sm:$0xff]  ;;  %v1106_v57 = vpop.permute.xlu2 %1105 }
 0x32a   :  { %v883_v31 = vmax.f32 %v875_v52, 0.0  ;;  %v4330_v52 = vld [vmem:[%s7130_s0 + $0x4] sm:$0xf] }
 0x32c   :  { %912 = vmatpush.msra.mxu0 %v883_v31 }
 0x32e   :  { %913 = vmatpush.msra.mxu0 %v882_v56  ;;  %v5622_v56 = vld [vmem:[%s7131_s1 + $0x10] sm:$0xff] }
 0x330   :  { %914 = vmatpush.msra.mxu0 %v881_v46 }
 0x332   :  { %915 = vmatpush.msra.mxu0 %v880_v10  ;;  %v1101_v10 = vpop.permute.xlu0 %1100 }
 0x334   :  { %916 = vmatpush.msra.mxu0 %v879_v12 }
 0x336   :  { %917 = vmatpush.msra.mxu0 %v878_v15 }
 0x338   :  { %918 = vmatpush.msra.mxu0 %v877_v16 }
 0x33a   :  { %919 = vmatpush.msra.mxu0 %v876_v17 }
 0x33b   :  { %4319 = vmatmul.msk.f32.vlgmr.msra.gmra.mxu0 %vm583_vm3, %v884_v55  ;;  %v1111_v55 = vpop.permute.xlu1 %1110 }
 0x33c   :  { %4321 = vmatpush.msk.msrb.mxu0 %vm966_vm4, %v956_v19 }
 0x33e   :  { %983 = vmatpush.msrb.mxu0 %v953_v20 }
 0x340   :  { %984 = vmatpush.msrb.mxu0 %v950_v21 }
 0x342   :  { %985 = vmatpush.msrb.mxu0 %v947_v22 }
 0x343   :  { %4320 = vmatmul.msk.f32.gmra.mxu0 %vm583_vm3, %v885_v23 }
 0x344   :  { %986 = vmatpush.msrb.mxu0 %v944_v24 }
 0x346   :  { %987 = vmatpush.msrb.mxu0 %v941_v33  ;;  %v5642_v33 = vld [vmem:[%s7134_s4 + $0x28] sm:$0xff] }
 0x347   :  { %7161 = vst [vmem:[#allocation7_spill] sm:$0xff] %v5642_v33 }
 0x348   :  { %988 = vmatpush.msrb.mxu0 %v938_v34  ;;  %v5650_v34 = vld [vmem:[%s7134_s4 + $0x10] sm:$0xff] }
 0x349   :  { %7162 = vst [vmem:[#allocation8_spill] sm:$0xff] %v5650_v34 }
 0x34a   :  { %989 = vmatpush.msrb.mxu0 %v935_v39  ;;  %v5658_v39 = vld [vmem:[%s7134_s4 + $0x38] sm:$0xff] }
 0x34c   :  { %990 = vmatpush.msrb.mxu0 %v932_v43  ;;  %v5672_v43 = vld [vmem:[%s7134_s4 + $0x8] sm:$0xff] }
 0x34d   :  { %7164 = vst [vmem:[#allocation10_spill] sm:$0xff] %v5672_v43 }
 0x34e   :  { %991 = vmatpush.msrb.mxu0 %v929_v50 }
 0x350   :  { %4331 = vmatpush.msk.msra.mxu0 %vm81_vm0, %v4330_v52 }
 0x3b8   :  { %v921_v29 = vpop.f32.mrf.mxu0 }
 0x3b9   :  { %v922_v28 = vadd.f32 %v921_v29, %v891_v54 }
 0x3bb   :  { %v927_v30 = vmax.f32 %v922_v28, 0.0  ;;  %v1167_v28 = vld [vmem:[%s7133_s3 + $0x8] sm:$0xff] }
 0x3bd   :  { %4322 = vmatmul.msk.f32.vlgmr.msrb.gmra.mxu0 %vm959_vm5, %v927_v30  ;;  %4325 = vmatmul.msk.f32.vlgmr.msra.gmra.mxu1 %vm959_vm5, %v927_v30 }
 0x3be   :  { %4328 = vmatmul.msk.f32.vlgmr.msrb.gmra.mxu2 %vm959_vm5, %v927_v30 }
 0x3c0   :  { %v924_v31 = vpop.f32.mrf.mxu0 }
 0x3c1   :  { %v925_v58 = vadd.f32 %v924_v31, %v896_v36  ;;  %v4376_v31 = vld [vmem:[%s7133_s3 + $0xc0] sm:$0xff] }
 0x3c3   :  { %v928_v61 = vmax.f32 %v925_v58, 0.0 }
 0x3c5   :  { %4323 = vmatmul.msk.f32.gmra.mxu0 %vm959_vm5, %v928_v61  ;;  %4326 = vmatmul.msk.f32.gmra.mxu1 %vm959_vm5, %v928_v61 }
 0x3c6   :  { %4329 = vmatmul.msk.f32.gmra.mxu2 %vm959_vm5, %v928_v61  ;;  %v1168_v61 = vld [vmem:[%s7133_s3 + $0x10] sm:$0xff] }
 0x3cd   :  { %4332 = vmatmul.msk.f32.vlgmr.msra.gmra.mxu0 %vm68_vm1, %v5608_v63 }
 0x3d5   :  { %4333 = vmatmul.msk.f32.gmra.mxu0 %vm68_vm1, %v5615_v32 }
 0x3dd   :  { %4334 = vmatmul.msk.f32.gmra.mxu0 %vm68_vm1, %v5622_v56 }
 0x3e5   :  { %4335 = vmatmul.msk.f32.gmra.mxu0 %vm68_vm1, %v5629_v0 }
 0x43a   :  { %v5633_v7 = vpop.f32.mrf.mxu0  ;;  %v5635_v6 = vpop.f32.mrf.mxu1 }
 0x43b   :  { %7159 = vst [vmem:[#allocation5_spill] sm:$0xff] %v5633_v7 }
 0x43c   :  { %7160 = vst [vmem:[#allocation6_spill] sm:$0xff] %v5635_v6 }
 0x441   :  { %v1037_v46 = vpop.f32.mrf.mxu2 }
 0x442   :  { %v996_v35 = vpop.f32.mrf.mxu0  ;;  %v1018_v60 = vpop.f32.mrf.mxu1 }
 0x443   :  { %v4377_v60 = vld [vmem:[%s7133_s3 + $0xc8] sm:$0xff] }
 0x44a   :  { %v1150_v8 = vpop.f32.mrf.mxu0 }
 0x44b   :  { %v1151_v11 = vadd.f32 %v1150_v8, %v1101_v10  ;;  %v1169_v8 = vld [vmem:[%s7133_s3 + $0x18] sm:$0xff] }
 0x44d   :  { %v1162_v14 = vmax.f32 %v1151_v11, 0.0  ;;  %v4336_v11 = vld [vmem:[%s7133_s3 + $0x40] sm:$0xff] }
 0x452   :  { %v1153_v12 = vpop.f32.mrf.mxu0 }
 0x453   :  { %v1154_v13 = vadd.f32 %v1153_v12, %v1106_v57 }
 0x455   :  { %v1163_v15 = vmax.f32 %v1154_v13, 0.0 }
 0x457   :  { %v4754_v16 = vpack.i.bf16 %v1162_v14, %v1163_v15 }
 0x459   :  { %4755 = vrot.lane.b32.xlu0 %v4754_v16, %s4992_s21 }
 0x45a   :  { %v1156_v17 = vpop.f32.mrf.mxu0 }
 0x45b   :  { %v1157_v19 = vadd.f32 %v1156_v17, %v1111_v55  ;;  %v4337_v17 = vld [vmem:[%s7133_s3 + $0x48] sm:$0xff] }
 0x45c   :  { %v4361_v55 = vld [vmem:[%s7133_s3 + $0x88] sm:$0xff] }
 0x45d   :  { %v1164_v22 = vmax.f32 %v1157_v19, 0.0  ;;  %v4379_v19 = vld [vmem:[%s7133_s3 + $0xd8] sm:$0xff] }
 0x461   :  { %4780 = vrot.lane.b32.xlu0 %v4754_v16, %s4993_s24 }
 0x462   :  { %v1159_v20 = vpop.f32.mrf.mxu0 }
 0x463   :  { %v1160_v21 = vadd.f32 %v1159_v20, %v1116_v2  ;;  %v1171_v20 = vld [vmem:[%s7133_s3 + $0x28] sm:$0xff] }
 0x465   :  { %v1165_v23 = vmax.f32 %v1160_v21, 0.0  ;;  %v4338_v21 = vld [vmem:[%s7133_s3 + $0x50] sm:$0xff] }
 0x467   :  { %1299 = vmatpush.msrb.mxu1 %v1165_v23  ;;  %v4769_v24 = vpack.i.bf16 %v1164_v22, %v1165_v23  ;;  %v4380_v23 = vld [vmem:[%s7133_s3 + $0xe0] sm:$0xff] }
 0x469   :  { %4770 = vrot.lane.b32.xlu2 %v4769_v24, %s4991_s16  ;;  %4760 = vrot.lane.b32.xlu1 %v4769_v24, %s4992_s21 }
 0x46a   :  { %1300 = vmatpush.msrb.mxu1 %v1164_v22  ;;  %1549 = vperm.xlu0 %4681, %v5642_v33   ;;  %v4362_v22 = vld [vmem:[%s7133_s3 + $0x90] sm:$0xff] }
 0x46c   :  { %1301 = vmatpush.msrb.mxu1 %v1163_v15  ;;  %v4378_v15 = vld [vmem:[%s7133_s3 + $0xd0] sm:$0xff] }
 0x46e   :  { %1302 = vmatpush.msrb.mxu1 %v1162_v14  ;;  %v4360_v14 = vld [vmem:[%s7133_s3 + $0x80] sm:$0xff] }
 0x471   :  { %4775 = vrot.lane.b32.xlu2 %v4769_v24, %s4993_s24  ;;  %4765 = vrot.lane.b32.xlu1 %v4754_v16, %s4991_s16  ;;  %v1170_v16 = vld [vmem:[%s7133_s3 + $0x20] sm:$0xff]  ;;  %v1172_v24 = vld [vmem:[%s7133_s3 + $0x30] sm:$0xff] }
 0x472   :  { %1534 = vperm.xlu0 %4681, %v5650_v34  }
 0x479   :  { %1554 = vperm.xlu2 %4713, %v5150_v53   ;;  %1559 = vperm.xlu1 %4682, %v5658_v39  }
 0x481   :  { %1539 = vperm.xlu2 %4713, %v5171_v62   ;;  %1544 = vperm.xlu1 %4682, %v5665_v38   ;;  %v1166_v62 = vld [vmem:[%s7133_s3] sm:$0xff] }
 0x482   :  { %4352 = vmatmul.msk.f32.vlgmr.msrb.gmra.mxu1 %vm151_vm2, %v1166_v62  ;;  %v4364_v62 = vld [vmem:[%s7133_s3 + $0xa0] sm:$0xff] }
 0x489   :  { %1524 = vperm.xlu2 %4713, %v5193_v5   ;;  %1529 = vperm.xlu1 %4682, %v5672_v43  }
 0x48a   :  { %4353 = vmatmul.msk.f32.gmra.mxu1 %vm151_vm2, %v1167_v28  ;;  %v4383_v28 = vld [vmem:[%s7133_s3 + $0xf8] sm:$0xff] }
 0x492   :  { %4354 = vmatmul.msk.f32.gmra.mxu1 %vm151_vm2, %v1168_v61 }
 0x49a   :  { %4355 = vmatmul.msk.f32.gmra.mxu1 %vm151_vm2, %v1169_v8 }
 0x4a2   :  { %4356 = vmatmul.msk.f32.gmra.mxu1 %vm151_vm2, %v1170_v16 }
 0x4aa   :  { %4357 = vmatmul.msk.f32.gmra.mxu1 %vm151_vm2, %v1171_v20 }
 0x4b2   :  { %4358 = vmatmul.msk.f32.gmra.mxu1 %vm151_vm2, %v1172_v24 }
 0x4c3   :  { %v4771_v53 = vpop.permute.xlu2 %4770 }
 0x4c4   :  { %v4772_v47 = vunpack.i.l.bf16 %v4771_v53  ;;  %v4773_v50 = vunpack.i.h.bf16 %v4771_v53  ;;  %v4339_v53 = vld [vmem:[%s7133_s3 + $0x58] sm:$0xff] }
 0x4c6   :  { %1384 = vmatpush.msra.mxu2 %v4772_v47  ;;  %v4363_v47 = vld [vmem:[%s7133_s3 + $0x98] sm:$0xff] }
 0x4c8   :  { %1385 = vmatpush.msra.mxu2 %v4773_v50  ;;  %v4381_v50 = vld [vmem:[%s7133_s3 + $0xe8] sm:$0xff] }
 0x4cb   :  { %v4776_v51 = vpop.permute.xlu2 %4775  ;;  %v4756_v52 = vpop.permute.xlu0 %4755 }
 0x4cc   :  { %v4777_v54 = vunpack.i.l.bf16 %v4776_v51  ;;  %v4778_v29 = vunpack.i.h.bf16 %v4776_v51  ;;  %v4757_v2 = vunpack.i.l.bf16 %v4756_v52  ;;  %v4758_v10 = vunpack.i.h.bf16 %v4756_v52  ;;  %v1173_v51 = vld [vmem:[%s7133_s3 + $0x38] sm:$0xff]  ;;  %v4340_v52 = vld [vmem:[%s7133_s3 + $0x60] sm:$0xff] }
 0x4cd   :  { %4359 = vmatmul.msk.f32.gmra.mxu1 %vm151_vm2, %v1173_v51 }
 0x4ce   :  { %1477 = vmatpush.msrb.mxu0 %v4777_v54  ;;  %v4382_v54 = vld [vmem:[%s7133_s3 + $0xf0] sm:$0xff] }
 0x4d0   :  { %1478 = vmatpush.msrb.mxu0 %v4778_v29  ;;  %v4341_v29 = vld [vmem:[%s7133_s3 + $0x68] sm:$0xff] }
 0x4d3   :  { %v4781_v5 = vpop.permute.xlu0 %4780 }
 0x4d4   :  { %v4782_v30 = vunpack.i.l.bf16 %v4781_v5  ;;  %v4783_v36 = vunpack.i.h.bf16 %v4781_v5  ;;  %v4365_v5 = vld [vmem:[%s7133_s3 + $0xa8] sm:$0xff] }
 0x4d6   :  { %1479 = vmatpush.msrb.mxu0 %v4782_v30  ;;  %v4342_v30 = vld [vmem:[%s7133_s3 + $0x70] sm:$0xff] }
 0x4d8   :  { %1480 = vmatpush.msrb.mxu0 %v4783_v36  ;;  %v4366_v36 = vld [vmem:[%s7133_s3 + $0xb0] sm:$0xff] }
 0x4d9   :  { %4384 = vmatmul.msk.f32.vlgmr.msrb.gmra.mxu0 %vm151_vm2, %v4376_v31  ;;  %v4343_v31 = vld [vmem:[%s7133_s3 + $0x78] sm:$0xff] }
 0x4db   :  { %v4761_v58 = vpop.permute.xlu1 %4760 }
 0x4dc   :  { %v4762_v46 = vunpack.i.l.bf16 %v4761_v58  ;;  %v4763_v35 = vunpack.i.h.bf16 %v4761_v58  ;;  %v4367_v58 = vld [vmem:[%s7133_s3 + $0xb8] sm:$0xff] }
 0x4de   :  { %1234 = vmatpush.msra.mxu3 %v4762_v46 }
 0x4e0   :  { %1235 = vmatpush.msra.mxu3 %v4763_v35 }
 0x4e1   :  { %4385 = vmatmul.msk.f32.gmra.mxu0 %vm151_vm2, %v4377_v60  ;;  %v5810_v60 = vpop.f32.mrf.mxu2 }
 0x4e2   :  { %1236 = vmatpush.msra.mxu3 %v4757_v2  ;;  %7165 = vst [vmem:[#allocation11_spill] sm:$0xff] %v5810_v60 }
 0x4e3   :  { %v4766_v57 = vpop.permute.xlu1 %4765 }
 0x4e4   :  { %v4767_v12 = vunpack.i.l.bf16 %v4766_v57  ;;  %1237 = vmatpush.msra.mxu3 %v4758_v10  ;;  %v4768_v13 = vunpack.i.h.bf16 %v4766_v57 }
 0x4e5   :  { %4344 = vmatmul.msk.f32.vlgmr.msra.gmra.mxu3 %vm151_vm2, %v4336_v11 }
 0x4e6   :  { %1386 = vmatpush.msra.mxu2 %v4767_v12 }
 0x4e8   :  { %1387 = vmatpush.msra.mxu2 %v4768_v13 }
 0x4e9   :  { %4368 = vmatmul.msk.f32.vlgmr.msra.gmra.mxu2 %vm151_vm2, %v4360_v14  ;;  %4386 = vmatmul.msk.f32.gmra.mxu0 %vm151_vm2, %v4378_v15 }
 0x4ed   :  { %4345 = vmatmul.msk.f32.gmra.mxu3 %vm151_vm2, %v4337_v17 }
 0x4f1   :  { %4369 = vmatmul.msk.f32.gmra.mxu2 %vm151_vm2, %v4361_v55  ;;  %4387 = vmatmul.msk.f32.gmra.mxu0 %vm151_vm2, %v4379_v19 }
 0x4f5   :  { %4346 = vmatmul.msk.f32.gmra.mxu3 %vm151_vm2, %v4338_v21 }
 0x4f9   :  { %4370 = vmatmul.msk.f32.gmra.mxu2 %vm151_vm2, %v4362_v22  ;;  %4388 = vmatmul.msk.f32.gmra.mxu0 %vm151_vm2, %v4380_v23 }
 0x4fd   :  { %4347 = vmatmul.msk.f32.gmra.mxu3 %vm151_vm2, %v4339_v53  ;;  %v1560_v53 = vpop.permute.xlu1 %1559 }
 0x4ff   :  { %v5804_v61 = vpop.f32.mrf.mxu1 }
 0x501   :  { %4371 = vmatmul.msk.f32.gmra.mxu2 %vm151_vm2, %v4363_v47  ;;  %4389 = vmatmul.msk.f32.gmra.mxu0 %vm151_vm2, %v4381_v50 }
 0x505   :  { %4348 = vmatmul.msk.f32.gmra.mxu3 %vm151_vm2, %v4340_v52  ;;  %v1545_v6 = vpop.permute.xlu1 %1544 }
 0x507   :  { %v5808_v35 = vpop.f32.mrf.mxu1 }
 0x509   :  { %4372 = vmatmul.msk.f32.gmra.mxu2 %vm151_vm2, %v4364_v62  ;;  %4390 = vmatmul.msk.f32.gmra.mxu0 %vm151_vm2, %v4382_v54 }
 0x50d   :  { %4349 = vmatmul.msk.f32.gmra.mxu3 %vm151_vm2, %v4341_v29  ;;  %v1555_v29 = vpop.permute.xlu2 %1554 }
 0x50f   :  { %v1310_v11 = vpop.f32.mrf.mxu1 }
 0x511   :  { %4373 = vmatmul.msk.f32.gmra.mxu2 %vm151_vm2, %v4365_v5  ;;  %4391 = vmatmul.msk.f32.gmra.mxu0 %vm151_vm2, %v4383_v28  ;;  %v1550_v5 = vpop.permute.xlu0 %1549 }
 0x515   :  { %4350 = vmatmul.msk.f32.gmra.mxu3 %vm151_vm2, %v4342_v30 }
 0x517   :  { %v1313_v14 = vpop.f32.mrf.mxu1 }
 0x519   :  { %4374 = vmatmul.msk.f32.gmra.mxu2 %vm151_vm2, %v4366_v36 }
 0x51d   :  { %4351 = vmatmul.msk.f32.gmra.mxu3 %vm151_vm2, %v4343_v31 }
 0x51f   :  { %v1316_v19 = vpop.f32.mrf.mxu1 }
 0x521   :  { %4375 = vmatmul.msk.f32.gmra.mxu2 %vm151_vm2, %v4367_v58 }
 0x527   :  { %v1319_v23 = vpop.f32.mrf.mxu1 }
 0x52f   :  { %v1322_v31 = vpop.f32.mrf.mxu1 }
 0x556   :  { %v5806_v46 = vpop.f32.mrf.mxu0 }
 0x55e   :  { %v5814_v8 = vpop.f32.mrf.mxu0 }
 0x566   :  { %v1488_v12 = vpop.f32.mrf.mxu0 }
 0x568   :  { %v5812_v2 = vpop.f32.mrf.mxu3 }
 0x56c   :  { %v5816_v10 = vpop.f32.mrf.mxu2 }
 0x56e   :  { %v1491_v17 = vpop.f32.mrf.mxu0 }
 0x570   :  { %v1242_v57 = vpop.f32.mrf.mxu3 }
 0x574   :  { %v5818_v13 = vpop.f32.mrf.mxu2 }
 0x576   :  { %v1494_v21 = vpop.f32.mrf.mxu0 }
 0x578   :  { %v1245_v15 = vpop.f32.mrf.mxu3 }
 0x579   :  { %v1311_v28 = vadd.f32 %v1310_v11, %v1245_v15 }
 0x57c   :  { %v1395_v16 = vpop.f32.mrf.mxu2 }
 0x57d   :  { %v1415_v7 = vadd.f32 %v1395_v16, %v1311_v28 }
 0x57e   :  { %v1497_v52 = vpop.f32.mrf.mxu0 }
 0x580   :  { %v1248_v55 = vpop.f32.mrf.mxu3 }
 0x581   :  { %v1314_v62 = vadd.f32 %v1313_v14, %v1248_v55 }
 0x584   :  { %v1398_v20 = vpop.f32.mrf.mxu2 }
 0x585   :  { %v1416_v58 = vadd.f32 %v1398_v20, %v1314_v62 }
 0x588   :  { %v1251_v22 = vpop.f32.mrf.mxu3 }
 0x589   :  { %v1317_v24 = vadd.f32 %v1316_v19, %v1251_v22  ;;  %v1509_v22 = vadd.f32 %v1491_v17, %v1416_v58 }
 0x58c   :  { %v1401_v47 = vpop.f32.mrf.mxu2 }
 0x58d   :  { %v1417_v50 = vadd.f32 %v1401_v47, %v1317_v24  ;;  %v1500_v24 = vpop.f32.mrf.mxu0  ;;  %v1508_v47 = vadd.f32 %v1488_v12, %v1415_v7 }
 0x58f   :  { %v1510_v30 = vadd.f32 %v1494_v21, %v1417_v50  ;;  %v1535_v21 = vpop.permute.xlu0 %1534  ;;  %v1325_v50 = vpop.f32.mrf.mxu1 }
 0x590   :  { %v1254_v51 = vpop.f32.mrf.mxu3  ;;  %v1564_v20 = vadd.f32 %v1535_v21, %v1508_v47  ;;  %v1866_v47 = vld [vmem:[%s7136_s6 + $0x28] sm:$0xff] }
 0x591   :  { %v1320_v54 = vadd.f32 %v1319_v23, %v1254_v51  ;;  %v1566_v43 = vadd.f32 %v1545_v6, %v1510_v30  ;;  %v1540_v23 = vpop.permute.xlu2 %1539  ;;  %v1305_v30 = vadd.f32 %v5804_v61, %v5812_v2  ;;  %v1530_v2 = vpop.permute.xlu1 %1529  ;;  %v5886_v21 = vld [vmem:[%s7132_s2 + $0x8] sm:$0xff] }
 0x592   :  { %v1565_v11 = vadd.f32 %v1540_v23, %v1509_v22  ;;  %v1572_v17 = vmax.f32 %v1564_v20, 0.0  ;;  %v1868_v22 = vld [vmem:[%s7136_s6 + $0x38] sm:$0xff] }
 0x593   :  { %v1574_v33 = vmax.f32 %v1566_v43, 0.0  ;;  %v1864_v23 = vld [vmem:[%s7136_s6 + $0x18] sm:$0xff] }
 0x594   :  { %v1404_v36 = vpop.f32.mrf.mxu2 }
 0x595   :  { %v1418_v60 = vadd.f32 %v1404_v36, %v1320_v54  ;;  %v1503_v7 = vpop.f32.mrf.mxu0 }
 0x597   :  { %v1511_v34 = vadd.f32 %v1497_v52, %v1418_v60  ;;  %v1573_v60 = vmax.f32 %v1565_v11, 0.0  ;;  %v1861_v11 = vld [vmem:[%s7136_s6] sm:$0xff] }
 0x598   :  { %v1257_v19 = vpop.f32.mrf.mxu3 }
 0x599   :  { %v1567_v38 = vadd.f32 %v1550_v5, %v1511_v34  ;;  %v1323_v55 = vadd.f32 %v1322_v31, %v1257_v19  ;;  %v1308_v5 = vadd.f32 %v5808_v35, %v1242_v57 }
 0x59b   :  { %v1575_v14 = vmax.f32 %v1567_v38, 0.0  ;;  %v4809_v38 = vpack.i.bf16 %v1572_v17, %v1573_v60  ;;  %v1414_v58 = vadd.f32 %v5818_v13, %v1308_v5  ;;  %v1525_v13 = vpop.permute.xlu2 %1524 }
 0x59c   :  { %v1407_v51 = vpop.f32.mrf.mxu2 }
 0x59d   :  { %v4784_v15 = vpack.i.bf16 %v1574_v33, %v1575_v14  ;;  %v1419_v62 = vadd.f32 %v1407_v51, %v1323_v55  ;;  %v1507_v35 = vadd.f32 %v5814_v8, %v1414_v58  ;;  %v1863_v55 = vld [vmem:[%s7136_s6 + $0x10] sm:$0xff]  ;;  %v2135_v51 = vld [vmem:[%s7132_s2 + $0x18] sm:$0xff]  ;;  %v5927_v58 = vld [vmem:[%s7135_s5 + $0x48] sm:$0xff] }
 0x59f   :  { %4785 = vrot.lane.b32.xlu2 %v4784_v15, %s4992_s21  ;;  %v1512_v34 = vadd.f32 %v1500_v24, %v1419_v62  ;;  %v1563_v57 = vadd.f32 %v1530_v2, %v1507_v35  ;;  %v4418_v35 = vld [vmem:[%s7135_s5 + $0x90] sm:$0xff]  ;;  %v5953_v2 = vld [vmem:[%s7135_s5 + $0x58] sm:$0xff] }
 0x5a0   :  { %v1260_v6 = vpop.f32.mrf.mxu3 }
 0x5a1   :  { %v1326_v16 = vadd.f32 %v1325_v50, %v1260_v6  ;;  %v1568_v12 = vadd.f32 %v1555_v29, %v1512_v34  ;;  %v1413_v29 = vadd.f32 %v5816_v10, %v1305_v30  ;;  %v1571_v8 = vmax.f32 %v1563_v57, 0.0  ;;  %v5911_v30 = vld [vmem:[%s7135_s5 + $0x40] sm:$0xff]  ;;  %v4419_v57 = vld [vmem:[%s7135_s5 + $0x98] sm:$0xff] }
 0x5a3   :  { %v1576_v36 = vmax.f32 %v1568_v12, 0.0  ;;  %v1506_v61 = vadd.f32 %v5806_v46, %v1413_v29  ;;  %v5940_v29 = vld [vmem:[%s7135_s5 + $0x50] sm:$0xff] }
 0x5a4   :  { %v1410_v52 = vpop.f32.mrf.mxu2 }
 0x5a5   :  { %v1420_v43 = vadd.f32 %v1410_v52, %v1326_v16  ;;  %v1562_v10 = vadd.f32 %v1525_v13, %v1506_v61 }
 0x5a7   :  { %v1513_v54 = vadd.f32 %v1503_v7, %v1420_v43  ;;  %4810 = vrot.lane.b32.xlu2 %v4809_v38, %s4991_s16  ;;  %v1570_v46 = vmax.f32 %v1562_v10, 0.0  ;;  %v4420_v10 = vld [vmem:[%s7135_s5 + $0xa0] sm:$0xff] }
 0x5a9   :  { %v1569_v28 = vadd.f32 %v1560_v53, %v1513_v54  ;;  %v1865_v53 = vld [vmem:[%s7136_s6 + $0x20] sm:$0xff]  ;;  %v4819_v24 = vpack.i.bf16 %v1570_v46, %v1571_v8 }
 0x5ab   :  { %v1577_v31 = vmax.f32 %v1569_v28, 0.0 }
 0x5ad   :  { %1723 = vmatpush.msra.mxu1 %v1577_v31  ;;  %v4799_v19 = vpack.i.bf16 %v1576_v36, %v1577_v31 }
 0x5af   :  { %4800 = vrot.lane.b32.xlu1 %v4799_v19, %s4991_s16  ;;  %4790 = vrot.lane.b32.xlu0 %v4799_v19, %s4992_s21  ;;  %v4417_v19 = vld [vmem:[%s7135_s5 + $0x88] sm:$0xff] }
 0x5b0   :  { %1724 = vmatpush.msra.mxu1 %v1576_v36  ;;  %1906 = vperm.xlu2 %4713, %v1868_v22   ;;  %v5916_v36 = vld [vmem:[%s7135_s5 + $0x80] sm:$0xff] }
 0x5b2   :  { %1725 = vmatpush.msra.mxu1 %v1575_v14  ;;  %v1867_v14 = vld [vmem:[%s7136_s6 + $0x30] sm:$0xff] }
 0x5b4   :  { %1726 = vmatpush.msra.mxu1 %v1574_v33  ;;  %v1862_v33 = vld [vmem:[%s7136_s6 + $0x8] sm:$0xff] }
 0x5b6   :  { %1727 = vmatpush.msra.mxu1 %v1573_v60 }
 0x5b7   :  { %4795 = vrot.lane.b32.xlu0 %v4784_v15, %s4991_s16  ;;  %4805 = vrot.lane.b32.xlu1 %v4809_v38, %s4992_s21  ;;  %v2132_v15 = vld [vmem:[%s7132_s2] sm:$0xff] }
 0x5b8   :  { %1891 = vperm.xlu2 %4713, %v1865_v53   ;;  %1728 = vmatpush.msra.mxu1 %v1572_v17  ;;  %v5966_v53 = vld [vmem:[%s7135_s5 + $0x60] sm:$0xff] }
 0x5ba   :  { %1729 = vmatpush.msra.mxu1 %v1571_v8 }
 0x5bc   :  { %1730 = vmatpush.msra.mxu1 %v1570_v46  ;;  %v5979_v46 = vld [vmem:[%s7135_s5 + $0x68] sm:$0xff] }
 0x5bd   :  { %4408 = vmatmul.msk.f32.vlgmr.msra.gmra.mxu1 %vm583_vm3, %v5338_v3  ;;  %v2134_v3 = vld [vmem:[%s7132_s2 + $0x10] sm:$0xff] }
 0x5bf   :  { %4820 = vrot.lane.b32.xlu1 %v4819_v24, %s4991_s16  ;;  %4815 = vrot.lane.b32.xlu0 %v4819_v24, %s4992_s21 }
 0x5c0   :  { %1876 = vperm.xlu2 %4713, %v1862_v33   ;;  %v4421_v33 = vld [vmem:[%s7135_s5 + $0xa8] sm:$0xff] }
 0x5c5   :  { %4409 = vmatmul.msk.f32.gmra.mxu1 %vm583_vm3, %v5345_v1  ;;  %v1927_v1 = vld [vmem:[%s7138_s8] sm:$0xff] }
 0x5c7   :  { %1896 = vperm.xlu1 %4682, %v1866_v47   ;;  %1901 = vperm.xlu0 %4681, %v1867_v14   ;;  %v1998_v14 = vld [vmem:[%s7139_s9 + $0xe0] sm:$0x3] }
 0x5c8   :  { %2148 = vperm.xlu2 %4713, %v2134_v3  }
 0x5cd   :  { %4410 = vmatmul.msk.f32.gmra.mxu1 %vm583_vm3, %v5352_v9  ;;  %v4443_v9 = vld [vmem:[%s7130_s0 + $0x8] sm:$0xf] }
 0x5ce   :  { %4444 = vmatpush.msk.msrb.mxu1 %vm81_vm0, %v4443_v9 }
 0x5cf   :  { %1881 = vperm.xlu1 %4682, %v1863_v55   ;;  %1886 = vperm.xlu0 %4681, %v1864_v23   ;;  %v5999_v55 = vld [vmem:[%s7135_s5 + $0x70] sm:$0xff] }
 0x5d0   :  { %1931 = vperm.xlu2 %4713, %v1927_v1   ;;  %v4422_v23 = vld [vmem:[%s7135_s5 + $0xb0] sm:$0xff] }
 0x5d5   :  { %4411 = vmatmul.msk.f32.gmra.mxu1 %vm583_vm3, %v5359_v18  ;;  %v1928_v18 = vld [vmem:[%s7138_s8 + $0x8] sm:$0x3] }
 0x5d7   :  { %2153 = vperm.xlu1 %4682, %v2135_v51   ;;  %1871 = vperm.xlu0 %4681, %v1861_v11   ;;  %v6018_v11 = vld [vmem:[%s7135_s5 + $0x78] sm:$0xff] }
 0x5dd   :  { %4412 = vmatmul.msk.f32.gmra.mxu1 %vm583_vm3, %v5366_v37 }
 0x5df   :  { %2138 = vperm.xlu1 %4682, %v2132_v15   ;;  %2143 = vperm.xlu0 %4681, %v5886_v21  }
 0x5e5   :  { %4413 = vmatmul.msk.f32.gmra.mxu1 %vm583_vm3, %v5381_v42 }
 0x5e7   :  { %1936 = vperm.xlu0 %4681, %v1928_v18  }
 0x5ed   :  { %4414 = vmatmul.msk.f32.gmra.mxu1 %vm583_vm3, %v5396_v45 }
 0x5f5   :  { %4415 = vmatmul.msk.f32.gmra.mxu1 %vm583_vm3, %v5411_v49 }
 0x5f9   :  { %v4786_v37 = vpop.permute.xlu2 %4785 }
 0x5fa   :  { %v4787_v49 = vunpack.i.l.bf16 %v4786_v37 }
 0x5fd   :  { %4445 = vmatmul.msk.f32.vlgmr.msrb.gmra.mxu1 %vm68_vm1, %v5608_v63  ;;  %v4788_v63 = vunpack.i.h.bf16 %v4786_v37 }
 0x605   :  { %4446 = vmatmul.msk.f32.gmra.mxu1 %vm68_vm1, %v5615_v32 }
 0x60d   :  { %4447 = vmatmul.msk.f32.gmra.mxu1 %vm68_vm1, %v5622_v56 }
 0x615   :  { %4448 = vmatmul.msk.f32.gmra.mxu1 %vm68_vm1, %v5629_v0  ;;  %v4811_v0 = vpop.permute.xlu2 %4810 }
 0x616   :  { %v4812_v52 = vunpack.i.l.bf16 %v4811_v0  ;;  %v4813_v7 = vunpack.i.h.bf16 %v4811_v0  ;;  %v2558_v0 = vld [vmem:[%s7134_s4 + $0x30] sm:$0xff] }
 0x621   :  { %v4801_v42 = vpop.permute.xlu1 %4800  ;;  %v4791_v50 = vpop.permute.xlu0 %4790 }
 0x622   :  { %v4802_v20 = vunpack.i.l.bf16 %v4801_v42  ;;  %v4792_v45 = vunpack.i.l.bf16 %v4791_v50  ;;  %v4803_v62 = vunpack.i.h.bf16 %v4801_v42  ;;  %v4793_v6 = vunpack.i.h.bf16 %v4791_v50 }
 0x624   :  { %1658 = vmatpush.msrb.mxu3 %v4792_v45  ;;  %1820 = vmatpush.msrb.mxu2 %v4802_v20 }
 0x626   :  { %1659 = vmatpush.msrb.mxu3 %v4793_v6  ;;  %1821 = vmatpush.msrb.mxu2 %v4803_v62 }
 0x628   :  { %1660 = vmatpush.msrb.mxu3 %v4787_v49 }
 0x629   :  { %v4796_v32 = vpop.permute.xlu0 %4795  ;;  %v4806_v60 = vpop.permute.xlu1 %4805 }
 0x62a   :  { %v4797_v56 = vunpack.i.l.bf16 %v4796_v32  ;;  %v4807_v16 = vunpack.i.l.bf16 %v4806_v60  ;;  %1661 = vmatpush.msrb.mxu3 %v4788_v63  ;;  %v4798_v17 = vunpack.i.h.bf16 %v4796_v32  ;;  %v4808_v34 = vunpack.i.h.bf16 %v4806_v60 }
 0x62c   :  { %1662 = vmatpush.msrb.mxu3 %v4807_v16  ;;  %1822 = vmatpush.msrb.mxu2 %v4797_v56 }
 0x62e   :  { %1663 = vmatpush.msrb.mxu3 %v4808_v34  ;;  %1823 = vmatpush.msrb.mxu2 %v4798_v17  ;;  %v2555_v17 = vld [vmem:[%s7134_s4 + $0x18] sm:$0xff]  ;;  %v2552_v34 = vld [vmem:[%s7134_s4] sm:$0xff] }
 0x630   :  { %1824 = vmatpush.msrb.mxu2 %v4812_v52  ;;  %v7166_v52 = vld [vmem:[#allocation7_spill] sm:$0xff] }
 0x631   :  { %v4821_v43 = vpop.permute.xlu1 %4820  ;;  %v4816_v38 = vpop.permute.xlu0 %4815 }
 0x632   :  { %v4822_v12 = vunpack.i.l.bf16 %v4821_v43  ;;  %v4817_v54 = vunpack.i.l.bf16 %v4816_v38  ;;  %1825 = vmatpush.msrb.mxu2 %v4813_v7  ;;  %v4823_v5 = vunpack.i.h.bf16 %v4821_v43  ;;  %v4818_v28 = vunpack.i.h.bf16 %v4816_v38  ;;  %v7167_v7 = vld [vmem:[#allocation9_spill] sm:$0xff]  ;;  %v7168_v43 = vld [vmem:[#allocation8_spill] sm:$0xff]  ;;  %v7169_v38 = vld [vmem:[#allocation10_spill] sm:$0xff] }
 0x634   :  { %1664 = vmatpush.msrb.mxu3 %v4817_v54  ;;  %1826 = vmatpush.msrb.mxu2 %v4822_v12 }
 0x636   :  { %1665 = vmatpush.msrb.mxu3 %v4818_v28  ;;  %1827 = vmatpush.msrb.mxu2 %v4823_v5 }
 0x637   :  { %4400 = vmatmul.msk.f32.vlgmr.msrb.gmra.mxu3 %vm583_vm3, %v5911_v30  ;;  %4424 = vmatmul.msk.f32.vlgmr.msrb.gmra.mxu2 %vm583_vm3, %v5916_v36 }
 0x638   :  { %4437 = vmatpush.msk.msra.mxu3 %vm966_vm4, %v1998_v14 }
 0x639   :  { %v5987_v24 = vpop.permute.xlu1 %1896  ;;  %v5994_v3 = vpop.permute.xlu0 %1901 }
 0x63a   :  { %v5922_v31 = vpop.f32.mrf.mxu1  ;;  %2044 = vmatpush.msra.mxu3 %v5473_v25  ;;  %v6023_v25 = vld [vmem:[%s7135_s5 + $0xb8] sm:$0xff] }
 0x63c   :  { %2045 = vmatpush.msra.mxu3 %v5482_v40  ;;  %v6034_v40 = vpop.permute.xlu2 %1906 }
 0x63e   :  { %2046 = vmatpush.msra.mxu3 %v5491_v48 }
 0x63f   :  { %4401 = vmatmul.msk.f32.gmra.mxu3 %vm583_vm3, %v5927_v58  ;;  %4425 = vmatmul.msk.f32.gmra.mxu2 %vm583_vm3, %v4417_v19 }
 0x640   :  { %2047 = vmatpush.msra.mxu3 %v5500_v27 }
 0x641   :  { %v6013_v51 = vpop.permute.xlu1 %1881  ;;  %v6026_v9 = vpop.permute.xlu0 %1886 }
 0x642   :  { %v5935_v22 = vpop.f32.mrf.mxu1  ;;  %2048 = vmatpush.msra.mxu3 %v5509_v59 }
 0x644   :  { %2049 = vmatpush.msra.mxu3 %v5520_v4  ;;  %v6043_v18 = vpop.permute.xlu2 %1891 }
 0x646   :  { %2050 = vmatpush.msra.mxu3 %v5565_v41 }
 0x647   :  { %4402 = vmatmul.msk.f32.gmra.mxu3 %vm583_vm3, %v5940_v29  ;;  %4426 = vmatmul.msk.f32.gmra.mxu2 %vm583_vm3, %v4418_v35 }
 0x648   :  { %2051 = vmatpush.msra.mxu3 %v5577_v44 }
 0x649   :  { %v2154_v27 = vpop.permute.xlu1 %2153  ;;  %v6041_v59 = vpop.permute.xlu0 %1871 }
 0x64a   :  { %v5948_v61 = vpop.f32.mrf.mxu1  ;;  %2052 = vmatpush.msra.mxu3 %v5589_v26 }
 0x64c   :  { %v6045_v6 = vpop.permute.xlu2 %1876 }
 0x64f   :  { %4403 = vmatmul.msk.f32.gmra.mxu3 %vm583_vm3, %v5953_v2  ;;  %4427 = vmatmul.msk.f32.gmra.mxu2 %vm583_vm3, %v4419_v57 }
 0x651   :  { %v2139_v37 = vpop.permute.xlu1 %2138  ;;  %v2144_v50 = vpop.permute.xlu0 %2143 }
 0x652   :  { %v5961_v13 = vpop.f32.mrf.mxu1 }
 0x654   :  { %v2149_v49 = vpop.permute.xlu2 %2148 }
 0x657   :  { %4404 = vmatmul.msk.f32.gmra.mxu3 %vm583_vm3, %v5966_v53  ;;  %4428 = vmatmul.msk.f32.gmra.mxu2 %vm583_vm3, %v4420_v10 }
 0x65a   :  { %v5974_v8 = vpop.f32.mrf.mxu1 }
 0x65f   :  { %4405 = vmatmul.msk.f32.gmra.mxu3 %vm583_vm3, %v5979_v46  ;;  %4429 = vmatmul.msk.f32.gmra.mxu2 %vm583_vm3, %v4421_v33 }
 0x662   :  { %v5989_v47 = vpop.f32.mrf.mxu1 }
 0x667   :  { %4406 = vmatmul.msk.f32.gmra.mxu3 %vm583_vm3, %v5999_v55  ;;  %4430 = vmatmul.msk.f32.gmra.mxu2 %vm583_vm3, %v4422_v23 }
 0x66a   :  { %v6010_v1 = vpop.f32.mrf.mxu1 }
 0x66f   :  { %4407 = vmatmul.msk.f32.gmra.mxu3 %vm583_vm3, %v6018_v11  ;;  %4431 = vmatmul.msk.f32.gmra.mxu2 %vm583_vm3, %v6023_v25 }
 0x672   :  { %v6036_v48 = vpop.f32.mrf.mxu1 }
 0x67a   :  { %v2188_v15 = vpop.f32.mrf.mxu1 }
 0x67b   :  { %v2189_v42 = vadd.f32 %v2188_v15, %v2139_v37 }
 0x67d   :  { %v2200_v45 = vmax.f32 %v2189_v42, 0.0 }
 0x682   :  { %v2191_v4 = vpop.f32.mrf.mxu1 }
 0x683   :  { %v2192_v20 = vadd.f32 %v2191_v4, %v2144_v50 }
 0x685   :  { %v2201_v62 = vmax.f32 %v2192_v20, 0.0 }
 0x687   :  { %v4829_v41 = vpack.i.bf16 %v2200_v45, %v2201_v62 }
 0x689   :  { %4830 = vrot.lane.b32.xlu2 %v4829_v41, %s4992_s21 }
 0x68a   :  { %v2194_v44 = vpop.f32.mrf.mxu1 }
 0x68b   :  { %v2195_v26 = vadd.f32 %v2194_v44, %v2149_v49 }
 0x68d   :  { %v2202_v60 = vmax.f32 %v2195_v26, 0.0 }
 0x691   :  { %4845 = vrot.lane.b32.xlu2 %v4829_v41, %s4991_s16 }
 0x692   :  { %v2197_v63 = vpop.f32.mrf.mxu1 }
 0x693   :  { %v2198_v32 = vadd.f32 %v2197_v63, %v2154_v27 }
 0x695   :  { %v2203_v56 = vmax.f32 %v2198_v32, 0.0 }
 0x697   :  { %2337 = vmatpush.msrb.mxu3 %v2203_v56  ;;  %v4834_v16 = vpack.i.bf16 %v2202_v60, %v2203_v56 }
 0x699   :  { %4835 = vrot.lane.b32.xlu0 %v4834_v16, %s4991_s16  ;;  %4825 = vrot.lane.b32.xlu1 %v4834_v16, %s4992_s21 }
 0x69a   :  { %2338 = vmatpush.msrb.mxu3 %v2202_v60  ;;  %2592 = vperm.xlu2 %4713, %v2558_v0  }
 0x69c   :  { %2339 = vmatpush.msrb.mxu3 %v2201_v62 }
 0x69e   :  { %2340 = vmatpush.msrb.mxu3 %v2200_v45 }
 0x6a1   :  { %4840 = vrot.lane.b32.xlu1 %v4834_v16, %s4993_s24  ;;  %4850 = vrot.lane.b32.xlu0 %v4829_v41, %s4993_s24 }
 0x6a2   :  { %2577 = vperm.xlu2 %4713, %v2555_v17  }
 0x6a9   :  { %2597 = vperm.xlu1 %4682, %v5658_v39   ;;  %2587 = vperm.xlu0 %4681, %v7166_v52  }
 0x6aa   :  { %2562 = vperm.xlu2 %4713, %v2552_v34  }
 0x6b1   :  { %2582 = vperm.xlu1 %4682, %v7167_v7   ;;  %2572 = vperm.xlu0 %4681, %v7168_v43   ;;  %v6085_v43 = vpop.permute.xlu2 %1931 }
 0x6b9   :  { %2567 = vperm.xlu1 %4682, %v7169_v38  }
 0x6ba   :  { %v1667_v12 = vpop.f32.mrf.mxu3  ;;  %v1829_v54 = vpop.f32.mrf.mxu2 }
 0x6bb   :  { %v1733_v16 = vadd.f32 %v5922_v31, %v1667_v12  ;;  %v6082_v31 = vpop.permute.xlu0 %1936  ;;  %v1997_v12 = vld [vmem:[%s7139_s9 + $0xd8] sm:$0x3] }
 0x6bd   :  { %v1853_v34 = vadd.f32 %v1829_v54, %v1733_v16  ;;  %v6102_v54 = vld [vmem:[%s7139_s9 + $0xc0] sm:$0xff] }
 0x6be   :  { %v4449_v16 = vld [vmem:[%s7133_s3 + $0x40] sm:$0xff] }
 0x6c2   :  { %v1670_v5 = vpop.f32.mrf.mxu3  ;;  %v1832_v28 = vpop.f32.mrf.mxu2 }
 0x6ca   :  { %v1673_v19 = vpop.f32.mrf.mxu3  ;;  %v1835_v35 = vpop.f32.mrf.mxu2 }
 0x6cb   :  { %v1739_v26 = vadd.f32 %v5948_v61, %v1673_v19  ;;  %v6108_v19 = vld [vmem:[%s7139_s9 + $0xa8] sm:$0xff] }
 0x6d2   :  { %v1676_v57 = vpop.f32.mrf.mxu3  ;;  %v1838_v10 = vpop.f32.mrf.mxu2 }
 0x6d3   :  { %v1742_v41 = vadd.f32 %v5961_v13, %v1676_v57  ;;  %v1926_v57 = vld [vmem:[%s7137_s7 + $0x8] sm:$0x3] }
 0x6d5   :  { %v1856_v60 = vadd.f32 %v1838_v10, %v1742_v41  ;;  %v6154_v41 = vld [vmem:[%s7139_s9] sm:$0xff] }
 0x6d6   :  { %7174 = vst [vmem:[#allocation12_spill] sm:$0xff] %v6154_v41 }
 0x6d7   :  { %v1912_v61 = vadd.f32 %v6026_v9, %v1856_v60  ;;  %v6201_v60 = vld [vmem:[%s7139_s9 + $0x40] sm:$0xff] }
 0x6d9   :  { %v1920_v52 = vmax.f32 %v1912_v61, 0.0 }
 0x6da   :  { %v1679_v33 = vpop.f32.mrf.mxu3  ;;  %v1841_v14 = vpop.f32.mrf.mxu2 }
 0x6db   :  { %v1745_v20 = vadd.f32 %v5974_v8, %v1679_v33  ;;  %v6118_v33 = vld [vmem:[%s7139_s9 + $0x90] sm:$0xff] }
 0x6dd   :  { %v1857_v63 = vadd.f32 %v1841_v14, %v1745_v20  ;;  %v6142_v20 = vld [vmem:[%s7139_s9 + $0x30] sm:$0xff] }
 0x6de   :  { %7172 = vst [vmem:[#allocation8_spill] sm:$0xff] %v6142_v20 }
 0x6df   :  { %v1913_v13 = vadd.f32 %v6043_v18, %v1857_v63  ;;  %v1909_v18 = vadd.f32 %v6041_v59, %v1853_v34  ;;  %v6176_v63 = vld [vmem:[%s7139_s9 + $0xa0] sm:$0xff] }
 0x6e0   :  { %v4489_v34 = vld [vmem:[%s7133_s3 + $0xc0] sm:$0xff] }
 0x6e1   :  { %v1917_v38 = vmax.f32 %v1909_v18, 0.0 }
 0x6e2   :  { %v1682_v39 = vpop.f32.mrf.mxu3  ;;  %v1844_v23 = vpop.f32.mrf.mxu2 }
 0x6e3   :  { %v1748_v42 = vadd.f32 %v5989_v47, %v1682_v39  ;;  %v1736_v47 = vadd.f32 %v5935_v22, %v1670_v5  ;;  %v1921_v22 = vmax.f32 %v1913_v13, 0.0  ;;  %v6124_v39 = vld [vmem:[%s7139_s9 + $0x78] sm:$0xff] }
 0x6e5   :  { %v1858_v44 = vadd.f32 %v1844_v23, %v1748_v42  ;;  %v1854_v17 = vadd.f32 %v1832_v28, %v1736_v47  ;;  %v4831_v28 = vpop.permute.xlu2 %4830  ;;  %v6194_v47 = vld [vmem:[%s7139_s9 + $0x58] sm:$0xff] }
 0x6e6   :  { %v4832_v10 = vunpack.i.l.bf16 %v4831_v28  ;;  %v4833_v14 = vunpack.i.h.bf16 %v4831_v28  ;;  %v4473_v28 = vld [vmem:[%s7133_s3 + $0x80] sm:$0xff] }
 0x6e7   :  { %v1914_v56 = vadd.f32 %v5987_v24, %v1858_v44  ;;  %v1910_v24 = vadd.f32 %v6045_v6, %v1854_v17  ;;  %v1999_v44 = vld [vmem:[%s7139_s9 + $0xe8] sm:$0x3] }
 0x6e8   :  { %v4450_v17 = vld [vmem:[%s7133_s3 + $0x48] sm:$0xff] }
 0x6e9   :  { %v1918_v9 = vmax.f32 %v1910_v24, 0.0 }
 0x6ea   :  { %v1685_v27 = vpop.f32.mrf.mxu3  ;;  %v1847_v15 = vpop.f32.mrf.mxu2 }
 0x6eb   :  { %v1751_v37 = vadd.f32 %v6010_v1, %v1685_v27 }
 0x6ed   :  { %v1859_v45 = vadd.f32 %v1847_v15, %v1751_v37  ;;  %v6130_v15 = vld [vmem:[%s7139_s9 + $0x60] sm:$0xff] }
 0x6ee   :  { %7170 = vst [vmem:[#allocation7_spill] sm:$0xff] %v6130_v15 }
 0x6ef   :  { %v1915_v32 = vadd.f32 %v5994_v3, %v1859_v45  ;;  %v1922_v3 = vmax.f32 %v1914_v56, 0.0  ;;  %v6207_v56 = vld [vmem:[%s7139_s9 + $0x28] sm:$0xff] }
 0x6f1   :  { %v1923_v0 = vmax.f32 %v1915_v32, 0.0  ;;  %v6182_v32 = vld [vmem:[%s7139_s9 + $0x88] sm:$0xff] }
 0x6f2   :  { %v1688_v50 = vpop.f32.mrf.mxu3  ;;  %v1850_v4 = vpop.f32.mrf.mxu2 }
 0x6f3   :  { %v1754_v62 = vadd.f32 %v6036_v48, %v1688_v50  ;;  %v1855_v48 = vadd.f32 %v1835_v35, %v1739_v26  ;;  %v6136_v50 = vld [vmem:[%s7139_s9 + $0x48] sm:$0xff]  ;;  %v6170_v26 = vld [vmem:[%s7139_s9 + $0xb8] sm:$0xff] }
 0x6f4   :  { %7171 = vst [vmem:[#allocation9_spill] sm:$0xff] %v6136_v50 }
 0x6f5   :  { %v1860_v49 = vadd.f32 %v1850_v4, %v1754_v62  ;;  %v6148_v62 = vld [vmem:[%s7139_s9 + $0x18] sm:$0xff] }
 0x6f6   :  { %7173 = vst [vmem:[#allocation10_spill] sm:$0xff] %v6148_v62 }
 0x6f7   :  { %v1916_v1 = vadd.f32 %v6034_v40, %v1860_v49  ;;  %v1911_v40 = vadd.f32 %v6013_v51, %v1855_v48  ;;  %v6090_v51 = vld [vmem:[%s7137_s7] sm:$0xff]  ;;  %v6164_v49 = vld [vmem:[%s7139_s9 + $0xd0] sm:$0xff] }
 0x6f9   :  { %v1924_v8 = vmax.f32 %v1916_v1, 0.0  ;;  %v1919_v7 = vmax.f32 %v1911_v40, 0.0  ;;  %v6188_v1 = vld [vmem:[%s7139_s9 + $0x70] sm:$0xff] }
 0x6fb   :  { %1953 = vmatpush.msra.mxu0 %v1924_v8  ;;  %v6212_v8 = vld [vmem:[%s7139_s9 + $0x10] sm:$0xff] }
 0x6fd   :  { %1954 = vmatpush.msra.mxu0 %v1923_v0 }
 0x6ff   :  { %1955 = vmatpush.msra.mxu0 %v1922_v3  ;;  %v4846_v3 = vpop.permute.xlu2 %4845 }
 0x700   :  { %v4848_v18 = vunpack.i.h.bf16 %v4846_v3 }
 0x701   :  { %1956 = vmatpush.msra.mxu0 %v1921_v22  ;;  %v4847_v22 = vunpack.i.l.bf16 %v4846_v3  ;;  %v2211_v3 = vld [vmem:[%s7133_s3 + $0x38] sm:$0xff] }
 0x703   :  { %1957 = vmatpush.msra.mxu0 %v1920_v52 }
 0x705   :  { %1958 = vmatpush.msra.mxu0 %v1919_v7 }
 0x707   :  { %1959 = vmatpush.msra.mxu0 %v1918_v9  ;;  %v4490_v9 = vld [vmem:[%s7133_s3 + $0xc8] sm:$0xff] }
 0x709   :  { %1960 = vmatpush.msra.mxu0 %v1917_v38  ;;  %v4452_v38 = vld [vmem:[%s7133_s3 + $0x58] sm:$0xff] }
 0x70a   :  { %4432 = vmatmul.msk.f32.vlgmr.msra.gmra.mxu0 %vm583_vm3, %v6090_v51 }
 0x70b   :  { %v6094_v6 = vpop.permute.xlu0 %4835  ;;  %v4826_v59 = vpop.permute.xlu1 %4825  ;;  %4434 = vmatpush.msk.msrb.mxu0 %vm966_vm4, %v1997_v12  ;;  %v4453_v12 = vld [vmem:[%s7133_s3 + $0x60] sm:$0xff] }
 0x70c   :  { %v4827_v5 = vunpack.i.l.bf16 %v4826_v59  ;;  %v4828_v35 = vunpack.i.h.bf16 %v4826_v59  ;;  %v4837_v61 = vunpack.i.l.bf16 %v6094_v6  ;;  %v4838_v40 = vunpack.i.h.bf16 %v6094_v6  ;;  %v4491_v6 = vld [vmem:[%s7133_s3 + $0xd0] sm:$0xff]  ;;  %v2205_v59 = vld [vmem:[%s7133_s3 + $0x8] sm:$0xff] }
 0x70d   :  { %2022 = vmatpush.msrb.mxu0 %v6102_v54 }
 0x70e   :  { %2272 = vmatpush.msra.mxu2 %v4827_v5  ;;  %v4492_v5 = vld [vmem:[%s7133_s3 + $0xd8] sm:$0xff] }
 0x70f   :  { %2023 = vmatpush.msrb.mxu0 %v6108_v19 }
 0x710   :  { %2273 = vmatpush.msra.mxu2 %v4828_v35  ;;  %v2206_v35 = vld [vmem:[%s7133_s3 + $0x10] sm:$0xff] }
 0x711   :  { %2024 = vmatpush.msrb.mxu0 %v6118_v33 }
 0x712   :  { %2274 = vmatpush.msra.mxu2 %v4832_v10  ;;  %4433 = vmatmul.msk.f32.gmra.mxu0 %vm583_vm3, %v1926_v57  ;;  %v4454_v57 = vld [vmem:[%s7133_s3 + $0x68] sm:$0xff]  ;;  %v4493_v10 = vld [vmem:[%s7133_s3 + $0xe0] sm:$0xff] }
 0x713   :  { %v4841_v23 = vpop.permute.xlu1 %4840  ;;  %v4851_v37 = vpop.permute.xlu0 %4850  ;;  %2025 = vmatpush.msrb.mxu0 %v6124_v39 }
 0x714   :  { %v4842_v27 = vunpack.i.l.bf16 %v4841_v23  ;;  %2275 = vmatpush.msra.mxu2 %v4833_v14  ;;  %v4843_v42 = vunpack.i.h.bf16 %v4841_v23  ;;  %v4852_v4 = vunpack.i.l.bf16 %v4851_v37  ;;  %v4853_v45 = vunpack.i.h.bf16 %v4851_v37  ;;  %v4474_v14 = vld [vmem:[%s7133_s3 + $0x88] sm:$0xff]  ;;  %v2207_v23 = vld [vmem:[%s7133_s3 + $0x18] sm:$0xff] }
 0x715   :  { %2026 = vmatpush.msrb.mxu0 %v6130_v15  ;;  %4457 = vmatmul.msk.f32.vlgmr.msra.gmra.mxu2 %vm151_vm2, %v4449_v16  ;;  %v4494_v37 = vld [vmem:[%s7133_s3 + $0xe8] sm:$0xff]  ;;  %v4476_v16 = vld [vmem:[%s7133_s3 + $0x98] sm:$0xff] }
 0x716   :  { %2515 = vmatpush.msra.mxu1 %v4842_v27  ;;  %v4455_v27 = vld [vmem:[%s7133_s3 + $0x70] sm:$0xff] }
 0x717   :  { %2027 = vmatpush.msrb.mxu0 %v6136_v50 }
 0x718   :  { %2516 = vmatpush.msra.mxu1 %v4843_v42  ;;  %v4475_v42 = vld [vmem:[%s7133_s3 + $0x90] sm:$0xff] }
 0x719   :  { %2028 = vmatpush.msrb.mxu0 %v6142_v20 }
 0x71a   :  { %2517 = vmatpush.msra.mxu1 %v4852_v4  ;;  %v2208_v4 = vld [vmem:[%s7133_s3 + $0x20] sm:$0xff] }
 0x71b   :  { %2029 = vmatpush.msrb.mxu0 %v6148_v62 }
 0x71c   :  { %2518 = vmatpush.msra.mxu1 %v4853_v45  ;;  %v4456_v45 = vld [vmem:[%s7133_s3 + $0x78] sm:$0xff] }
 0x71d   :  { %2030 = vmatpush.msrb.mxu0 %v6154_v41  ;;  %4458 = vmatmul.msk.f32.gmra.mxu2 %vm151_vm2, %v4450_v17  ;;  %v2210_v17 = vld [vmem:[%s7133_s3 + $0x30] sm:$0xff] }
 0x71e   :  { %4497 = vmatmul.msk.f32.vlgmr.msra.gmra.mxu1 %vm151_vm2, %v4489_v34  ;;  %v4479_v34 = vld [vmem:[%s7133_s3 + $0xb0] sm:$0xff] }
 0x71f   :  { %4440 = vmatpush.msk.msra.mxu0 %vm966_vm4, %v1999_v44  ;;  %v4495_v44 = vld [vmem:[%s7133_s3 + $0xf0] sm:$0xff] }
 0x721   :  { %2066 = vmatpush.msra.mxu0 %v6164_v49 }
 0x723   :  { %2067 = vmatpush.msra.mxu0 %v6170_v26 }
 0x725   :  { %2068 = vmatpush.msra.mxu0 %v6176_v63 }
 0x726   :  { %4498 = vmatmul.msk.f32.gmra.mxu1 %vm151_vm2, %v4490_v9 }
 0x727   :  { %2069 = vmatpush.msra.mxu0 %v6182_v32 }
 0x729   :  { %2070 = vmatpush.msra.mxu0 %v6188_v1 }
 0x72b   :  { %2071 = vmatpush.msra.mxu0 %v6194_v47 }
 0x72d   :  { %2072 = vmatpush.msra.mxu0 %v6201_v60 }
 0x72e   :  { %4499 = vmatmul.msk.f32.gmra.mxu1 %vm151_vm2, %v4491_v6 }
 0x72f   :  { %2073 = vmatpush.msra.mxu0 %v6207_v56 }
 0x731   :  { %2074 = vmatpush.msra.mxu0 %v6212_v8 }
 0x736   :  { %4500 = vmatmul.msk.f32.gmra.mxu1 %vm151_vm2, %v4492_v5 }
 0x73e   :  { %4501 = vmatmul.msk.f32.gmra.mxu1 %vm151_vm2, %v4493_v10 }
 0x746   :  { %4502 = vmatmul.msk.f32.gmra.mxu1 %vm151_vm2, %v4494_v37 }
 0x74e   :  { %4503 = vmatmul.msk.f32.gmra.mxu1 %vm151_vm2, %v4495_v44 }
 0x787   :  { %v1962_v48 = vpop.f32.mrf.mxu0 }
 0x788   :  { %v1963_v13 = vadd.f32 %v1962_v48, %v6085_v43  ;;  %v4451_v43 = vld [vmem:[%s7133_s3 + $0x50] sm:$0xff]  ;;  %v2209_v48 = vld [vmem:[%s7133_s3 + $0x28] sm:$0xff] }
 0x789   :  { %4459 = vmatmul.msk.f32.gmra.mxu2 %vm151_vm2, %v4451_v43 }
 0x78a   :  { %v1968_v0 = vmax.f32 %v1963_v13, 0.0  ;;  %v4496_v13 = vld [vmem:[%s7133_s3 + $0xf8] sm:$0xff] }
 0x78b   :  { %4504 = vmatmul.msk.f32.gmra.mxu1 %vm151_vm2, %v4496_v13 }
 0x78c   :  { %4435 = vmatmul.msk.f32.vlgmr.msrb.gmra.mxu0 %vm959_vm5, %v1968_v0  ;;  %4438 = vmatmul.msk.f32.vlgmr.msra.gmra.mxu3 %vm959_vm5, %v1968_v0 }
 0x78d   :  { %2422 = vmatpush.msrb.mxu0 %v4837_v61  ;;  %v4478_v61 = vld [vmem:[%s7133_s3 + $0xa8] sm:$0xff] }
 0x78f   :  { %2423 = vmatpush.msrb.mxu0 %v4838_v40  ;;  %v1965_v24 = vpop.f32.mrf.mxu0  ;;  %v4480_v40 = vld [vmem:[%s7133_s3 + $0xb8] sm:$0xff] }
 0x790   :  { %v1966_v52 = vadd.f32 %v1965_v24, %v6082_v31  ;;  %v2204_v31 = vld [vmem:[%s7133_s3] sm:$0xff] }
 0x791   :  { %2424 = vmatpush.msrb.mxu0 %v4847_v22  ;;  %4460 = vmatmul.msk.f32.gmra.mxu2 %vm151_vm2, %v4452_v38 }
 0x792   :  { %v1969_v7 = vmax.f32 %v1966_v52, 0.0 }
 0x793   :  { %2425 = vmatpush.msrb.mxu0 %v4848_v18 }
 0x794   :  { %4436 = vmatmul.msk.f32.gmra.mxu0 %vm959_vm5, %v1969_v7  ;;  %4439 = vmatmul.msk.f32.gmra.mxu3 %vm959_vm5, %v1969_v7 }
 0x798   :  { %v2277_v18 = vpop.f32.mrf.mxu2 }
 0x799   :  { %4461 = vmatmul.msk.f32.gmra.mxu2 %vm151_vm2, %v4453_v12 }
 0x79b   :  { %v2520_v9 = vpop.f32.mrf.mxu1 }
 0x79c   :  { %4441 = vmatmul.msk.f32.vlgmr.msra.gmra.mxu0 %vm959_vm5, %v1968_v0  ;;  %4465 = vmatmul.msk.f32.vlgmr.msrb.gmra.mxu3 %vm151_vm2, %v2204_v31  ;;  %v4477_v0 = vld [vmem:[%s7133_s3 + $0xa0] sm:$0xff] }
 0x7a0   :  { %v2280_v31 = vpop.f32.mrf.mxu2 }
 0x7a1   :  { %4462 = vmatmul.msk.f32.gmra.mxu2 %vm151_vm2, %v4454_v57 }
 0x7a4   :  { %4442 = vmatmul.msk.f32.gmra.mxu0 %vm959_vm5, %v1969_v7  ;;  %4466 = vmatmul.msk.f32.gmra.mxu3 %vm151_vm2, %v2205_v59  ;;  %v2523_v59 = vpop.f32.mrf.mxu1 }
 0x7a9   :  { %4463 = vmatmul.msk.f32.gmra.mxu2 %vm151_vm2, %v4455_v27  ;;  %v2588_v27 = vpop.permute.xlu0 %2587 }
 0x7ac   :  { %4481 = vmatmul.msk.f32.vlgmr.msrb.gmra.mxu0 %vm151_vm2, %v4473_v28  ;;  %4467 = vmatmul.msk.f32.gmra.mxu3 %vm151_vm2, %v2206_v35  ;;  %v2526_v57 = vpop.f32.mrf.mxu1 }
 0x7b1   :  { %4464 = vmatmul.msk.f32.gmra.mxu2 %vm151_vm2, %v4456_v45  ;;  %v6360_v45 = vpop.permute.xlu2 %2592 }
 0x7b4   :  { %4482 = vmatmul.msk.f32.gmra.mxu0 %vm151_vm2, %v4474_v14  ;;  %4468 = vmatmul.msk.f32.gmra.mxu3 %vm151_vm2, %v2207_v23 }
 0x7bc   :  { %4483 = vmatmul.msk.f32.gmra.mxu0 %vm151_vm2, %v4475_v42  ;;  %4469 = vmatmul.msk.f32.gmra.mxu3 %vm151_vm2, %v2208_v4  ;;  %v2529_v4 = vpop.f32.mrf.mxu1 }
 0x7c4   :  { %4484 = vmatmul.msk.f32.gmra.mxu0 %vm151_vm2, %v4476_v16  ;;  %4470 = vmatmul.msk.f32.gmra.mxu3 %vm151_vm2, %v2209_v48 }
 0x7cc   :  { %4485 = vmatmul.msk.f32.gmra.mxu0 %vm151_vm2, %v4477_v0  ;;  %4471 = vmatmul.msk.f32.gmra.mxu3 %vm151_vm2, %v2210_v17 }
 0x7d4   :  { %4486 = vmatmul.msk.f32.gmra.mxu0 %vm151_vm2, %v4478_v61  ;;  %4472 = vmatmul.msk.f32.gmra.mxu3 %vm151_vm2, %v2211_v3  ;;  %v2573_v3 = vpop.permute.xlu0 %2572 }
 0x7dc   :  { %4487 = vmatmul.msk.f32.gmra.mxu0 %vm151_vm2, %v4479_v34  ;;  %v2532_v34 = vpop.f32.mrf.mxu1 }
 0x7e4   :  { %4488 = vmatmul.msk.f32.gmra.mxu0 %vm151_vm2, %v4480_v40 }
 0x809   :  { %v6354_v22 = vpop.f32.mrf.mxu0 }
 0x80a   :  { %7175 = vst [vmem:[#allocation13_spill] sm:$0xff] %v6354_v22 }
 0x80c   :  { %v2283_v5 = vpop.f32.mrf.mxu2 }
 0x80f   :  { %v6356_v24 = vpop.f32.mrf.mxu3 }
 0x810   :  { %7176 = vst [vmem:[#allocation14_spill] sm:$0xff] %v6356_v24 }
 0x811   :  { %v2035_v52 = vpop.f32.mrf.mxu0 }
 0x814   :  { %v2286_v14 = vpop.f32.mrf.mxu2 }
 0x817   :  { %v2057_v7 = vpop.f32.mrf.mxu3 }
 0x818   :  { %v2578_v7 = vpop.permute.xlu2 %2577 }
 0x819   :  { %v2076_v43 = vpop.f32.mrf.mxu0 }
 0x81a   :  { %v2598_v43 = vpop.permute.xlu1 %2597 }
 0x81c   :  { %v2289_v16 = vpop.f32.mrf.mxu2 }
 0x81f   :  { %v2342_v38 = vpop.f32.mrf.mxu3 }
 0x821   :  { %v6358_v6 = vpop.f32.mrf.mxu0 }
 0x822   :  { %7177 = vst [vmem:[#allocation15_spill] sm:$0xff] %v6358_v6 }
 0x827   :  { %v2345_v12 = vpop.f32.mrf.mxu3 }
 0x829   :  { %v2427_v28 = vpop.f32.mrf.mxu0 }
 0x82f   :  { %v2348_v35 = vpop.f32.mrf.mxu3 }
 0x830   :  { %v2349_v37 = vadd.f32 %v2348_v35, %v2283_v5  ;;  %v2292_v5 = vpop.f32.mrf.mxu2 }
 0x831   :  { %v2430_v10 = vpop.f32.mrf.mxu0 }
 0x837   :  { %v2351_v23 = vpop.f32.mrf.mxu3 }
 0x838   :  { %v2352_v48 = vadd.f32 %v2351_v23, %v2286_v14 }
 0x839   :  { %v2433_v42 = vpop.f32.mrf.mxu0 }
 0x83a   :  { %v2453_v44 = vadd.f32 %v2433_v42, %v2349_v37 }
 0x83c   :  { %v2546_v0 = vadd.f32 %v2526_v57, %v2453_v44  ;;  %v2346_v44 = vadd.f32 %v2345_v12, %v2280_v31 }
 0x83e   :  { %v6362_v40 = vadd.f32 %v2573_v3, %v2546_v0  ;;  %v2583_v0 = vpop.permute.xlu1 %2582  ;;  %v2295_v3 = vpop.f32.mrf.mxu2 }
 0x83f   :  { %v2354_v13 = vpop.f32.mrf.mxu3 }
 0x840   :  { %v7154_v24 = vmax.f32 %v6362_v40, 0.0  ;;  %v2355_v14 = vadd.f32 %v2354_v13, %v2289_v16  ;;  %v2452_v13 = vadd.f32 %v2430_v10, %v2346_v44 }
 0x841   :  { %v2436_v17 = vpop.f32.mrf.mxu0 }
 0x842   :  { %v2454_v61 = vadd.f32 %v2436_v17, %v2352_v48  ;;  %v2343_v17 = vadd.f32 %v2342_v38, %v2277_v18 }
 0x844   :  { %v2547_v52 = vadd.f32 %v2529_v4, %v2454_v61  ;;  %v2535_v4 = vpop.f32.mrf.mxu1  ;;  %v2451_v22 = vadd.f32 %v2427_v28, %v2343_v17  ;;  %v2903_v17 = vld [vmem:[%s7136_s6 + $0x20] sm:$0xff] }
 0x846   :  { %v6364_v6 = vadd.f32 %v2578_v7, %v2547_v52  ;;  %v2568_v31 = vpop.permute.xlu1 %2567 }
 0x847   :  { %v2357_v35 = vpop.f32.mrf.mxu3 }
 0x848   :  { %v7155_v37 = vmax.f32 %v6364_v6, 0.0  ;;  %v2358_v48 = vadd.f32 %v2357_v35, %v2292_v5  ;;  %v2563_v5 = vpop.permute.xlu2 %2562 }
 0x849   :  { %v2439_v23 = vpop.f32.mrf.mxu0 }
 0x84a   :  { %v6372_v57 = vpack.i.bf16 %v7154_v24, %v7155_v37  ;;  %v2455_v42 = vadd.f32 %v2439_v23, %v2355_v14  ;;  %v2545_v24 = vadd.f32 %v2523_v59, %v2452_v13  ;;  %v2544_v23 = vadd.f32 %v2520_v9, %v2451_v22  ;;  %v2899_v13 = vld [vmem:[%s7136_s6] sm:$0xff] }
 0x84c   :  { %4855 = vrot.lane.b32.xlu2 %v6372_v57, %s4992_s21  ;;  %v2548_v61 = vadd.f32 %v2532_v34, %v2455_v42  ;;  %v2538_v14 = vpop.f32.mrf.mxu1  ;;  %v2601_v18 = vadd.f32 %v2568_v31, %v2545_v24  ;;  %v2298_v34 = vpop.f32.mrf.mxu2  ;;  %v2600_v42 = vadd.f32 %v2563_v5, %v2544_v23  ;;  %v2617_v23 = vld [vmem:[%s7135_s5 + $0x8] sm:$0xff] }
 0x84e   :  { %v2604_v41 = vadd.f32 %v2583_v0, %v2548_v61  ;;  %v2609_v59 = vmax.f32 %v2601_v18, 0.0  ;;  %v2608_v28 = vmax.f32 %v2600_v42, 0.0 }
 0x84f   :  { %v2360_v16 = vpop.f32.mrf.mxu3 }
 0x850   :  { %v2612_v20 = vmax.f32 %v2604_v41, 0.0  ;;  %v2361_v15 = vadd.f32 %v2360_v16, %v2295_v3  ;;  %v7178_v3 = vmax.f32 %v6364_v6, 0.0  ;;  %v2965_v6 = vld [vmem:[%s7138_s8] sm:$0xff]  ;;  %v3172_v16 = vld [vmem:[%s7132_s2 + $0x10] sm:$0xff] }
 0x851   :  { %v2442_v52 = vpop.f32.mrf.mxu0 }
 0x852   :  { %v2456_v7 = vadd.f32 %v2442_v52, %v2358_v48  ;;  %v7179_v52 = vmax.f32 %v6362_v40, 0.0  ;;  %v2905_v40 = vld [vmem:[%s7136_s6 + $0x30] sm:$0xff] }
 0x854   :  { %v2549_v62 = vadd.f32 %v2535_v4, %v2456_v7  ;;  %v2541_v9 = vpop.f32.mrf.mxu1  ;;  %v3170_v7 = vld [vmem:[%s7132_s2] sm:$0xff] }
 0x856   :  { %v2605_v37 = vadd.f32 %v2588_v27, %v2549_v62  ;;  %v2906_v27 = vld [vmem:[%s7136_s6 + $0x38] sm:$0xff] }
 0x857   :  { %v2363_v35 = vpop.f32.mrf.mxu3 }
 0x858   :  { %v2613_v50 = vmax.f32 %v2605_v37, 0.0  ;;  %v2364_v62 = vadd.f32 %v2363_v35, %v2298_v34  ;;  %v4864_v37 = vpack.i.bf16 %v2608_v28, %v2609_v59 }
 0x859   :  { %v2445_v12 = vpop.f32.mrf.mxu0 }
 0x85a   :  { %v4869_v38 = vpack.i.bf16 %v2612_v20, %v2613_v50  ;;  %v2457_v10 = vadd.f32 %v2445_v12, %v2361_v15 }
 0x85c   :  { %4870 = vrot.lane.b32.xlu2 %v4869_v38, %s4991_s16  ;;  %4860 = vrot.lane.b32.xlu1 %v4869_v38, %s4992_s21  ;;  %v2550_v22 = vadd.f32 %v2538_v14, %v2457_v10  ;;  %v2616_v14 = vld [vmem:[%s7135_s5] sm:$0xff]  ;;  %v2618_v38 = vld [vmem:[%s7135_s5 + $0x10] sm:$0xff] }
 0x85e   :  { %v2606_v4 = vadd.f32 %v6360_v45, %v2550_v22  ;;  %v2900_v45 = vld [vmem:[%s7136_s6 + $0x8] sm:$0xff] }
 0x860   :  { %v2614_v48 = vmax.f32 %v2606_v4, 0.0 }
 0x861   :  { %v2448_v41 = vpop.f32.mrf.mxu0 }
 0x862   :  { %v2458_v24 = vadd.f32 %v2448_v41, %v2364_v62  ;;  %v2619_v41 = vld [vmem:[%s7135_s5 + $0x18] sm:$0xff] }
 0x864   :  { %v2551_v44 = vadd.f32 %v2541_v9, %v2458_v24  ;;  %2944 = vperm.xlu2 %4713, %v2906_v27   ;;  %4865 = vrot.lane.b32.xlu1 %v4864_v37, %s4992_s21 }
 0x866   :  { %v2607_v15 = vadd.f32 %v2598_v43, %v2551_v44  ;;  %v2904_v43 = vld [vmem:[%s7136_s6 + $0x28] sm:$0xff] }
 0x868   :  { %v2615_v0 = vmax.f32 %v2607_v15, 0.0 }
 0x86a   :  { %2761 = vmatpush.msra.mxu3 %v2615_v0  ;;  %v4874_v61 = vpack.i.bf16 %v2614_v48, %v2615_v0 }
 0x86c   :  { %2929 = vperm.xlu2 %4713, %v2903_v17   ;;  %4890 = vrot.lane.b32.xlu1 %v4864_v37, %s4991_s16  ;;  %v2620_v17 = vld [vmem:[%s7135_s5 + $0x20] sm:$0xff] }
 0x86d   :  { %4875 = vrot.lane.b32.xlu0 %v4874_v61, %s4992_s21  ;;  %2762 = vmatpush.msra.mxu3 %v2614_v48 }
 0x86f   :  { %2763 = vmatpush.msra.mxu3 %v2613_v50  ;;  %v2966_v50 = vld [vmem:[%s7138_s8 + $0x8] sm:$0x3] }
 0x871   :  { %2764 = vmatpush.msra.mxu3 %v2612_v20  ;;  %v2901_v20 = vld [vmem:[%s7136_s6 + $0x10] sm:$0xff] }
 0x873   :  { %2765 = vmatpush.msra.mxu3 %v7178_v3  ;;  %v4530_v3 = vld [vmem:[%s7135_s5 + $0x88] sm:$0xff] }
 0x874   :  { %2914 = vperm.xlu2 %4713, %v2900_v45   ;;  %2934 = vperm.xlu1 %4682, %v2904_v43  }
 0x875   :  { %4880 = vrot.lane.b32.xlu0 %v4874_v61, %s4991_s16  ;;  %2766 = vmatpush.msra.mxu3 %v7179_v52  ;;  %v4532_v52 = vld [vmem:[%s7135_s5 + $0x98] sm:$0xff] }
 0x877   :  { %2767 = vmatpush.msra.mxu3 %v2609_v59 }
 0x879   :  { %2768 = vmatpush.msra.mxu3 %v2608_v28 }
 0x87a   :  { %4521 = vmatmul.msk.f32.vlgmr.msra.gmra.mxu3 %vm583_vm3, %v2616_v14 }
 0x87c   :  { %2974 = vperm.xlu2 %4713, %v2966_v50   ;;  %2919 = vperm.xlu1 %4682, %v2901_v20   ;;  %v4534_v50 = vld [vmem:[%s7135_s5 + $0xa8] sm:$0xff] }
 0x87d   :  { %4885 = vrot.lane.b32.xlu0 %v6372_v57, %s4991_s16  ;;  %v2902_v57 = vld [vmem:[%s7136_s6 + $0x18] sm:$0xff] }
 0x882   :  { %4522 = vmatmul.msk.f32.gmra.mxu3 %vm583_vm3, %v2617_v23 }
 0x884   :  { %3181 = vperm.xlu2 %4713, %v5886_v21   ;;  %2969 = vperm.xlu1 %4682, %v2965_v6   ;;  %v3173_v21 = vld [vmem:[%s7132_s2 + $0x18] sm:$0xff]  ;;  %s4995_s2 = smov 64  }
 0x885   :  { %2939 = vperm.xlu0 %4681, %v2905_v40  }
 0x88a   :  { %4523 = vmatmul.msk.f32.gmra.mxu3 %vm583_vm3, %v2618_v38 }
 0x88c   :  { %3186 = vperm.xlu1 %4682, %v3172_v16  }
 0x88d   :  { %2924 = vperm.xlu0 %4681, %v2902_v57  }
 0x892   :  { %4524 = vmatmul.msk.f32.gmra.mxu3 %vm583_vm3, %v2619_v41  ;;  %v3036_v41 = vld [vmem:[%s7139_s9 + $0xe0] sm:$0x3] }
 0x895   :  { %2909 = vperm.xlu0 %4681, %v2899_v13  }
 0x89a   :  { %4525 = vmatmul.msk.f32.gmra.mxu3 %vm583_vm3, %v2620_v17 }
 0x89d   :  { %3191 = vperm.xlu0 %4681, %v3173_v21  }
 0x8a5   :  { %3176 = vperm.xlu0 %4681, %v3170_v7  }
 0x8a6   :  { %v4856_v18 = vpop.permute.xlu2 %4855 }
 0x8a7   :  { %v4857_v62 = vunpack.i.l.bf16 %v4856_v18  ;;  %v4858_v9 = vunpack.i.h.bf16 %v4856_v18 }
 0x8b6   :  { %v4871_v22 = vpop.permute.xlu2 %4870 }
 0x8b7   :  { %v4872_v24 = vunpack.i.l.bf16 %v4871_v22  ;;  %v4873_v4 = vunpack.i.h.bf16 %v4871_v22 }
 0x8ce   :  { %v4861_v31 = vpop.permute.xlu1 %4860 }
 0x8cf   :  { %v4862_v35 = vunpack.i.l.bf16 %v4861_v31  ;;  %v4863_v42 = vunpack.i.h.bf16 %v4861_v31 }
 0x8d6   :  { %v4866_v10 = vpop.permute.xlu1 %4865 }
 0x8d7   :  { %v4867_v37 = vunpack.i.l.bf16 %v4866_v10  ;;  %v4868_v44 = vunpack.i.h.bf16 %v4866_v10 }
 0x8de   :  { %v4891_v0 = vpop.permute.xlu1 %4890 }
 0x8df   :  { %v4876_v12 = vpop.permute.xlu0 %4875  ;;  %v4892_v45 = vunpack.i.l.bf16 %v4891_v0  ;;  %v4893_v43 = vunpack.i.h.bf16 %v4891_v0 }
 0x8e0   :  { %v4877_v5 = vunpack.i.l.bf16 %v4876_v12  ;;  %v4878_v34 = vunpack.i.h.bf16 %v4876_v12 }
 0x8e2   :  { %2696 = vmatpush.msrb.mxu2 %v4877_v5 }
 0x8e4   :  { %2697 = vmatpush.msrb.mxu2 %v4878_v34 }
 0x8e6   :  { %2698 = vmatpush.msrb.mxu2 %v4862_v35  ;;  %v2945_v35 = vpop.permute.xlu2 %2944 }
 0x8e7   :  { %v4881_v59 = vpop.permute.xlu0 %4880 }
 0x8e8   :  { %v4882_v28 = vunpack.i.l.bf16 %v4881_v59  ;;  %2699 = vmatpush.msrb.mxu2 %v4863_v42  ;;  %v4883_v27 = vunpack.i.h.bf16 %v4881_v59 }
 0x8ea   :  { %2700 = vmatpush.msrb.mxu2 %v4857_v62  ;;  %2858 = vmatpush.msra.mxu0 %v4882_v28 }
 0x8ec   :  { %2701 = vmatpush.msrb.mxu2 %v4858_v9  ;;  %2859 = vmatpush.msra.mxu0 %v4883_v27  ;;  %v3037_v9 = vld [vmem:[%s7139_s9 + $0xe8] sm:$0x3] }
 0x8ed   :  { %4553 = vmatpush.msk.msrb.mxu3 %vm966_vm4, %v3037_v9  ;;  %v3167_v9 = vld [vmem:[%s7131_s1 + $0x8] sm:$0xff] }
 0x8ee   :  { %2702 = vmatpush.msrb.mxu2 %v4867_v37  ;;  %2860 = vmatpush.msra.mxu0 %v4872_v24 }
 0x8ef   :  { %v4886_v15 = vpop.permute.xlu0 %4885  ;;  %3104 = vmatpush.msrb.mxu3 %v6164_v49 }
 0x8f0   :  { %v4887_v48 = vunpack.i.l.bf16 %v4886_v15  ;;  %2703 = vmatpush.msrb.mxu2 %v4868_v44  ;;  %2861 = vmatpush.msra.mxu0 %v4873_v4  ;;  %v4888_v61 = vunpack.i.h.bf16 %v4886_v15  ;;  %v3033_v4 = vld [vmem:[%s7139_s9 + $0xc8] sm:$0xff]  ;;  %v2935_v44 = vpop.permute.xlu1 %2934 }
 0x8f1   :  { %4513 = vmatmul.msk.f32.vlgmr.msrb.gmra.mxu2 %vm583_vm3, %v5911_v30  ;;  %v2621_v30 = vld [vmem:[%s7135_s5 + $0x28] sm:$0xff]  ;;  %3105 = vmatpush.msrb.mxu3 %v6170_v26 }
 0x8f2   :  { %2862 = vmatpush.msra.mxu0 %v4887_v48  ;;  %4526 = vmatmul.msk.f32.gmra.mxu3 %vm583_vm3, %v2621_v30  ;;  %v3030_v48 = vld [vmem:[%s7139_s9 + $0xb0] sm:$0xff]  ;;  %v3027_v30 = vld [vmem:[%s7139_s9 + $0x98] sm:$0xff] }
 0x8f3   :  { %4550 = vmatpush.msk.msra.mxu2 %vm966_vm4, %v3036_v41  ;;  %3106 = vmatpush.msrb.mxu3 %v6176_v63  ;;  %v3166_v41 = vld [vmem:[%s7131_s1] sm:$0xff] }
 0x8f4   :  { %2863 = vmatpush.msra.mxu0 %v4888_v61 }
 0x8f5   :  { %3082 = vmatpush.msra.mxu2 %v3033_v4  ;;  %3107 = vmatpush.msrb.mxu3 %v6182_v32 }
 0x8f6   :  { %2864 = vmatpush.msra.mxu0 %v4892_v45  ;;  %v2930_v45 = vpop.permute.xlu2 %2929 }
 0x8f7   :  { %v2940_v10 = vpop.permute.xlu0 %2939  ;;  %3083 = vmatpush.msra.mxu2 %v3030_v48  ;;  %3108 = vmatpush.msrb.mxu3 %v6188_v1 }
 0x8f8   :  { %2865 = vmatpush.msra.mxu0 %v4893_v43  ;;  %v2920_v63 = vpop.permute.xlu1 %2919 }
 0x8f9   :  { %4514 = vmatmul.msk.f32.gmra.mxu2 %vm583_vm3, %v5927_v58  ;;  %4537 = vmatmul.msk.f32.vlgmr.msra.gmra.mxu0 %vm583_vm3, %v5916_v36  ;;  %v2622_v58 = vld [vmem:[%s7135_s5 + $0x30] sm:$0xff] }
 0x8fa   :  { %4527 = vmatmul.msk.f32.gmra.mxu3 %vm583_vm3, %v2622_v58  ;;  %v4531_v36 = vld [vmem:[%s7135_s5 + $0x90] sm:$0xff]  ;;  %3084 = vmatpush.msra.mxu2 %v3027_v30 }
 0x8fb   :  { %3109 = vmatpush.msrb.mxu3 %v6194_v47  ;;  %v3035_v47 = vld [vmem:[%s7139_s9 + $0xd8] sm:$0x3] }
 0x8fd   :  { %3110 = vmatpush.msrb.mxu3 %v6201_v60  ;;  %v2964_v60 = vld [vmem:[%s7137_s7 + $0x8] sm:$0x3] }
 0x8ff   :  { %3111 = vmatpush.msrb.mxu3 %v6207_v56  ;;  %v7180_v56 = vld [vmem:[#allocation7_spill] sm:$0xff] }
 0x901   :  { %4515 = vmatmul.msk.f32.gmra.mxu2 %vm583_vm3, %v5940_v29  ;;  %4538 = vmatmul.msk.f32.gmra.mxu0 %vm583_vm3, %v4530_v3  ;;  %v2623_v29 = vld [vmem:[%s7135_s5 + $0x38] sm:$0xff] }
 0x902   :  { %4528 = vmatmul.msk.f32.gmra.mxu3 %vm583_vm3, %v2623_v29  ;;  %v2925_v29 = vpop.permute.xlu0 %2924 }
 0x903   :  { %3112 = vmatpush.msrb.mxu3 %v6212_v8  ;;  %v7181_v8 = vld [vmem:[#allocation9_spill] sm:$0xff] }
 0x909   :  { %4516 = vmatmul.msk.f32.gmra.mxu2 %vm583_vm3, %v5953_v2  ;;  %4539 = vmatmul.msk.f32.gmra.mxu0 %vm583_vm3, %v4531_v36  ;;  %v4533_v2 = vld [vmem:[%s7135_s5 + $0xa0] sm:$0xff] }
 0x911   :  { %4517 = vmatmul.msk.f32.gmra.mxu2 %vm583_vm3, %v5966_v53  ;;  %4540 = vmatmul.msk.f32.gmra.mxu0 %vm583_vm3, %v4532_v52  ;;  %v4535_v53 = vld [vmem:[%s7135_s5 + $0xb0] sm:$0xff]  ;;  %v3024_v52 = vld [vmem:[%s7139_s9 + $0x80] sm:$0xff] }
 0x912   :  { %3085 = vmatpush.msra.mxu2 %v3024_v52 }
 0x919   :  { %4518 = vmatmul.msk.f32.gmra.mxu2 %vm583_vm3, %v5979_v46  ;;  %4541 = vmatmul.msk.f32.gmra.mxu0 %vm583_vm3, %v4533_v2  ;;  %v2770_v46 = vpop.f32.mrf.mxu3 }
 0x921   :  { %4519 = vmatmul.msk.f32.gmra.mxu2 %vm583_vm3, %v5999_v55  ;;  %4542 = vmatmul.msk.f32.gmra.mxu0 %vm583_vm3, %v4534_v50  ;;  %v2773_v20 = vpop.f32.mrf.mxu3 }
 0x929   :  { %4520 = vmatmul.msk.f32.gmra.mxu2 %vm583_vm3, %v6018_v11  ;;  %4543 = vmatmul.msk.f32.gmra.mxu0 %vm583_vm3, %v4535_v53  ;;  %v2776_v55 = vpop.f32.mrf.mxu3 }
 0x931   :  { %4544 = vmatmul.msk.f32.gmra.mxu0 %vm583_vm3, %v6023_v25  ;;  %v2779_v13 = vpop.f32.mrf.mxu3 }
 0x939   :  { %v2782_v23 = vpop.f32.mrf.mxu3 }
 0x974   :  { %v2705_v6 = vpop.f32.mrf.mxu2 }
 0x975   :  { %v2785_v5 = vpop.f32.mrf.mxu3 }
 0x976   :  { %v6505_v40 = vpop.f32.mrf.mxu0 }
 0x97c   :  { %v2708_v16 = vpop.f32.mrf.mxu2 }
 0x97d   :  { %v2788_v25 = vpop.f32.mrf.mxu3  ;;  %v2774_v2 = vadd.f32 %v2773_v20, %v2708_v16  ;;  %v3018_v20 = vld [vmem:[%s7139_s9 + $0x50] sm:$0xff] }
 0x97e   :  { %v2870_v57 = vpop.f32.mrf.mxu0 }
 0x97f   :  { %v2892_v16 = vadd.f32 %v2870_v57, %v2774_v2  ;;  %v2910_v57 = vpop.permute.xlu0 %2909 }
 0x984   :  { %v2711_v21 = vpop.f32.mrf.mxu2 }
 0x985   :  { %v2791_v62 = vpop.f32.mrf.mxu3  ;;  %v2777_v43 = vadd.f32 %v2776_v55, %v2711_v21  ;;  %v3021_v55 = vld [vmem:[%s7139_s9 + $0x68] sm:$0xff] }
 0x986   :  { %v2873_v7 = vpop.f32.mrf.mxu0  ;;  %3086 = vmatpush.msra.mxu2 %v3021_v55 }
 0x987   :  { %v2893_v21 = vadd.f32 %v2873_v7, %v2777_v43  ;;  %v3192_v48 = vpop.permute.xlu0 %3191 }
 0x988   :  { %3087 = vmatpush.msra.mxu2 %v3018_v20  ;;  %v3596_v20 = vld [vmem:[%s7134_s4 + $0x30] sm:$0xff] }
 0x98c   :  { %v2714_v14 = vpop.f32.mrf.mxu2 }
 0x98d   :  { %v2780_v0 = vadd.f32 %v2779_v13, %v2714_v14  ;;  %v2771_v13 = vadd.f32 %v2770_v46, %v2705_v6  ;;  %v2949_v6 = vadd.f32 %v2920_v63, %v2893_v21  ;;  %v3590_v63 = vld [vmem:[%s7134_s4] sm:$0xff] }
 0x98e   :  { %v2876_v31 = vpop.f32.mrf.mxu0 }
 0x98f   :  { %v2894_v50 = vadd.f32 %v2876_v31, %v2780_v0  ;;  %v2891_v46 = vadd.f32 %v6505_v40, %v2771_v13 }
 0x994   :  { %v2717_v11 = vpop.f32.mrf.mxu2 }
 0x995   :  { %v2783_v27 = vadd.f32 %v2782_v23, %v2717_v11  ;;  %v2950_v23 = vadd.f32 %v2925_v29, %v2894_v50  ;;  %v2915_v11 = vpop.permute.xlu2 %2914 }
 0x996   :  { %v2879_v12 = vpop.f32.mrf.mxu0  ;;  %v2948_v32 = vadd.f32 %v2915_v11, %v2892_v16  ;;  %v3597_v16 = vld [vmem:[%s7134_s4 + $0x38] sm:$0xff] }
 0x997   :  { %v2895_v3 = vadd.f32 %v2879_v12, %v2783_v27  ;;  %v2958_v12 = vmax.f32 %v2950_v23, 0.0  ;;  %v3168_v27 = vld [vmem:[%s7131_s1 + $0x10] sm:$0xff]  ;;  %v3593_v23 = vld [vmem:[%s7134_s4 + $0x18] sm:$0xff] }
 0x998   :  { %v2956_v1 = vmax.f32 %v2948_v32, 0.0 }
 0x999   :  { %v2951_v14 = vadd.f32 %v2930_v45, %v2895_v3 }
 0x99b   :  { %v2959_v7 = vmax.f32 %v2951_v14, 0.0  ;;  %v3595_v14 = vld [vmem:[%s7134_s4 + $0x28] sm:$0xff] }
 0x99c   :  { %v2720_v18 = vpop.f32.mrf.mxu2 }
 0x99d   :  { %v2786_v28 = vadd.f32 %v2785_v5, %v2720_v18  ;;  %v2947_v5 = vadd.f32 %v2910_v57, %v2891_v46  ;;  %v2957_v18 = vmax.f32 %v2949_v6, 0.0  ;;  %v3591_v46 = vld [vmem:[%s7134_s4 + $0x8] sm:$0xff] }
 0x99e   :  { %v2882_v38 = vpop.f32.mrf.mxu0 }
 0x99f   :  { %v2896_v17 = vadd.f32 %v2882_v38, %v2786_v28  ;;  %v2955_v40 = vmax.f32 %v2947_v5, 0.0  ;;  %v7183_v38 = vld [vmem:[#allocation10_spill] sm:$0xff] }
 0x9a0   :  { %v3243_v5 = vld [vmem:[%s7133_s3 + $0x8] sm:$0xff] }
 0x9a1   :  { %v2952_v49 = vadd.f32 %v2935_v44, %v2896_v17 }
 0x9a3   :  { %v2960_v31 = vmax.f32 %v2952_v49, 0.0 }
 0x9a4   :  { %v2723_v34 = vpop.f32.mrf.mxu2 }
 0x9a5   :  { %v2789_v59 = vadd.f32 %v2788_v25, %v2723_v34  ;;  %v4556_v25 = vld [vmem:[%s7130_s0 + $0xc] sm:$0xf]  ;;  %v2970_v34 = vpop.permute.xlu1 %2969 }
 0x9a6   :  { %v2885_v42 = vpop.f32.mrf.mxu0 }
 0x9a7   :  { %v2897_v24 = vadd.f32 %v2885_v42, %v2789_v59  ;;  %v2975_v59 = vpop.permute.xlu2 %2974 }
 0x9a9   :  { %v2953_v58 = vadd.f32 %v2940_v10, %v2897_v24  ;;  %v3169_v24 = vld [vmem:[%s7131_s1 + $0x18] sm:$0xff] }
 0x9ab   :  { %v2961_v26 = vmax.f32 %v2953_v58, 0.0 }
 0x9ac   :  { %v2726_v22 = vpop.f32.mrf.mxu2 }
 0x9ad   :  { %v2792_v37 = vadd.f32 %v2791_v62, %v2726_v22  ;;  %v3187_v2 = vpop.permute.xlu1 %3186 }
 0x9ae   :  { %v2888_v15 = vpop.f32.mrf.mxu0 }
 0x9af   :  { %v2898_v61 = vadd.f32 %v2888_v15, %v2792_v37  ;;  %v3182_v43 = vpop.permute.xlu2 %3181 }
 0x9b1   :  { %v2954_v36 = vadd.f32 %v2945_v35, %v2898_v61  ;;  %v3177_v61 = vpop.permute.xlu0 %3176 }
 0x9b3   :  { %v2962_v53 = vmax.f32 %v2954_v36, 0.0 }
 0x9b5   :  { %2991 = vmatpush.msrb.mxu1 %v2962_v53 }
 0x9b7   :  { %2992 = vmatpush.msrb.mxu1 %v2961_v26  ;;  %v3592_v26 = vld [vmem:[%s7134_s4 + $0x10] sm:$0xff] }
 0x9b9   :  { %2993 = vmatpush.msrb.mxu1 %v2960_v31  ;;  %v3594_v31 = vld [vmem:[%s7134_s4 + $0x20] sm:$0xff] }
 0x9bb   :  { %2994 = vmatpush.msrb.mxu1 %v2959_v7  ;;  %v3242_v7 = vld [vmem:[%s7133_s3] sm:$0xff] }
 0x9bd   :  { %2995 = vmatpush.msrb.mxu1 %v2958_v12 }
 0x9bf   :  { %2996 = vmatpush.msrb.mxu1 %v2957_v18 }
 0x9c1   :  { %2997 = vmatpush.msrb.mxu1 %v2956_v1 }
 0x9c3   :  { %2998 = vmatpush.msrb.mxu1 %v2955_v40 }
 0x9c4   :  { %4545 = vmatmul.msk.f32.vlgmr.msrb.gmra.mxu1 %vm583_vm3, %v6090_v51  ;;  %v7182_v51 = vld [vmem:[#allocation8_spill] sm:$0xff] }
 0x9c5   :  { %4547 = vmatpush.msk.msra.mxu1 %vm966_vm4, %v3035_v47  ;;  %v3244_v47 = vld [vmem:[%s7133_s3 + $0x10] sm:$0xff] }
 0x9c7   :  { %3060 = vmatpush.msra.mxu1 %v6102_v54  ;;  %v7184_v54 = vld [vmem:[#allocation12_spill] sm:$0xff] }
 0x9c9   :  { %3061 = vmatpush.msra.mxu1 %v6108_v19  ;;  %v3015_v19 = vld [vmem:[%s7139_s9 + $0x38] sm:$0xff] }
 0x9ca   :  { %3088 = vmatpush.msra.mxu2 %v3015_v19 }
 0x9cb   :  { %3062 = vmatpush.msra.mxu1 %v6118_v33  ;;  %v3012_v33 = vld [vmem:[%s7139_s9 + $0x20] sm:$0xff] }
 0x9cc   :  { %4546 = vmatmul.msk.f32.gmra.mxu1 %vm583_vm3, %v2964_v60  ;;  %3089 = vmatpush.msra.mxu2 %v3012_v33  ;;  %v4603_v33 = vld [vmem:[%s7133_s3 + $0xc8] sm:$0xff] }
 0x9cd   :  { %3063 = vmatpush.msra.mxu1 %v6124_v39  ;;  %v3009_v39 = vld [vmem:[%s7139_s9 + $0x8] sm:$0xff] }
 0x9ce   :  { %3090 = vmatpush.msra.mxu2 %v3009_v39 }
 0x9cf   :  { %3064 = vmatpush.msra.mxu1 %v7180_v56 }
 0x9d1   :  { %3065 = vmatpush.msra.mxu1 %v7181_v8  ;;  %v4602_v8 = vld [vmem:[%s7133_s3 + $0xc0] sm:$0xff] }
 0x9d3   :  { %3066 = vmatpush.msra.mxu1 %v7182_v51 }
 0x9d5   :  { %3067 = vmatpush.msra.mxu1 %v7183_v38  ;;  %v3245_v38 = vld [vmem:[%s7133_s3 + $0x18] sm:$0xff] }
 0x9d7   :  { %3068 = vmatpush.msra.mxu1 %v7184_v54 }
 0x9d9   :  { %4557 = vmatpush.msk.msrb.mxu1 %vm81_vm0, %v4556_v25  ;;  %v3246_v25 = vld [vmem:[%s7133_s3 + $0x20] sm:$0xff] }
 0xa41   :  { %v3000_v35 = vpop.f32.mrf.mxu1 }
 0xa42   :  { %v3001_v42 = vadd.f32 %v3000_v35, %v2970_v34  ;;  %v4586_v35 = vld [vmem:[%s7133_s3 + $0x80] sm:$0xff] }
 0xa44   :  { %v3006_v10 = vmax.f32 %v3001_v42, 0.0 }
 0xa46   :  { %4548 = vmatmul.msk.f32.vlgmr.msra.gmra.mxu1 %vm959_vm5, %v3006_v10  ;;  %4551 = vmatmul.msk.f32.vlgmr.msra.gmra.mxu2 %vm959_vm5, %v3006_v10 }
 0xa47   :  { %4554 = vmatmul.msk.f32.vlgmr.msrb.gmra.mxu3 %vm959_vm5, %v3006_v10 }
 0xa49   :  { %v3003_v62 = vpop.f32.mrf.mxu1 }
 0xa4a   :  { %v3004_v28 = vadd.f32 %v3003_v62, %v2975_v59  ;;  %v4562_v62 = vld [vmem:[%s7133_s3 + $0x40] sm:$0xff] }
 0xa4c   :  { %v3007_v22 = vmax.f32 %v3004_v28, 0.0  ;;  %v4604_v28 = vld [vmem:[%s7133_s3 + $0xd0] sm:$0xff] }
 0xa4e   :  { %4549 = vmatmul.msk.f32.gmra.mxu1 %vm959_vm5, %v3007_v22  ;;  %4552 = vmatmul.msk.f32.gmra.mxu2 %vm959_vm5, %v3007_v22 }
 0xa4f   :  { %4555 = vmatmul.msk.f32.gmra.mxu3 %vm959_vm5, %v3007_v22  ;;  %v3247_v22 = vld [vmem:[%s7133_s3 + $0x28] sm:$0xff] }
 0xa56   :  { %4558 = vmatmul.msk.f32.vlgmr.msrb.gmra.mxu1 %vm68_vm1, %v3166_v41  ;;  %v4587_v41 = vld [vmem:[%s7133_s3 + $0x88] sm:$0xff] }
 0xa5e   :  { %4559 = vmatmul.msk.f32.gmra.mxu1 %vm68_vm1, %v3167_v9  ;;  %v4563_v9 = vld [vmem:[%s7133_s3 + $0x48] sm:$0xff] }
 0xa66   :  { %4560 = vmatmul.msk.f32.gmra.mxu1 %vm68_vm1, %v3168_v27  ;;  %v4605_v27 = vld [vmem:[%s7133_s3 + $0xd8] sm:$0xff] }
 0xa6e   :  { %4561 = vmatmul.msk.f32.gmra.mxu1 %vm68_vm1, %v3169_v24  ;;  %v3248_v24 = vld [vmem:[%s7133_s3 + $0x30] sm:$0xff] }
 0xac3   :  { %v6597_v37 = vpop.f32.mrf.mxu1 }
 0xac9   :  { %v6599_v4 = vpop.f32.mrf.mxu2 }
 0xaca   :  { %v3114_v44 = vpop.f32.mrf.mxu3 }
 0xacb   :  { %v3073_v15 = vpop.f32.mrf.mxu1  ;;  %v4588_v44 = vld [vmem:[%s7133_s3 + $0x90] sm:$0xff] }
 0xacc   :  { %v4564_v15 = vld [vmem:[%s7133_s3 + $0x50] sm:$0xff] }
 0xad1   :  { %v3095_v0 = vpop.f32.mrf.mxu2 }
 0xad2   :  { %v3249_v0 = vld [vmem:[%s7133_s3 + $0x38] sm:$0xff] }
 0xad3   :  { %v3226_v17 = vpop.f32.mrf.mxu1 }
 0xad4   :  { %v3227_v45 = vadd.f32 %v3226_v17, %v3177_v61  ;;  %v4589_v17 = vld [vmem:[%s7133_s3 + $0x98] sm:$0xff] }
 0xad5   :  { %v4565_v61 = vld [vmem:[%s7133_s3 + $0x58] sm:$0xff] }
 0xad6   :  { %v3238_v58 = vmax.f32 %v3227_v45, 0.0  ;;  %v4607_v45 = vld [vmem:[%s7133_s3 + $0xe8] sm:$0xff] }
 0xadb   :  { %v3229_v30 = vpop.f32.mrf.mxu1 }
 0xadc   :  { %v3230_v3 = vadd.f32 %v3229_v30, %v3182_v43  ;;  %v4590_v43 = vld [vmem:[%s7133_s3 + $0xa0] sm:$0xff] }
 0xadd   :  { %v4566_v30 = vld [vmem:[%s7133_s3 + $0x60] sm:$0xff] }
 0xade   :  { %v3239_v36 = vmax.f32 %v3230_v3, 0.0  ;;  %v4608_v3 = vld [vmem:[%s7133_s3 + $0xf0] sm:$0xff] }
 0xae0   :  { %v4894_v29 = vpack.i.bf16 %v3238_v58, %v3239_v36 }
 0xae2   :  { %4895 = vrot.lane.b32.xlu0 %v4894_v29, %s4991_s16 }
 0xae3   :  { %v3232_v52 = vpop.f32.mrf.mxu1 }
 0xae4   :  { %v3233_v50 = vadd.f32 %v3232_v52, %v3187_v2  ;;  %v4592_v52 = vld [vmem:[%s7133_s3 + $0xb0] sm:$0xff] }
 0xae5   :  { %v4568_v2 = vld [vmem:[%s7133_s3 + $0x70] sm:$0xff] }
 0xae6   :  { %v3240_v55 = vmax.f32 %v3233_v50, 0.0  ;;  %v4593_v50 = vld [vmem:[%s7133_s3 + $0xb8] sm:$0xff] }
 0xaea   :  { %4920 = vrot.lane.b32.xlu0 %v4894_v29, %s4993_s24 }
 0xaeb   :  { %v3235_v49 = vpop.f32.mrf.mxu1 }
 0xaec   :  { %v3236_v53 = vadd.f32 %v3235_v49, %v3192_v48  ;;  %v4606_v48 = vld [vmem:[%s7133_s3 + $0xe0] sm:$0xff]  ;;  %v4569_v49 = vld [vmem:[%s7133_s3 + $0x78] sm:$0xff] }
 0xaee   :  { %v3241_v13 = vmax.f32 %v3236_v53, 0.0 }
 0xaf0   :  { %3375 = vmatpush.msrb.mxu2 %v3241_v13  ;;  %v4909_v21 = vpack.i.bf16 %v3240_v55, %v3241_v13  ;;  %v6759_v13 = vpop.f32.mrf.mxu3 }
 0xaf2   :  { %4910 = vrot.lane.b32.xlu2 %v4909_v21, %s4992_s21  ;;  %4900 = vrot.lane.b32.xlu1 %v4909_v21, %s4991_s16 }
 0xaf3   :  { %3376 = vmatpush.msrb.mxu2 %v3240_v55  ;;  %3625 = vperm.xlu0 %4681, %v3595_v14  }
 0xaf5   :  { %3377 = vmatpush.msrb.mxu2 %v3239_v36  ;;  %v4567_v36 = vld [vmem:[%s7133_s3 + $0x68] sm:$0xff] }
 0xaf7   :  { %3378 = vmatpush.msrb.mxu2 %v3238_v58  ;;  %v4591_v58 = vld [vmem:[%s7133_s3 + $0xa8] sm:$0xff] }
 0xaf8   :  { %4578 = vmatmul.msk.f32.vlgmr.msrb.gmra.mxu2 %vm151_vm2, %v3242_v7 }
 0xafa   :  { %4915 = vrot.lane.b32.xlu2 %v4909_v21, %s4993_s24  ;;  %4905 = vrot.lane.b32.xlu1 %v4894_v29, %s4992_s21  ;;  %v4609_v29 = vld [vmem:[%s7133_s3 + $0xf8] sm:$0xff] }
 0xafb   :  { %3610 = vperm.xlu0 %4681, %v3592_v26  }
 0xb00   :  { %4579 = vmatmul.msk.f32.gmra.mxu2 %vm151_vm2, %v3243_v5 }
 0xb02   :  { %3630 = vperm.xlu2 %4713, %v3596_v20   ;;  %3635 = vperm.xlu1 %4682, %v3597_v16  }
 0xb08   :  { %4580 = vmatmul.msk.f32.gmra.mxu2 %vm151_vm2, %v3244_v47 }
 0xb0a   :  { %3615 = vperm.xlu2 %4713, %v3593_v23   ;;  %3620 = vperm.xlu1 %4682, %v3594_v31  }
 0xb10   :  { %4581 = vmatmul.msk.f32.gmra.mxu2 %vm151_vm2, %v3245_v38 }
 0xb12   :  { %3600 = vperm.xlu2 %4713, %v3590_v63   ;;  %3605 = vperm.xlu1 %4682, %v3591_v46  }
 0xb18   :  { %4582 = vmatmul.msk.f32.gmra.mxu2 %vm151_vm2, %v3246_v25 }
 0xb20   :  { %4583 = vmatmul.msk.f32.gmra.mxu2 %vm151_vm2, %v3247_v22 }
 0xb28   :  { %4584 = vmatmul.msk.f32.gmra.mxu2 %vm151_vm2, %v3248_v24 }
 0xb30   :  { %4585 = vmatmul.msk.f32.gmra.mxu2 %vm151_vm2, %v3249_v0 }
 0xb4c   :  { %v4911_v6 = vpop.permute.xlu2 %4910 }
 0xb4d   :  { %v4912_v11 = vunpack.i.l.bf16 %v4911_v6  ;;  %v4913_v32 = vunpack.i.h.bf16 %v4911_v6 }
 0xb4f   :  { %3310 = vmatpush.msrb.mxu0 %v4912_v11 }
 0xb51   :  { %3311 = vmatpush.msrb.mxu0 %v4913_v32 }
 0xb54   :  { %v4916_v12 = vpop.permute.xlu2 %4915  ;;  %v4896_v57 = vpop.permute.xlu0 %4895 }
 0xb55   :  { %v4917_v18 = vunpack.i.l.bf16 %v4916_v12  ;;  %v4918_v1 = vunpack.i.h.bf16 %v4916_v12  ;;  %v4897_v39 = vunpack.i.l.bf16 %v4896_v57  ;;  %v4898_v34 = vunpack.i.h.bf16 %v4896_v57 }
 0xb57   :  { %3553 = vmatpush.msra.mxu1 %v4917_v18 }
 0xb59   :  { %3554 = vmatpush.msra.mxu1 %v4918_v1 }
 0xb5c   :  { %v4921_v40 = vpop.permute.xlu0 %4920 }
 0xb5d   :  { %v4922_v60 = vunpack.i.l.bf16 %v4921_v40  ;;  %v4923_v56 = vunpack.i.h.bf16 %v4921_v40 }
 0xb5f   :  { %3555 = vmatpush.msra.mxu1 %v4922_v60 }
 0xb61   :  { %3556 = vmatpush.msra.mxu1 %v4923_v56 }
 0xb62   :  { %4610 = vmatmul.msk.f32.vlgmr.msra.gmra.mxu1 %vm151_vm2, %v4602_v8 }
 0xb64   :  { %v4901_v51 = vpop.permute.xlu1 %4900 }
 0xb65   :  { %v4902_v54 = vunpack.i.l.bf16 %v4901_v51  ;;  %v4903_v19 = vunpack.i.h.bf16 %v4901_v51 }
 0xb67   :  { %3460 = vmatpush.msra.mxu3 %v4902_v54 }
 0xb69   :  { %3461 = vmatpush.msra.mxu3 %v4903_v19 }
 0xb6a   :  { %4611 = vmatmul.msk.f32.gmra.mxu1 %vm151_vm2, %v4603_v33  ;;  %v3631_v33 = vpop.permute.xlu2 %3630 }
 0xb6b   :  { %3462 = vmatpush.msra.mxu3 %v4897_v39 }
 0xb6c   :  { %v4906_v42 = vpop.permute.xlu1 %4905 }
 0xb6d   :  { %v4907_v10 = vunpack.i.l.bf16 %v4906_v42  ;;  %3463 = vmatpush.msra.mxu3 %v4898_v34  ;;  %v4908_v59 = vunpack.i.h.bf16 %v4906_v42  ;;  %v3626_v42 = vpop.permute.xlu0 %3625 }
 0xb6e   :  { %4594 = vmatmul.msk.f32.vlgmr.msra.gmra.mxu3 %vm151_vm2, %v4586_v35 }
 0xb6f   :  { %3312 = vmatpush.msrb.mxu0 %v4907_v10 }
 0xb71   :  { %3313 = vmatpush.msrb.mxu0 %v4908_v59 }
 0xb72   :  { %4570 = vmatmul.msk.f32.vlgmr.msrb.gmra.mxu0 %vm151_vm2, %v4562_v62  ;;  %4612 = vmatmul.msk.f32.gmra.mxu1 %vm151_vm2, %v4604_v28 }
 0xb74   :  { %v3636_v60 = vpop.permute.xlu1 %3635 }
 0xb76   :  { %4595 = vmatmul.msk.f32.gmra.mxu3 %vm151_vm2, %v4587_v41 }
 0xb7a   :  { %4571 = vmatmul.msk.f32.gmra.mxu0 %vm151_vm2, %v4563_v9  ;;  %4613 = vmatmul.msk.f32.gmra.mxu1 %vm151_vm2, %v4605_v27 }
 0xb7b   :  { %v3380_v53 = vpop.f32.mrf.mxu2 }
 0xb7c   :  { %v3621_v28 = vpop.permute.xlu1 %3620 }
 0xb7e   :  { %4596 = vmatmul.msk.f32.gmra.mxu3 %vm151_vm2, %v4588_v44 }
 0xb82   :  { %4572 = vmatmul.msk.f32.gmra.mxu0 %vm151_vm2, %v4564_v15  ;;  %4614 = vmatmul.msk.f32.gmra.mxu1 %vm151_vm2, %v4606_v48 }
 0xb83   :  { %v6761_v21 = vpop.f32.mrf.mxu2 }
 0xb86   :  { %4597 = vmatmul.msk.f32.gmra.mxu3 %vm151_vm2, %v4589_v17 }
 0xb8a   :  { %4573 = vmatmul.msk.f32.gmra.mxu0 %vm151_vm2, %v4565_v61  ;;  %4615 = vmatmul.msk.f32.gmra.mxu1 %vm151_vm2, %v4607_v45 }
 0xb8b   :  { %v3386_v31 = vpop.f32.mrf.mxu2 }
 0xb8e   :  { %4598 = vmatmul.msk.f32.gmra.mxu3 %vm151_vm2, %v4590_v43  ;;  %v3616_v43 = vpop.permute.xlu2 %3615 }
 0xb92   :  { %4574 = vmatmul.msk.f32.gmra.mxu0 %vm151_vm2, %v4566_v30  ;;  %4616 = vmatmul.msk.f32.gmra.mxu1 %vm151_vm2, %v4608_v3 }
 0xb93   :  { %v3389_v11 = vpop.f32.mrf.mxu2 }
 0xb96   :  { %4599 = vmatmul.msk.f32.gmra.mxu3 %vm151_vm2, %v4591_v58 }
 0xb9a   :  { %4575 = vmatmul.msk.f32.gmra.mxu0 %vm151_vm2, %v4567_v36  ;;  %4617 = vmatmul.msk.f32.gmra.mxu1 %vm151_vm2, %v4609_v29  ;;  %v3611_v36 = vpop.permute.xlu0 %3610 }
 0xb9b   :  { %v3392_v18 = vpop.f32.mrf.mxu2 }
 0xb9e   :  { %4600 = vmatmul.msk.f32.gmra.mxu3 %vm151_vm2, %v4592_v52 }
 0xba2   :  { %4576 = vmatmul.msk.f32.gmra.mxu0 %vm151_vm2, %v4568_v2 }
 0xba3   :  { %v3395_v51 = vpop.f32.mrf.mxu2 }
 0xba6   :  { %4601 = vmatmul.msk.f32.gmra.mxu3 %vm151_vm2, %v4593_v50 }
 0xbaa   :  { %4577 = vmatmul.msk.f32.gmra.mxu0 %vm151_vm2, %v4569_v49 }
 0xbab   :  { %v3398_v22 = vpop.f32.mrf.mxu2 }
 0xbb3   :  { %v3401_v2 = vpop.f32.mrf.mxu2 }
 0xbdf   :  { %v3558_v55 = vpop.f32.mrf.mxu1 }
 0xbe7   :  { %v6763_v14 = vpop.f32.mrf.mxu1 }
 0xbef   :  { %v3315_v26 = vpop.f32.mrf.mxu0  ;;  %v3564_v6 = vpop.f32.mrf.mxu1 }
 0xbf0   :  { %v3381_v20 = vadd.f32 %v3380_v53, %v3315_v26 }
 0xbf1   :  { %v3465_v16 = vpop.f32.mrf.mxu3 }
 0xbf2   :  { %v3489_v23 = vadd.f32 %v3465_v16, %v3381_v20 }
 0xbf4   :  { %v6765_v63 = vadd.f32 %v3558_v55, %v3489_v23 }
 0xbf7   :  { %v3318_v46 = vpop.f32.mrf.mxu0  ;;  %v3567_v57 = vpop.f32.mrf.mxu1 }
 0xbf9   :  { %v6767_v7 = vpop.f32.mrf.mxu3 }
 0xbff   :  { %v3321_v32 = vpop.f32.mrf.mxu0  ;;  %v3570_v40 = vpop.f32.mrf.mxu1 }
 0xc00   :  { %v3387_v25 = vadd.f32 %v3386_v31, %v3321_v32  ;;  %v3384_v32 = vadd.f32 %v6761_v21, %v3318_v46  ;;  %v3606_v21 = vpop.permute.xlu1 %3605 }
 0xc01   :  { %v3471_v12 = vpop.f32.mrf.mxu3 }
 0xc02   :  { %v3491_v41 = vadd.f32 %v3471_v12, %v3387_v25  ;;  %v7185_v25 = vld [vmem:[#allocation5_spill] sm:$0xff] }
 0xc04   :  { %v3584_v0 = vadd.f32 %v3564_v6, %v3491_v41 }
 0xc06   :  { %v3640_v29 = vadd.f32 %v3611_v36, %v3584_v0  ;;  %v3130_v0 = vrot.slane %v6597_v37, 3 }
 0xc07   :  { %v3324_v5 = vpop.f32.mrf.mxu0  ;;  %v3573_v54 = vpop.f32.mrf.mxu1 }
 0xc08   :  { %v3390_v19 = vadd.f32 %v3389_v11, %v3324_v5  ;;  %v3648_v53 = vmax.f32 %v3640_v29, 0.0  ;;  %v3149_v29 = vrot.slane %v6599_v4, 7 }
 0xc09   :  { %v3474_v1 = vpop.f32.mrf.mxu3 }
 0xc0a   :  { %v3492_v59 = vadd.f32 %v3474_v1, %v3390_v19  ;;  %v4004_v19 = vld [vmem:[%s7138_s8 + $0x8] sm:$0x3] }
 0xc0c   :  { %v3585_v24 = vadd.f32 %v3567_v57, %v3492_v59 }
 0xc0e   :  { %v3641_v3 = vadd.f32 %v3616_v43, %v3585_v24  ;;  %v7187_v24 = vld [vmem:[#allocation11_spill] sm:$0xff] }
 0xc0f   :  { %v3327_v47 = vpop.f32.mrf.mxu0  ;;  %v3576_v48 = vpop.f32.mrf.mxu1 }
 0xc10   :  { %v3393_v56 = vadd.f32 %v3392_v18, %v3327_v47  ;;  %v3649_v50 = vmax.f32 %v3641_v3, 0.0  ;;  %v3490_v18 = vadd.f32 %v6767_v7, %v3384_v32  ;;  %v3941_v7 = vld [vmem:[%s7136_s6 + $0x20] sm:$0xff] }
 0xc11   :  { %v3477_v8 = vpop.f32.mrf.mxu3 }
 0xc12   :  { %v3493_v38 = vadd.f32 %v3477_v8, %v3393_v56  ;;  %v4949_v31 = vpack.i.bf16 %v3648_v53, %v3649_v50  ;;  %v3583_v47 = vadd.f32 %v6763_v14, %v3490_v18 }
 0xc14   :  { %v3586_v34 = vadd.f32 %v3570_v40, %v3493_v38  ;;  %v3944_v40 = vld [vmem:[%s7136_s6 + $0x38] sm:$0xff]  ;;  %v3639_v46 = vadd.f32 %v3606_v21, %v3583_v47 }
 0xc16   :  { %v3642_v9 = vadd.f32 %v3621_v28, %v3586_v34  ;;  %v3647_v8 = vmax.f32 %v3639_v46, 0.0  ;;  %v1053_v34 = vrot.slane %v7185_v25, 3  ;;  %v1043_v28 = vrot.slane %v7185_v25, 1 }
 0xc17   :  { %v3330_v39 = vpop.f32.mrf.mxu0  ;;  %v3579_v16 = vpop.f32.mrf.mxu1 }
 0xc18   :  { %v3396_v35 = vadd.f32 %v3395_v51, %v3330_v39  ;;  %v3650_v17 = vmax.f32 %v3642_v9, 0.0  ;;  %v3938_v51 = vld [vmem:[%s7136_s6 + $0x8] sm:$0xff]  ;;  %v3940_v39 = vld [vmem:[%s7136_s6 + $0x18] sm:$0xff] }
 0xc19   :  { %v3480_v10 = vpop.f32.mrf.mxu3 }
 0xc1a   :  { %v3494_v62 = vadd.f32 %v3480_v10, %v3396_v35  ;;  %v4003_v35 = vld [vmem:[%s7138_s8] sm:$0xff]  ;;  %v7186_v10 = vld [vmem:[#allocation6_spill] sm:$0xff]  ;;  %s4996_s8 = smov 96  }
 0xc1b   :  { %v1072_v59 = vrot.slane %v7186_v10, 7  ;;  %v1067_v41 = vrot.slane %v7186_v10, 6  ;;  %v1062_v9 = vrot.slane %v7186_v10, 5 }
 0xc1c   :  { %v3587_v27 = vadd.f32 %v3573_v54, %v3494_v62  ;;  %v3943_v54 = vld [vmem:[%s7136_s6 + $0x30] sm:$0xff]  ;;  %v1048_v62 = vrot.slane %v7185_v25, 2 }
 0xc1e   :  { %v3643_v44 = vadd.f32 %v3626_v42, %v3587_v27  ;;  %v3937_v42 = vld [vmem:[%s7136_s6] sm:$0xff]  ;;  %v3125_v27 = vrot.slane %v6597_v37, 2 }
 0xc1f   :  { %v3333_v15 = vpop.f32.mrf.mxu0 }
 0xc20   :  { %v3651_v61 = vmax.f32 %v3643_v44, 0.0  ;;  %v3399_v45 = vadd.f32 %v3398_v22, %v3333_v15  ;;  %v3120_v22 = vrot.slane %v6597_v37, 1  ;;  %v1079_v44 = vrot.slane %v7187_v24, 1  ;;  %v7188_v15 = vld [vmem:[#allocation13_spill] sm:$0xff] }
 0xc21   :  { %v3483_v30 = vpop.f32.mrf.mxu3  ;;  %v2092_v43 = vrot.slane %v7188_v15, 3 }
 0xc22   :  { %v4924_v58 = vpack.i.bf16 %v3650_v17, %v3651_v61  ;;  %v3495_v52 = vadd.f32 %v3483_v30, %v3399_v45  ;;  %v3144_v30 = vrot.slane %v6599_v4, 6 }
 0xc24   :  { %4925 = vrot.lane.b32.xlu2 %v4924_v58, %s4991_s16  ;;  %v3588_v55 = vadd.f32 %v3576_v48, %v3495_v52  ;;  %v2082_v48 = vrot.slane %v7188_v15, 1 }
 0xc26   :  { %v3644_v6 = vadd.f32 %v3631_v33, %v3588_v55  ;;  %v3939_v33 = vld [vmem:[%s7136_s6 + $0x10] sm:$0xff] }
 0xc27   :  { %v3336_v49 = vpop.f32.mrf.mxu0 }
 0xc28   :  { %v3402_v26 = vadd.f32 %v3401_v2, %v3336_v49  ;;  %v3652_v57 = vmax.f32 %v3644_v6, 0.0 }
 0xc29   :  { %v3486_v20 = vpop.f32.mrf.mxu3 }
 0xc2a   :  { %v3496_v23 = vadd.f32 %v3486_v20, %v3402_v26  ;;  %v3655_v20 = vld [vmem:[%s7135_s5 + $0x8] sm:$0xff] }
 0xc2c   :  { %v3589_v11 = vadd.f32 %v3579_v16, %v3496_v23  ;;  %4950 = vrot.lane.b32.xlu2 %v4949_v31, %s4992_s21  ;;  %v7190_v16 = vld [vmem:[#allocation15_spill] sm:$0xff] }
 0xc2d   :  { %v2118_v23 = vrot.slane %v7190_v16, 1 }
 0xc2e   :  { %v3645_v12 = vadd.f32 %v3636_v60, %v3589_v11  ;;  %v3601_v60 = vpop.permute.xlu2 %3600 }
 0xc2f   :  { %v3638_v56 = vadd.f32 %v3601_v60, %v6765_v63  ;;  %v3942_v63 = vld [vmem:[%s7136_s6 + $0x28] sm:$0xff]  ;;  %s4209_s6 = sshll.u32 %s7141_s11, 4  ;;  %s4210_s6 = int_to_ptr.hbm [resolvable:$true] %s4209_s6 }
 0xc30   :  { %v3653_v5 = vmax.f32 %v3645_v12, 0.0 }
 0xc31   :  { %v3646_v14 = vmax.f32 %v3638_v56, 0.0  ;;  %v3657_v56 = vld [vmem:[%s7135_s5 + $0x18] sm:$0xff] }
 0xc32   :  { %3799 = vmatpush.msra.mxu2 %v3653_v5  ;;  %v4939_v1 = vpack.i.bf16 %v3652_v57, %v3653_v5 }
 0xc33   :  { %v4959_v38 = vpack.i.bf16 %v3646_v14, %v3647_v8 }
 0xc34   :  { %4940 = vrot.lane.b32.xlu1 %v4939_v1, %s4992_s21  ;;  %4930 = vrot.lane.b32.xlu0 %v4939_v1, %s4991_s16 }
 0xc35   :  { %3800 = vmatpush.msra.mxu2 %v3652_v57  ;;  %3982 = vperm.xlu2 %4713, %v3944_v40   ;;  %v3656_v57 = vld [vmem:[%s7135_s5 + $0x10] sm:$0xff] }
 0xc37   :  { %3801 = vmatpush.msra.mxu2 %v3651_v61  ;;  %v3139_v61 = vrot.slane %v6599_v4, 5 }
 0xc39   :  { %3802 = vmatpush.msra.mxu2 %v3650_v17  ;;  %v2087_v17 = vrot.slane %v7188_v15, 2 }
 0xc3b   :  { %3803 = vmatpush.msra.mxu2 %v3649_v50  ;;  %v3156_v50 = vrot.slane %v6759_v13, 1 }
 0xc3c   :  { %4935 = vrot.lane.b32.xlu0 %v4924_v58, %s4992_s21  ;;  %4945 = vrot.lane.b32.xlu1 %v4949_v31, %s4991_s16  ;;  %v7189_v58 = vld [vmem:[#allocation14_spill] sm:$0xff] }
 0xc3d   :  { %3967 = vperm.xlu2 %4713, %v3941_v7   ;;  %3804 = vmatpush.msra.mxu2 %v3648_v53  ;;  %v2101_v36 = vrot.slane %v7189_v58, 5  ;;  %v2106_v2 = vrot.slane %v7189_v58, 6  ;;  %v3654_v53 = vld [vmem:[%s7135_s5] sm:$0xff]  ;;  %v2111_v55 = vrot.slane %v7189_v58, 7 }
 0xc3f   :  { %3805 = vmatpush.msra.mxu2 %v3647_v8 }
 0xc41   :  { %3806 = vmatpush.msra.mxu2 %v3646_v14 }
 0xc42   :  { %4634 = vmatmul.msk.f32.vlgmr.msra.gmra.mxu2 %vm583_vm3, %v3654_v53 }
 0xc44   :  { %4960 = vrot.lane.b32.xlu1 %v4959_v38, %s4992_s21  ;;  %4955 = vrot.lane.b32.xlu0 %v4959_v38, %s4991_s16 }
 0xc45   :  { %3952 = vperm.xlu2 %4713, %v3938_v51  }
 0xc4a   :  { %4635 = vmatmul.msk.f32.gmra.mxu2 %vm583_vm3, %v3655_v20 }
 0xc4c   :  { %3972 = vperm.xlu1 %4682, %v3942_v63   ;;  %3977 = vperm.xlu0 %4681, %v3943_v54  }
 0xc4d   :  { %4012 = vperm.xlu2 %4713, %v4004_v19  }
 0xc52   :  { %4636 = vmatmul.msk.f32.gmra.mxu2 %vm583_vm3, %v3656_v57  ;;  %v1059_v57 = vrot.slane %v7186_v10, 4  ;;  %v3136_v10 = vrot.slane %v6599_v4, 4 }
 0xc54   :  { %3957 = vperm.xlu1 %4682, %v3939_v33   ;;  %3962 = vperm.xlu0 %4681, %v3940_v39  }
 0xc55   :  { %1054 = vrot.lane.b32.xlu2 %v1053_v34, %s4994_s26 }
 0xc5a   :  { %4637 = vmatmul.msk.f32.gmra.mxu2 %vm583_vm3, %v3657_v56 }
 0xc5c   :  { %4007 = vperm.xlu1 %4682, %v4003_v35   ;;  %3947 = vperm.xlu0 %4681, %v3937_v42   ;;  %v4642_v42 = vld [vmem:[%s7135_s5 + $0x80] sm:$0xff] }
 0xc5d   :  { %1073 = vrot.lane.b32.xlu2 %v1072_v59, %s4994_s26  ;;  %v4618_v59 = vld [vmem:[%s7135_s5 + $0x40] sm:$0xff] }
 0xc64   :  { %1049 = vrot.lane.b32.xlu1 %v1048_v62, %s4995_s2  ;;  %1044 = vrot.lane.b32.xlu0 %v1043_v28, %s4996_s8  ;;  %v3658_v62 = vld [vmem:[%s7135_s5 + $0x20] sm:$0xff] }
 0xc65   :  { %3121 = vrot.lane.b32.xlu2 %v3120_v22, %s4996_s8  ;;  %4638 = vmatmul.msk.f32.gmra.mxu2 %vm583_vm3, %v3658_v62  ;;  %v3161_v62 = vld [vmem:[%s7140_s10] sm:$0x1] }
 0xc6c   :  { %1068 = vrot.lane.b32.xlu1 %v1067_v41, %s4995_s2  ;;  %1063 = vrot.lane.b32.xlu0 %v1062_v9, %s4996_s8  ;;  %v4643_v9 = vld [vmem:[%s7135_s5 + $0x88] sm:$0xff] }
 0xc6d   :  { %3126 = vrot.lane.b32.xlu2 %v3125_v27, %s4995_s2  ;;  %v4619_v27 = vld [vmem:[%s7135_s5 + $0x48] sm:$0xff] }
 0xc74   :  { %2083 = vrot.lane.b32.xlu1 %v2082_v48, %s4996_s8  ;;  %1080 = vrot.lane.b32.xlu0 %v1079_v44, %s4996_s8  ;;  %v3659_v44 = vld [vmem:[%s7135_s5 + $0x28] sm:$0xff] }
 0xc75   :  { %3131 = vrot.lane.b32.xlu2 %v3130_v0, %s4994_s26  ;;  %4639 = vmatmul.msk.f32.gmra.mxu2 %vm583_vm3, %v3659_v44  ;;  %v4625_v44 = vld [vmem:[%s7135_s5 + $0x78] sm:$0xff] }
 0xc7c   :  { %2088 = vrot.lane.b32.xlu1 %v2087_v17, %s4995_s2 }
 0xc7d   :  { %3140 = vrot.lane.b32.xlu2 %v3139_v61, %s4996_s8  ;;  %v4644_v61 = vld [vmem:[%s7135_s5 + $0x90] sm:$0xff] }
 0xc7e   :  { %v4926_v45 = vpop.permute.xlu2 %4925 }
 0xc7f   :  { %v4927_v1 = vunpack.i.l.bf16 %v4926_v45  ;;  %v4928_v40 = vunpack.i.h.bf16 %v4926_v45  ;;  %v4620_v45 = vld [vmem:[%s7135_s5 + $0x50] sm:$0xff] }
 0xc84   :  { %2093 = vrot.lane.b32.xlu1 %v2092_v43, %s4994_s26  ;;  %v3660_v43 = vld [vmem:[%s7135_s5 + $0x30] sm:$0xff] }
 0xc85   :  { %3145 = vrot.lane.b32.xlu2 %v3144_v30, %s4995_s2  ;;  %4640 = vmatmul.msk.f32.gmra.mxu2 %vm583_vm3, %v3660_v43 }
 0xc86   :  { %v4951_v3 = vpop.permute.xlu2 %4950 }
 0xc87   :  { %v4952_v51 = vunpack.i.l.bf16 %v4951_v3  ;;  %v4953_v38 = vunpack.i.h.bf16 %v4951_v3 }
 0xc8c   :  { %2102 = vrot.lane.b32.xlu1 %v2101_v36, %s4996_s8 }
 0xc8d   :  { %3150 = vrot.lane.b32.xlu2 %v3149_v29, %s4994_s26  ;;  %v4645_v29 = vld [vmem:[%s7135_s5 + $0x98] sm:$0xff] }
 0xc8f   :  { %v6845_v52 = vpop.permute.xlu2 %3982 }
 0xc94   :  { %2107 = vrot.lane.b32.xlu1 %v2106_v2, %s4995_s2  ;;  %v4621_v2 = vld [vmem:[%s7135_s5 + $0x58] sm:$0xff] }
 0xc95   :  { %3157 = vrot.lane.b32.xlu2 %v3156_v50, %s4996_s8  ;;  %v3661_v50 = vld [vmem:[%s7135_s5 + $0x38] sm:$0xff] }
 0xc96   :  { %4641 = vmatmul.msk.f32.gmra.mxu2 %vm583_vm3, %v3661_v50 }
 0xc97   :  { %v6851_v49 = vpop.permute.xlu2 %3967 }
 0xc9c   :  { %2112 = vrot.lane.b32.xlu1 %v2111_v55, %s4994_s26 }
 0xc9f   :  { %v6859_v26 = vpop.permute.xlu2 %3952 }
 0xca4   :  { %2119 = vrot.lane.b32.xlu1 %v2118_v23, %s4996_s8 }
 0xca6   :  { %v4941_v31 = vpop.permute.xlu1 %4940  ;;  %v4931_v6 = vpop.permute.xlu0 %4930 }
 0xca7   :  { %v4942_v11 = vunpack.i.l.bf16 %v4941_v31  ;;  %v4932_v32 = vunpack.i.l.bf16 %v4931_v6  ;;  %v6867_v12 = vpop.permute.xlu2 %4012  ;;  %v4943_v5 = vunpack.i.h.bf16 %v4941_v31  ;;  %v4933_v18 = vunpack.i.h.bf16 %v4931_v6  ;;  %v4646_v6 = vld [vmem:[%s7135_s5 + $0xa0] sm:$0xff] }
 0xca9   :  { %3734 = vmatpush.msra.mxu0 %v4942_v11  ;;  %3896 = vmatpush.msrb.mxu3 %v4932_v32  ;;  %v4622_v11 = vld [vmem:[%s7135_s5 + $0x60] sm:$0xff] }
 0xcab   :  { %3735 = vmatpush.msra.mxu0 %v4943_v5  ;;  %3897 = vmatpush.msrb.mxu3 %v4933_v18 }
 0xcad   :  { %3898 = vmatpush.msrb.mxu3 %v4927_v1 }
 0xcae   :  { %v4936_v47 = vpop.permute.xlu0 %4935  ;;  %v4946_v21 = vpop.permute.xlu1 %4945 }
 0xcaf   :  { %v4937_v46 = vunpack.i.l.bf16 %v4936_v47  ;;  %v6873_v60 = vpop.permute.xlu2 %1054  ;;  %v4947_v7 = vunpack.i.l.bf16 %v4946_v21  ;;  %3899 = vmatpush.msrb.mxu3 %v4928_v40  ;;  %v4938_v8 = vunpack.i.h.bf16 %v4936_v47  ;;  %v4948_v14 = vunpack.i.h.bf16 %v4946_v21 }
 0xcb1   :  { %3736 = vmatpush.msra.mxu0 %v4937_v46  ;;  %3900 = vmatpush.msrb.mxu3 %v4947_v7 }
 0xcb3   :  { %3737 = vmatpush.msra.mxu0 %v4938_v8  ;;  %3901 = vmatpush.msrb.mxu3 %v4948_v14 }
 0xcb5   :  { %3738 = vmatpush.msra.mxu0 %v4952_v51 }
 0xcb6   :  { %v4961_v63 = vpop.permute.xlu1 %4960  ;;  %v4956_v54 = vpop.permute.xlu0 %4955 }
 0xcb7   :  { %v6879_v19 = vpop.permute.xlu2 %1073  ;;  %v4962_v33 = vunpack.i.l.bf16 %v4961_v63  ;;  %v4957_v39 = vunpack.i.l.bf16 %v4956_v54  ;;  %3739 = vmatpush.msra.mxu0 %v4953_v38  ;;  %v4963_v34 = vunpack.i.h.bf16 %v4961_v63  ;;  %v4958_v35 = vunpack.i.h.bf16 %v4956_v54  ;;  %v1084_v63 = vld [vmem:[%s7140_s10] sm:$0x1] }
 0xcb9   :  { %3740 = vmatpush.msra.mxu0 %v4962_v33  ;;  %3902 = vmatpush.msrb.mxu3 %v4957_v39 }
 0xcbb   :  { %3741 = vmatpush.msra.mxu0 %v4963_v34  ;;  %3903 = vmatpush.msrb.mxu3 %v4958_v35 }
 0xcbc   :  { %4650 = vmatmul.msk.f32.vlgmr.msrb.gmra.mxu3 %vm583_vm3, %v4642_v42  ;;  %4626 = vmatmul.msk.f32.vlgmr.msra.gmra.mxu0 %vm583_vm3, %v4618_v59 }
 0xcbe   :  { %v6893_v28 = vpop.permute.xlu1 %3972  ;;  %v6895_v22 = vpop.permute.xlu0 %3977 }
 0xcbf   :  { %v3122_v41 = vpop.permute.xlu2 %3121 }
 0xcc0   :  { %v3124_v5 = vadd.f32 %v3122_v41, %v6597_v37  ;;  %v4623_v37 = vld [vmem:[%s7135_s5 + $0x68] sm:$0xff] }
 0xcc4   :  { %4651 = vmatmul.msk.f32.gmra.mxu3 %vm583_vm3, %v4643_v9  ;;  %4627 = vmatmul.msk.f32.gmra.mxu0 %vm583_vm3, %v4619_v27  ;;  %v4649_v27 = vld [vmem:[%s7135_s5 + $0xb8] sm:$0xff] }
 0xcc6   :  { %v6909_v48 = vpop.permute.xlu1 %3957  ;;  %v6911_v0 = vpop.permute.xlu0 %3962 }
 0xcc7   :  { %v3127_v17 = vpop.permute.xlu2 %3126 }
 0xcc8   :  { %v3129_v18 = vadd.f32 %v3127_v17, %v3124_v5 }
 0xccc   :  { %4652 = vmatmul.msk.f32.gmra.mxu3 %vm583_vm3, %v4644_v61  ;;  %4628 = vmatmul.msk.f32.gmra.mxu0 %vm583_vm3, %v4620_v45 }
 0xcce   :  { %v6925_v30 = vpop.permute.xlu1 %4007  ;;  %v6927_v3 = vpop.permute.xlu0 %3947 }
 0xccf   :  { %v3132_v36 = vpop.permute.xlu2 %3131 }
 0xcd0   :  { %v3134_v46 = vadd.f32 %v3132_v36, %v3129_v18 }
 0xcd2   :  { %v3138_v8 = vadd.f32 %v3136_v10, %v3134_v46 }
 0xcd4   :  { %4653 = vmatmul.msk.f32.gmra.mxu3 %vm583_vm3, %v4645_v29  ;;  %4629 = vmatmul.msk.f32.gmra.mxu0 %vm583_vm3, %v4621_v2  ;;  %v2098_v2 = vrot.slane %v7189_v58, 4 }
 0xcd6   :  { %v1050_v53 = vpop.permute.xlu1 %1049  ;;  %v1045_v55 = vpop.permute.xlu0 %1044 }
 0xcd7   :  { %v3141_v20 = vpop.permute.xlu2 %3140  ;;  %v1047_v23 = vadd.f32 %v1045_v55, %v7185_v25 }
 0xcd8   :  { %v3143_v51 = vadd.f32 %v3141_v20, %v3138_v8 }
 0xcd9   :  { %v1052_v31 = vadd.f32 %v1050_v53, %v1047_v23 }
 0xcdb   :  { %v1057_v32 = vadd.f32 %v6873_v60, %v1052_v31  ;;  %v4647_v60 = vld [vmem:[%s7135_s5 + $0xa8] sm:$0xff] }
 0xcdc   :  { %4654 = vmatmul.msk.f32.gmra.mxu3 %vm583_vm3, %v4646_v6  ;;  %4630 = vmatmul.msk.f32.gmra.mxu0 %vm583_vm3, %v4622_v11  ;;  %v2123_v6 = vld [vmem:[%s7140_s10] sm:$0x1] }
 0xcdd   :  { %v1061_v25 = vadd.f32 %v1059_v57, %v1057_v32 }
 0xcde   :  { %v1069_v1 = vpop.permute.xlu1 %1068  ;;  %v1064_v40 = vpop.permute.xlu0 %1063 }
 0xcdf   :  { %v3146_v47 = vpop.permute.xlu2 %3145  ;;  %v1066_v21 = vadd.f32 %v1064_v40, %v1061_v25 }
 0xce0   :  { %v3148_v34 = vadd.f32 %v3146_v47, %v3143_v51 }
 0xce1   :  { %v1071_v7 = vadd.f32 %v1069_v1, %v1066_v21 }
 0xce3   :  { %v1076_v56 = vadd.f32 %v6879_v19, %v1071_v7  ;;  %v4648_v19 = vld [vmem:[%s7135_s5 + $0xb0] sm:$0xff] }
 0xce4   :  { %4655 = vmatmul.msk.f32.gmra.mxu3 %vm583_vm3, %v4647_v60  ;;  %4631 = vmatmul.msk.f32.gmra.mxu0 %vm583_vm3, %v4623_v37 }
 0xce5   :  { %v1077_v14 = vadd.f32 %v1076_v56, %v7187_v24  ;;  %v4624_v24 = vld [vmem:[%s7135_s5 + $0x70] sm:$0xff] }
 0xce6   :  { %v2084_v38 = vpop.permute.xlu1 %2083  ;;  %v1081_v54 = vpop.permute.xlu0 %1080 }
 0xce7   :  { %v3151_v33 = vpop.permute.xlu2 %3150  ;;  %v1083_v39 = vadd.f32 %v1081_v54, %v1077_v14  ;;  %v2086_v45 = vadd.f32 %v2084_v38, %v7188_v15  ;;  %v3808_v15 = vpop.f32.mrf.mxu2 }
 0xce8   :  { %v3153_v35 = vadd.f32 %v3151_v33, %v3148_v34 }
 0xce9   :  { %v1085_v4 = vadd.f32 %v1084_v63, %v1083_v39 }
 0xcea   :  { %v3154_v42 = vadd.f32 %v3153_v35, %v6759_v13  ;;  %v4074_v35 = vld [vmem:[%s7139_s9 + $0xe0] sm:$0x3] }
 0xceb   :  { %1087 = vst.msk [vmem:[#allocation2] sm:$0x1] %vm1086_vm6, %v1085_v4  ;;  %4663 = vmatpush.msk.msrb.mxu0 %vm966_vm4, %v4074_v35 }
 0xcec   :  { %4656 = vmatmul.msk.f32.gmra.mxu3 %vm583_vm3, %v4648_v19  ;;  %4632 = vmatmul.msk.f32.gmra.mxu0 %vm583_vm3, %v4624_v24 }
 0xcee   :  { %v2089_v59 = vpop.permute.xlu1 %2088 }
 0xcef   :  { %v3158_v41 = vpop.permute.xlu2 %3157  ;;  %v2091_v43 = vadd.f32 %v2089_v59, %v2086_v45  ;;  %v3811_v5 = vpop.f32.mrf.mxu2 }
 0xcf0   :  { %v3160_v9 = vadd.f32 %v3158_v41, %v3154_v42 }
 0xcf2   :  { %v3162_v17 = vadd.f32 %v3161_v62, %v3160_v9  ;;  %v4071_v62 = vld [vmem:[%s7139_s9 + $0xc8] sm:$0xff]  ;;  %v4068_v9 = vld [vmem:[%s7139_s9 + $0xb0] sm:$0xff] }
 0xcf3   :  { %4120 = vmatpush.msrb.mxu0 %v4071_v62 }
 0xcf4   :  { %3163 = vst.msk [vmem:[#allocation2 + $0x2] sm:$0x1] %vm1086_vm6, %v3162_v17  ;;  %4657 = vmatmul.msk.f32.gmra.mxu3 %vm583_vm3, %v4649_v27  ;;  %4633 = vmatmul.msk.f32.gmra.mxu0 %vm583_vm3, %v4625_v44 }
 0xcf5   :  { %4121 = vmatpush.msrb.mxu0 %v4068_v9 }
 0xcf6   :  { %v2094_v13 = vpop.permute.xlu1 %2093 }
 0xcf7   :  { %v2096_v29 = vadd.f32 %v2094_v13, %v2091_v43  ;;  %v3814_v1 = vpop.f32.mrf.mxu2  ;;  %v4065_v13 = vld [vmem:[%s7139_s9 + $0x98] sm:$0xff] }
 0xcf8   :  { %4122 = vmatpush.msrb.mxu0 %v4065_v13 }
 0xcf9   :  { %v2100_v50 = vadd.f32 %v2098_v2, %v2096_v29  ;;  %v4062_v29 = vld [vmem:[%s7139_s9 + $0x80] sm:$0xff] }
 0xcfa   :  { %4123 = vmatpush.msrb.mxu0 %v4062_v29 }
 0xcfe   :  { %v2103_v61 = vpop.permute.xlu1 %2102 }
 0xcff   :  { %v2105_v53 = vadd.f32 %v2103_v61, %v2100_v50  ;;  %v3817_v46 = vpop.f32.mrf.mxu2 }
 0xd06   :  { %v2108_v36 = vpop.permute.xlu1 %2107 }
 0xd07   :  { %v2110_v20 = vadd.f32 %v2108_v36, %v2105_v53  ;;  %v3820_v37 = vpop.f32.mrf.mxu2 }
 0xd0e   :  { %v2113_v55 = vpop.permute.xlu1 %2112 }
 0xd0f   :  { %v2115_v23 = vadd.f32 %v2113_v55, %v2110_v20  ;;  %v3823_v8 = vpop.f32.mrf.mxu2  ;;  %v4059_v20 = vld [vmem:[%s7139_s9 + $0x68] sm:$0xff] }
 0xd10   :  { %4124 = vmatpush.msrb.mxu0 %v4059_v20 }
 0xd11   :  { %v2116_v31 = vadd.f32 %v2115_v23, %v7190_v16 }
 0xd16   :  { %v2120_v11 = vpop.permute.xlu1 %2119 }
 0xd17   :  { %v2122_v32 = vadd.f32 %v2120_v11, %v2116_v31  ;;  %v3826_v63 = vpop.f32.mrf.mxu2 }
 0xd19   :  { %v2124_v57 = vadd.f32 %v2123_v6, %v2122_v32 }
 0xd1b   :  { %2125 = vst.msk [vmem:[#allocation2 + $0x1] sm:$0x1] %vm1086_vm6, %v2124_v57 }
 0xd1f   :  { %v3829_v34 = vpop.f32.mrf.mxu2 }
 0xd39   :  { %v3743_v25 = vpop.f32.mrf.mxu0 }
 0xd3a   :  { %v3809_v58 = vadd.f32 %v3808_v15, %v3743_v25 }
 0xd3f   :  { %v3905_v18 = vpop.f32.mrf.mxu3 }
 0xd40   :  { %v6996_v40 = vadd.f32 %v3905_v18, %v3809_v58  ;;  %v4073_v18 = vld [vmem:[%s7139_s9 + $0xd8] sm:$0x3] }
 0xd41   :  { %v3746_v47 = vpop.f32.mrf.mxu0 }
 0xd42   :  { %v3812_v2 = vadd.f32 %v3811_v5, %v3746_v47  ;;  %v3985_v5 = vadd.f32 %v6927_v3, %v6996_v40  ;;  %v4067_v3 = vld [vmem:[%s7139_s9 + $0xa8] sm:$0xff]  ;;  %v4061_v47 = vld [vmem:[%s7139_s9 + $0x78] sm:$0xff] }
 0xd43   :  { %v4002_v40 = vld [vmem:[%s7137_s7 + $0x8] sm:$0x3] }
 0xd47   :  { %v3908_v21 = vpop.f32.mrf.mxu3 }
 0xd48   :  { %v3930_v6 = vadd.f32 %v3908_v21, %v3812_v2  ;;  %v4058_v21 = vld [vmem:[%s7139_s9 + $0x60] sm:$0xff] }
 0xd49   :  { %v3749_v16 = vpop.f32.mrf.mxu0 }
 0xd4a   :  { %v3815_v61 = vadd.f32 %v3814_v1, %v3749_v16  ;;  %v4064_v1 = vld [vmem:[%s7139_s9 + $0x90] sm:$0xff]  ;;  %v4055_v16 = vld [vmem:[%s7139_s9 + $0x48] sm:$0xff] }
 0xd4f   :  { %v3911_v7 = vpop.f32.mrf.mxu3 }
 0xd50   :  { %v3931_v23 = vadd.f32 %v3911_v7, %v3815_v61  ;;  %v4049_v7 = vld [vmem:[%s7139_s9 + $0x18] sm:$0xff] }
 0xd51   :  { %v3752_v60 = vpop.f32.mrf.mxu0 }
 0xd52   :  { %v3818_v27 = vadd.f32 %v3817_v46, %v3752_v60  ;;  %v3987_v32 = vadd.f32 %v6909_v48, %v3931_v23  ;;  %v4001_v48 = vld [vmem:[%s7137_s7] sm:$0xff]  ;;  %v4052_v46 = vld [vmem:[%s7139_s9 + $0x30] sm:$0xff]  ;;  %v4053_v60 = vld [vmem:[%s7139_s9 + $0x38] sm:$0xff] }
 0xd54   :  { %v3995_v25 = vmax.f32 %v3987_v32, 0.0 }
 0xd57   :  { %v3914_v10 = vpop.f32.mrf.mxu3 }
 0xd58   :  { %v3932_v50 = vadd.f32 %v3914_v10, %v3818_v27  ;;  %v4050_v10 = vld [vmem:[%s7139_s9 + $0x20] sm:$0xff] }
 0xd59   :  { %v3755_v56 = vpop.f32.mrf.mxu0 }
 0xd5a   :  { %v3821_v42 = vadd.f32 %v3820_v37, %v3755_v56  ;;  %v3988_v11 = vadd.f32 %v6911_v0, %v3932_v50  ;;  %v3993_v0 = vmax.f32 %v3985_v5, 0.0  ;;  %v4046_v37 = vld [vmem:[%s7139_s9] sm:$0xff]  ;;  %v4075_v56 = vld [vmem:[%s7139_s9 + $0xe8] sm:$0x3] }
 0xd5c   :  { %v3996_v15 = vmax.f32 %v3988_v11, 0.0 }
 0xd5f   :  { %v3917_v14 = vpop.f32.mrf.mxu3 }
 0xd60   :  { %v3933_v45 = vadd.f32 %v3917_v14, %v3821_v42  ;;  %v4072_v14 = vld [vmem:[%s7139_s9 + $0xd0] sm:$0xff] }
 0xd61   :  { %v3758_v51 = vpop.f32.mrf.mxu0 }
 0xd62   :  { %v3824_v19 = vadd.f32 %v3823_v8, %v3758_v51  ;;  %v4047_v8 = vld [vmem:[%s7139_s9 + $0x8] sm:$0xff]  ;;  %v4069_v51 = vld [vmem:[%s7139_s9 + $0xb8] sm:$0xff] }
 0xd67   :  { %v3920_v38 = vpop.f32.mrf.mxu3 }
 0xd68   :  { %v3934_v44 = vadd.f32 %v3920_v38, %v3824_v19  ;;  %v4066_v38 = vld [vmem:[%s7139_s9 + $0xa0] sm:$0xff] }
 0xd69   :  { %v3761_v54 = vpop.f32.mrf.mxu0 }
 0xd6a   :  { %v3827_v4 = vadd.f32 %v3826_v63, %v3761_v54  ;;  %v3990_v53 = vadd.f32 %v6893_v28, %v3934_v44  ;;  %v4063_v63 = vld [vmem:[%s7139_s9 + $0x88] sm:$0xff]  ;;  %v4060_v54 = vld [vmem:[%s7139_s9 + $0x70] sm:$0xff] }
 0xd6c   :  { %v3998_v28 = vmax.f32 %v3990_v53, 0.0 }
 0xd6f   :  { %v3923_v33 = vpop.f32.mrf.mxu3 }
 0xd70   :  { %v3935_v59 = vadd.f32 %v3923_v33, %v3827_v4  ;;  %v4057_v33 = vld [vmem:[%s7139_s9 + $0x58] sm:$0xff]  ;;  %v4048_v4 = vld [vmem:[%s7139_s9 + $0x10] sm:$0xff] }
 0xd71   :  { %v3764_v39 = vpop.f32.mrf.mxu0 }
 0xd72   :  { %v3830_v24 = vadd.f32 %v3829_v34, %v3764_v39  ;;  %v3991_v43 = vadd.f32 %v6895_v22, %v3935_v59  ;;  %v3989_v22 = vadd.f32 %v6851_v49, %v3933_v45  ;;  %v3986_v49 = vadd.f32 %v6859_v26, %v3930_v6  ;;  %v4070_v26 = vld [vmem:[%s7139_s9 + $0xc0] sm:$0xff]  ;;  %v4051_v34 = vld [vmem:[%s7139_s9 + $0x28] sm:$0xff] }
 0xd73   :  { %v4054_v39 = vld [vmem:[%s7139_s9 + $0x40] sm:$0xff] }
 0xd74   :  { %v3999_v31 = vmax.f32 %v3991_v43, 0.0  ;;  %v3997_v57 = vmax.f32 %v3989_v22, 0.0  ;;  %v3994_v58 = vmax.f32 %v3986_v49, 0.0 }
 0xd77   :  { %v3926_v41 = vpop.f32.mrf.mxu3 }
 0xd78   :  { %v3936_v17 = vadd.f32 %v3926_v41, %v3830_v24 }
 0xd7a   :  { %v3992_v36 = vadd.f32 %v6845_v52, %v3936_v17  ;;  %v4056_v52 = vld [vmem:[%s7139_s9 + $0x50] sm:$0xff] }
 0xd7b   :  { %4125 = vmatpush.msrb.mxu0 %v4056_v52 }
 0xd7c   :  { %v4000_v55 = vmax.f32 %v3992_v36, 0.0 }
 0xd7d   :  { %4126 = vmatpush.msrb.mxu0 %v4053_v60 }
 0xd7e   :  { %4029 = vmatpush.msrb.mxu1 %v4000_v55 }
 0xd7f   :  { %4127 = vmatpush.msrb.mxu0 %v4050_v10 }
 0xd80   :  { %4030 = vmatpush.msrb.mxu1 %v3999_v31 }
 0xd81   :  { %4128 = vmatpush.msrb.mxu0 %v4047_v8 }
 0xd82   :  { %4031 = vmatpush.msrb.mxu1 %v3998_v28 }
 0xd84   :  { %4032 = vmatpush.msrb.mxu1 %v3997_v57 }
 0xd86   :  { %4033 = vmatpush.msrb.mxu1 %v3996_v15  ;;  %v4199_v15 = vld [vmem:[%s7140_s10] sm:$0x1] }
 0xd88   :  { %4034 = vmatpush.msrb.mxu1 %v3995_v25 }
 0xd8a   :  { %4035 = vmatpush.msrb.mxu1 %v3994_v58 }
 0xd8c   :  { %4036 = vmatpush.msrb.mxu1 %v3993_v0 }
 0xd8d   :  { %4658 = vmatmul.msk.f32.vlgmr.msrb.gmra.mxu1 %vm583_vm3, %v4001_v48 }
 0xd8e   :  { %4660 = vmatpush.msk.msra.mxu1 %vm966_vm4, %v4073_v18 }
 0xd90   :  { %4098 = vmatpush.msra.mxu1 %v4070_v26 }
 0xd92   :  { %4099 = vmatpush.msra.mxu1 %v4067_v3 }
 0xd94   :  { %4100 = vmatpush.msra.mxu1 %v4064_v1 }
 0xd95   :  { %4659 = vmatmul.msk.f32.gmra.mxu1 %vm583_vm3, %v4002_v40 }
 0xd96   :  { %4101 = vmatpush.msra.mxu1 %v4061_v47 }
 0xd98   :  { %4102 = vmatpush.msra.mxu1 %v4058_v21 }
 0xd9a   :  { %4103 = vmatpush.msra.mxu1 %v4055_v16 }
 0xd9c   :  { %4104 = vmatpush.msra.mxu1 %v4052_v46 }
 0xd9e   :  { %4105 = vmatpush.msra.mxu1 %v4049_v7 }
 0xda0   :  { %4106 = vmatpush.msra.mxu1 %v4046_v37 }
 0xda2   :  { %4666 = vmatpush.msk.msrb.mxu1 %vm966_vm4, %v4075_v56 }
 0xda4   :  { %4142 = vmatpush.msrb.mxu1 %v4072_v14 }
 0xda6   :  { %4143 = vmatpush.msrb.mxu1 %v4069_v51 }
 0xda8   :  { %4144 = vmatpush.msrb.mxu1 %v4066_v38 }
 0xdaa   :  { %4145 = vmatpush.msrb.mxu1 %v4063_v63 }
 0xdac   :  { %4146 = vmatpush.msrb.mxu1 %v4060_v54 }
 0xdae   :  { %4147 = vmatpush.msrb.mxu1 %v4057_v33 }
 0xdb0   :  { %4148 = vmatpush.msrb.mxu1 %v4054_v39 }
 0xdb2   :  { %4149 = vmatpush.msrb.mxu1 %v4051_v34 }
 0xdb4   :  { %4150 = vmatpush.msrb.mxu1 %v4048_v4 }
 0xe0a   :  { %v4038_v19 = vpop.f32.mrf.mxu1 }
 0xe0b   :  { %v4039_v24 = vadd.f32 %v4038_v19, %v6925_v30 }
 0xe0d   :  { %v4044_v35 = vmax.f32 %v4039_v24, 0.0 }
 0xe0f   :  { %4661 = vmatmul.msk.f32.vlgmr.msra.gmra.mxu1 %vm959_vm5, %v4044_v35  ;;  %4664 = vmatmul.msk.f32.vlgmr.msrb.gmra.mxu0 %vm959_vm5, %v4044_v35 }
 0xe12   :  { %v4041_v42 = vpop.f32.mrf.mxu1 }
 0xe13   :  { %v4042_v59 = vadd.f32 %v4041_v42, %v6867_v12 }
 0xe15   :  { %v4045_v62 = vmax.f32 %v4042_v59, 0.0 }
 0xe17   :  { %4662 = vmatmul.msk.f32.gmra.mxu1 %vm959_vm5, %v4045_v62  ;;  %4665 = vmatmul.msk.f32.gmra.mxu0 %vm959_vm5, %v4045_v62 }
 0xe1f   :  { %4667 = vmatmul.msk.f32.vlgmr.msrb.gmra.mxu1 %vm959_vm5, %v4044_v35 }
 0xe27   :  { %4668 = vmatmul.msk.f32.gmra.mxu1 %vm959_vm5, %v4045_v62 }
 0xe8c   :  { %v4108_v41 = vpop.f32.mrf.mxu1  ;;  %v4130_v9 = vpop.f32.mrf.mxu0 }
 0xe8d   :  { %v4158_v30 = vrot.slane %v4108_v41, 1  ;;  %v4163_v17 = vrot.slane %v4108_v41, 2  ;;  %v4168_v13 = vrot.slane %v4108_v41, 3  ;;  %v4177_v61 = vrot.slane %v4130_v9, 5 }
 0xe8e   :  { %v4182_v45 = vrot.slane %v4130_v9, 6  ;;  %v4187_v43 = vrot.slane %v4130_v9, 7  ;;  %v4174_v52 = vrot.slane %v4130_v9, 4 }
 0xe8f   :  { %4159 = vrot.lane.b32.xlu0 %v4158_v30, %s4996_s8 }
 0xe94   :  { %v4111_v27 = vpop.f32.mrf.mxu1  ;;  %v4133_v44 = vpop.f32.mrf.mxu0 }
 0xe97   :  { %4164 = vrot.lane.b32.xlu0 %v4163_v17, %s4995_s2 }
 0xe9c   :  { %v4152_v12 = vpop.f32.mrf.mxu1 }
 0xe9f   :  { %4169 = vrot.lane.b32.xlu0 %v4168_v13, %s4994_s26 }
 0xea4   :  { %v4154_v36 = vpop.f32.mrf.mxu1 }
 0xea5   :  { %v4194_v29 = vrot.slane %v4154_v36, 1 }
 0xea7   :  { %4178 = vrot.lane.b32.xlu0 %v4177_v61, %s4996_s8 }
 0xeaf   :  { %4183 = vrot.lane.b32.xlu0 %v4182_v45, %s4995_s2  ;;  %s4997_s2 = smov [#allocation2]  }
 0xeb7   :  { %4188 = vrot.lane.b32.xlu0 %v4187_v43, %s4994_s26 }
 0xebf   :  { %4195 = vrot.lane.b32.xlu0 %v4194_v29, %s4996_s8  ;;  %s4207_s8 = sshll.u32 %s4997_s2, 4  ;;  %s4208_s8 = int_to_ptr.vmem [resolvable:$true] %s4207_s8 }
 0xf01   :  { %v4160_v2 = vpop.permute.xlu0 %4159 }
 0xf02   :  { %v4162_v20 = vadd.f32 %v4160_v2, %v4108_v41 }
 0xf09   :  { %v4165_v50 = vpop.permute.xlu0 %4164 }
 0xf0a   :  { %v4167_v23 = vadd.f32 %v4165_v50, %v4162_v20 }
 0xf11   :  { %v4170_v53 = vpop.permute.xlu0 %4169 }
 0xf12   :  { %v4172_v31 = vadd.f32 %v4170_v53, %v4167_v23 }
 0xf14   :  { %v4176_v6 = vadd.f32 %v4174_v52, %v4172_v31 }
 0xf19   :  { %v4179_v55 = vpop.permute.xlu0 %4178 }
 0xf1a   :  { %v4181_v11 = vadd.f32 %v4179_v55, %v4176_v6 }
 0xf21   :  { %v4184_v22 = vpop.permute.xlu0 %4183 }
 0xf22   :  { %v4186_v32 = vadd.f32 %v4184_v22, %v4181_v11 }
 0xf29   :  { %v4189_v28 = vpop.permute.xlu0 %4188 }
 0xf2a   :  { %v4191_v57 = vadd.f32 %v4189_v28, %v4186_v32 }
 0xf2c   :  { %v4192_v49 = vadd.f32 %v4191_v57, %v4154_v36 }
 0xf31   :  { %v4196_v5 = vpop.permute.xlu0 %4195 }
 0xf32   :  { %v4198_v25 = vadd.f32 %v4196_v5, %v4192_v49 }
 0xf34   :  { %v4200_v58 = vadd.f32 %v4199_v15, %v4198_v25 }
 0xf36   :  { %4201 = vst.msk [vmem:[#allocation2 + $0x3] sm:$0x1] %vm1086_vm6, %v4200_v58 }
 0xf37   :  { %4212 = dma.vmem_to_hbm [thread:$0]  %s4208_s8, 64, %s4210_s6, [#allocation3]  }
 0xf38   :  { %4988 = dma.done.wait [#allocation3], 64  }
 0xf39   :  { %4989 = vsyncadd [#allocation3], 4294967232 }
 0xf3a   :  { %4217 = vsyncpa [#allocation3], 1 }

</bundles_post_ra>
